<compile_context>
chip_gen: v5e
topology: v5e:2x2
jax: 0.10.0
libtpu: 0.0.40
codegen_flags: <defaults>
</compile_context>

<pallas_src>
import functools

import jax
import jax.numpy as jnp
from jax.experimental import pallas as pl
from jax.experimental.pallas import tpu as pltpu

_LANES = 128
_LANE_WIDTHS = (4096, 2048, 1024, 512, 256, 128)   # widest divisor wins
_VMEM_LIMIT_BYTES = 32 * 1024 * 1024                # explicit scoped-VMEM cap


def _round_up(n, m):
    return ((n + m - 1) // m) * m


@functools.lru_cache(maxsize=1)
def _tpu_generation():
    """Best-effort TPU generation from device_kind; unknown -> treat as v6-class."""
    try:
        kind = jax.devices()[0].device_kind.lower()
    except Exception:
        return 6
    if "v7" in kind or "7x" in kind:
        return 7
    for gen in (6, 5, 4, 3, 2):
        if f"v{gen}" in kind:
            return gen
    return 6


@functools.lru_cache(maxsize=1)
def _tuning():
    gen = _tpu_generation()
    if gen >= 7:
        return dict(
            target_block_bytes=4 * 1024 * 1024,  # 3.2 TB/s: bigger blocks hide step overhead
            min_grid_steps=4,                    # 2 TCs -> keep >=2 steps per core
            small_input_bytes=512 * 1024,        # launch overhead dominates below this
            native_bf16=True,
        )
    return dict(
        target_block_bytes=2 * 1024 * 1024,
        min_grid_steps=2,                        # single TC: grid is a serial loop
        small_input_bytes=256 * 1024,
        native_bf16=(gen >= 6),                  # v6e has bf16 VPU/EUP; v5e and older do not
    )


def _make_lambda_kernel(func, out_dtype, compute_f32):
    def kernel(x_ref, o_ref):
        x = x_ref[...]
        if compute_f32:
            # Pre-v6 chips have no bf16 VPU/EUP path; compute in f32, cast on store.
            x = x.astype(jnp.float32)
        o_ref[...] = func(x).astype(out_dtype)
    return kernel


class Lambda:
    """JAX/Pallas equivalent of M3PA's `Lambda(nn.Module)`: forward(x) = func(x)."""

    def __init__(self, func, elementwise=True, donate_input=True):
        self.func = func
        self.elementwise = elementwise
        self.donate_input = donate_input

    def __call__(self, x):
        out_sds = jax.eval_shape(self.func, x)

        # Shape-changing lambdas (view/permute glue) and explicitly
        # non-elementwise funcs: no elementwise hot path -> apply directly.
        if (not self.elementwise) or (out_sds.shape != x.shape):
            return self.func(x)

        tune = _tuning()
        in_item = jnp.dtype(x.dtype).itemsize
        out_item = jnp.dtype(out_sds.dtype).itemsize
        n = x.size

        # Tiny activations: pallas_call launch/pipeline prologue dominates;
        # XLA's fused elementwise is already roofline-bound there.
        if n * in_item < tune["small_input_bytes"]:
            return self.func(x)

        # Stream the 128-aligned prefix through the kernel; the <128-element
        # tail (if any) is evaluated directly and stitched back afterwards.
        flat = x.reshape(-1)
        aligned = (n // _LANES) * _LANES
        tail_len = n - aligned
        head = jax.lax.slice(flat, (0,), (aligned,)) if tail_len else flat

        # Widest lane dim that divides the aligned element count: lane-dense,
        # wide output slabs -> fewer row iterations / better vst utilization.
        lane = _LANES
        for c in _LANE_WIDTHS:
            if aligned % c == 0:
                lane = c
                break
        rows = aligned // lane
        x2d = head.reshape(rows, lane)

        # Sublane granule from the NARROWER of in/out dtypes (8 rows f32,
        # 16 bf16/f16, 32 int8/bool) so packed output tiles stay store-aligned.
        granule = 8 * max(1, 4 // min(in_item, out_item))
        buf_item = max(in_item, out_item)
        # Target ~2-4 MiB per block buffer, rounded to the granule...
        target_rows = max(granule, tune["target_block_bytes"] // (lane * buf_item))
        target_rows = (target_rows // granule) * granule
        # ...but keep enough grid steps for pipelining / megacore sharding.
        cap_rows = _round_up(pl.cdiv(rows, tune["min_grid_steps"]), granule)
        tile_rows = max(granule, min(target_rows, cap_rows))
        tile_rows = min(tile_rows, _round_up(rows, granule))
        grid = (pl.cdiv(rows, tile_rows),)   # ragged row tail handled by Pallas masking

        compute_f32 = (jnp.issubdtype(x.dtype, jnp.floating)
                       and in_item < 4
                       and not tune["native_bf16"])

        # Donate the 2-D staging view when dtypes match: halves peak HBM
        # footprint (x2d is a fresh buffer in eager; XLA copy-protects under jit).
        io_alias = {0: 0} if (self.donate_input and out_sds.dtype == x.dtype) else {}

        y2d = pl.pallas_call(
            _make_lambda_kernel(self.func, out_sds.dtype, compute_f32),
            out_shape=jax.ShapeDtypeStruct((rows, lane), out_sds.dtype),
            grid=grid,
            in_specs=[pl.BlockSpec((tile_rows, lane), lambda i: (i, 0))],
            out_specs=pl.BlockSpec((tile_rows, lane), lambda i: (i, 0)),
            input_output_aliases=io_alias,
            compiler_params=pltpu.CompilerParams(
                dimension_semantics=("parallel",),
                vmem_limit_bytes=_VMEM_LIMIT_BYTES),
        )(x2d)

        y = y2d.reshape(-1)
        if tail_len:
            tail = jax.lax.slice(flat, (aligned,), (n,))
            y = jnp.concatenate([y, self.func(tail).astype(out_sds.dtype)])
        return y.reshape(out_sds.shape)


if __name__ == "__main__":
    key = jax.random.PRNGKey(0)

    # Representative wrapped function (elementwise SiLU), as Lambda would
    # receive inside an nn.Sequential.
    func = lambda t: t * jax.nn.sigmoid(t)
    lam = Lambda(func)

    # 1) Small NCHW activation (2,4,16,16): exercises the small-input fallback.
    x_small = jax.random.normal(key, (2, 4, 16, 16), dtype=jnp.float32)
    out_small = jax.block_until_ready(lam(x_small))
    ref_small = func(x_small)
    assert out_small.shape == ref_small.shape and out_small.dtype == ref_small.dtype
    assert jnp.allclose(out_small, ref_small, atol=1e-5, rtol=1e-5)

    # 2) Larger, 128-aligned activation (1 MiB): Pallas kernel path, wide lanes.
    x_big = jax.random.normal(jax.random.fold_in(key, 1),
                              (4, 8, 64, 128), dtype=jnp.float32)
    out_big = jax.block_until_ready(lam(x_big))
    ref_big = func(x_big)
    assert out_big.shape == ref_big.shape and out_big.dtype == ref_big.dtype
    assert jnp.allclose(out_big, ref_big, atol=1e-5, rtol=1e-5)

    # 3) Ragged size (n % 128 != 0): aligned-prefix kernel + direct tail stitch.
    x_rag = jax.random.normal(jax.random.fold_in(key, 2),
                              (3, 7, 111, 97), dtype=jnp.float32)
    out_rag = jax.block_until_ready(lam(x_rag))
    ref_rag = func(x_rag)
    assert out_rag.shape == ref_rag.shape
    assert jnp.allclose(out_rag, ref_rag, atol=1e-5, rtol=1e-5)

    # 4) bf16 input: dtype-aware granule; native bf16 on v6e/v7x, f32 upcast on v5e.
    x_bf = jax.random.normal(jax.random.fold_in(key, 3),
                             (4, 8, 64, 128), dtype=jnp.bfloat16)
    out_bf = jax.block_until_ready(lam(x_bf))
    ref_bf = func(x_bf.astype(jnp.float32)).astype(jnp.bfloat16)
    assert out_bf.shape == x_bf.shape and out_bf.dtype == jnp.bfloat16
    assert jnp.allclose(out_bf.astype(jnp.float32), ref_bf.astype(jnp.float32),
                        atol=2e-2, rtol=2e-2)

    # 5) dtype-narrowing lambda (f32 -> bf16): granule derived from output dtype.
    func_nar = lambda t: (t * jax.nn.sigmoid(t)).astype(jnp.bfloat16)
    lam_nar = Lambda(func_nar)
    out_nar = jax.block_until_ready(lam_nar(x_big))
    ref_nar = func_nar(x_big)
    assert out_nar.shape == ref_nar.shape and out_nar.dtype == jnp.bfloat16
    assert jnp.allclose(out_nar.astype(jnp.float32), ref_nar.astype(jnp.float32),
                        atol=2e-2, rtol=2e-2)

    print("KERNEL_OK")
</pallas_src>

<mosaic_0001>
module attributes {stable_mosaic.version = 11 : i64} {
  func.func @kernel(%arg0: i32, %arg1: memref<32x4096xf32, #tpu.memory_space<vmem>>, %arg2: memref<32x4096xf32, #tpu.memory_space<vmem>>) attributes {dimension_semantics = [#tpu.dimension_semantics<parallel>], iteration_bounds = array<i64: 2>, scalar_prefetch = 0 : i64, scratch_operands = 0 : i64, tpu.core_type = #tpu.core_type<tc>, window_params = [{transform_indices = @transform_0, window_bounds = array<i64: 32, 4096>}, {transform_indices = @transform_1, window_bounds = array<i64: 32, 4096>}]} {
    %c0 = arith.constant 0 : index
    %c0_0 = arith.constant 0 : index
    %0 = vector.load %arg1[%c0, %c0_0] : memref<32x4096xf32, #tpu.memory_space<vmem>>, vector<32x4096xf32>
    %1 = arith.negf %0 : vector<32x4096xf32>
    %2 = math.exp %1 : vector<32x4096xf32>
    %cst = arith.constant 1.000000e+00 : f32
    %3 = vector.broadcast %cst : f32 to vector<32x4096xf32>
    %4 = arith.addf %3, %2 : vector<32x4096xf32>
    %5 = arith.divf %3, %4 : vector<32x4096xf32>
    %6 = arith.mulf %0, %5 : vector<32x4096xf32>
    %c0_1 = arith.constant 0 : index
    %c0_2 = arith.constant 0 : index
    %7 = vector.load %arg2[%c0_1, %c0_2] : memref<32x4096xf32, #tpu.memory_space<vmem>>, vector<32x4096xf32>
    tpu.vector_store %arg2[%c0_1, %c0_2], %6 {strides = array<i32>} : memref<32x4096xf32, #tpu.memory_space<vmem>>, vector<32x4096xf32>,
    return
  }
  func.func @transform_0(%arg0: i32) -> (i32, i32) {
    %c0_i32 = arith.constant 0 : i32
    %c0_i32_0 = arith.constant 0 : i32
    return %arg0, %c0_i32 : i32, i32
  }
  func.func @transform_1(%arg0: i32) -> (i32, i32) {
    %c0_i32 = arith.constant 0 : i32
    %c0_i32_0 = arith.constant 0 : i32
    return %arg0, %c0_i32 : i32, i32
  }
}

</mosaic_0001>

<bundles_post_ra>
// kernel: tpu_custom_call.1
= control target key start
LH: loop header
LB: loop body
LE: loop exit
PB: predicated region body
PF: predicated region fallthrough
CT: control target
= control target key end

     0   :  { %6 = vsyncpa [#allocation3], 0  ;;  %s7564_s0 = inlined_call_operand.hbm [shape: f32[64,4096], index: 0, kind: input, shape index: {}, may-alias: {0,1}]   ;;  %s7565_s1 = inlined_call_operand.hbm [shape: f32[64,4096], index: 1, kind: output, shape index: {}, may-alias: {0,1}]  }
   0x1   :  { %8 = vsyncpa [#allocation3 + $0x1], 0 }
   0x2   :  { %9 = vsyncpa [#allocation4], 0 }
   0x3   :  { %11 = vsyncpa [#allocation4 + $0x1], 0  ;;  %s3868_s6 = smov 0   ;;  %s3870_s7 = smov 0  }
   0x4   :  { %s3872_s8 = smov 0   ;;  %s3874_s9 = smov 0  }
   0x5 LB: > { %s3889_s10 = sadd.s32 4294967295, %s3852_s9   ;;  %s3046_s11 = sadd.s32 4294967294, %s3852_s9   ;;  %s3852_s9 = sphi %s3874_s9, %s8064_s9   ;;  %s3848_s8 = sphi %s3872_s8, %s8063_s8   ;;  %s3844_s7 = sphi %s3870_s7, %s8062_s7   ;;  %s3840_s6 = sphi %s3868_s6, %s8061_s6  }
   0x6   : > { %s3893_s12 = sadd.s32 1, %s3852_s9   ;;  %s24_s13 = sadd.s32 1, %s3848_s8 }
   0x7   : > { %s21_s14 = ssub.s32 %s3852_s9, %s3893_s12  ;;  %p31_p0 = scmp.ne.s32.totalorder %s3848_s8, %s3844_s7 }
   0x8   : > { %p22_p1 = scmp.eq.s32.totalorder %s21_s14, 0  ;;  %p32_p2 = scmp.eq.s32.totalorder %s3852_s9, 0 }
   0x9   : > { %p37_p3 = scmp.ne.s32.totalorder %s3844_s7, %s3840_s6  ;;  %p38_p4 = scmp.eq.s32.totalorder %s3889_s10, 0 }
   0xa   : > { %s3905_s15 = scalar_select %p22_p1, %s3848_s8, %s24_s13  }
   0xb   : > { %p3907_p5 = por %p32_p2, %p31_p0  ;;  %p3911_p6 = por %p38_p4, %p37_p3 }
   0xc   : > { %p61_p7 = scmp.eq.s32.totalorder %s3889_s10, 1  ;;  %p67_p8 = scmp.eq.s32.totalorder %s3046_s11, 1 }
   0xd   : > { %p3206_p10 = scmp.lt.s32.totalorder %s3852_s9, 2  ;;  %s87_s20 = sand.u32 1, %s3848_s8  }
   0xe   : > { %p3918_p11 = por %p61_p7, %p31_p0  ;;  %p3922_p12 = por %p67_p8, %p37_p3 }
   0xf   : > { %s3191_s21 = sshll.u32 %s3852_s9, 10  ;;  %s3049_s22 = sshll.u32 %s87_s20, 10 }
  0x10   : > { %s97_s25 = scalar_lea.hbm %s7564_s0, %s3191_s21  ;;  %s91_s27 = scalar_lea.vmem [#allocation2], %s3049_s22 }
  0x11   : > { %s98_s26 = sshll.u32 %s97_s25, 4  ;;  %s100_s28 = sshll.u32 %s91_s27, 4  ;;  %s99_s26 = int_to_ptr.hbm [resolvable:$true] %s98_s26  ;;  %s101_s28 = int_to_ptr.vmem [resolvable:$true] %s100_s28 }
  0x12   : > { %p3933_p13 = pnand %p3206_p10, %p3907_p5  ;;  %p3053_p0 = scmp.ge.s32.totalorder %s3852_s9, 1 }
  0x13   : > { %p108_p1 = scmp.lt.s32.totalorder %s3852_s9, 3  ;;  %s88_s30 = scalar_lea.sflag [#allocation3], %s87_s20 }
  0x14   : > { %s3756_s2 = sshra.s32 %s99_s26, 4  ;;  %p3760_p3 = pneg %p3933_p13  ;;  %s3757_s2 = int_to_ptr.hbm [resolvable:$true] %s3756_s2 }
  0x15   : > { %s3758_s3 = scalar_lea.hbm %s3757_s2, 1024  ;;  %s3763_s11 = scalar_lea.hbm %s7564_s0, 2048 }
  0x16   : > { %p3759_p2 = scmp.ne.s32.totalorder %s3757_s2, %s3758_s3  ;;  %p3764_p5 = scmp.lt.s32.totalorder %s3757_s2, %s7564_s0 }
  0x17   : > { %p3765_p8 = scmp.lt.s32.totalorder %s3763_s11, %s3758_s3 }
  0x18   : > { %p3761_p4 = pnand %p3760_p3, %p3759_p2 }
  0x19   : > { %p3766_p10 = por %p3765_p8, %p3764_p5 }
  0x1a   : > { %p3762_p7 = pneg %p3761_p4 }
  0x1c   : > { %p3767_p9 = pnand %p3766_p10, %p3762_p7 }
  0x1e   : > { %3770 = shalt.err (!%p3767_p9)
}
  0x1f   : > { %s3854_s16 = smov 4096   ;;  %s3855_s20 = smov 256  }
  0x20   : > { %3201 = dma.hbm_to_vmem [thread:$0]  (!%p3933_p13), %s99_s26, 16384, %s101_s28, %s88_s30, %s3854_s16, %s3854_s16, %s3855_s20  }
  0x21   : > { %p109_p2 = pnand %p3053_p0, %p108_p1 }
  0x22   : > { %s3954_s21 = sand.u32 (!%p109_p2), 1, %s3844_s7  }
  0x23   : > { %112 = sbr.rel (%p109_p2) target bundleno = 607 (0x25f), region = 24  ;;  %s3054_s22 = sshll.u32 (!%p109_p2), %s3954_s21, 10 }
  0x24   : > { %s115_s23 = scalar_lea.sflag (!%p109_p2), [#allocation3], %s3954_s21  ;;  %s3960_s24 = scalar_lea.vmem (!%p109_p2), [#allocation2], %s3054_s22 }
  0x28   : > { %3831 = dma.done.wait (%p3911_p6), %s115_s23, 16384  }
  0x29   : > { %3833 = vsyncadd (%p3911_p6), %s115_s23, 4294950912  ;;  %v3967_v0 = vld [vmem:[%s3960_s24] sm:$0xff]  ;;  %v3970_v1 = vld [vmem:[%s3960_s24 + $0x8] sm:$0xff]  ;;  %s4122_s17 = scalar_lea.vmem [#allocation5], %s3054_s22  ;;  %s3193_s25 = sshll.u32 %s3889_s10, 10 }
  0x2a   : > { %v3973_v2 = vld [vmem:[%s3960_s24 + $0x10] sm:$0xff]  ;;  %v3056_v3 = vmul.f32 -1.442695, %v3967_v0  ;;  %v3057_v4 = vmul.f32 -1.442695, %v3970_v1  ;;  %v3979_v6 = vld [vmem:[%s3960_s24 + $0x18] sm:$0xff]  ;;  %s2969_s27 = scalar_lea.hbm %s7565_s1, %s3193_s25 }
  0x2b   : > { %v3058_v5 = vmul.f32 -1.442695, %v3973_v2  ;;  %v3982_v7 = vld [vmem:[%s3960_s24 + $0x20] sm:$0xff]  ;;  %v3985_v8 = vld [vmem:[%s3960_s24 + $0x28] sm:$0xff]  ;;  %v3059_v9 = vmul.f32 -1.442695, %v3979_v6 }
  0x2c   : > { %3244 = vpow2.f32 %v3056_v3  ;;  %v3060_v10 = vmul.f32 -1.442695, %v3982_v7  ;;  %v3061_v11 = vmul.f32 -1.442695, %v3985_v8  ;;  %v3991_v12 = vld [vmem:[%s3960_s24 + $0x30] sm:$0xff]  ;;  %v3994_v13 = vld [vmem:[%s3960_s24 + $0x38] sm:$0xff] }
  0x2d   : > { %3246 = vpow2.f32 %v3057_v4  ;;  %v3062_v14 = vmul.f32 -1.442695, %v3991_v12  ;;  %v3063_v15 = vmul.f32 -1.442695, %v3994_v13  ;;  %v3999_v16 = vld [vmem:[%s3960_s24 + $0x40] sm:$0xff]  ;;  %s2970_s28 = sshll.u32 %s4122_s17, 4  ;;  %s2971_s28 = int_to_ptr.vmem [resolvable:$true] %s2970_s28 }
  0x2e   : > { %3248 = vpow2.f32 %v3058_v5  ;;  %v3064_v22 = vmul.f32 -1.442695, %v3999_v16  ;;  %v4183_v63 = vld [vmem:[%s3960_s24 + $0x60] sm:$0xff]  ;;  %s2972_s29 = sshll.u32 %s2969_s27, 4  ;;  %s2957_s30 = scalar_lea.sflag [#allocation4], %s3954_s21  ;;  %s2973_s29 = int_to_ptr.hbm [resolvable:$true] %s2972_s29 }
  0x2f   : > { %3250 = vpow2.f32 %v3059_v9  ;;  %s3800_s2 = sshra.s32 %s2973_s29, 4  ;;  %s3806_s11 = scalar_lea.hbm %s7565_s1, 2048  ;;  %s3801_s2 = int_to_ptr.hbm [resolvable:$true] %s3800_s2 }
  0x30   : > { %3252 = vpow2.f32 %v3060_v10  ;;  %s3802_s3 = scalar_lea.hbm %s3801_s2, 1024  ;;  %p3807_p0 = scmp.lt.s32.totalorder %s3801_s2, %s7565_s1 }
  0x31   : > { %3254 = vpow2.f32 %v3061_v11  ;;  %p3803_p6 = scmp.ne.s32.totalorder %s3801_s2, %s3802_s3  ;;  %p3808_p1 = scmp.lt.s32.totalorder %s3806_s11, %s3802_s3 }
  0x32   : > { %v3245_v17 = vpop.eup %3244  ;;  %3256 = vpow2.f32 %v3062_v14  ;;  %v4196_v14 = vld [vmem:[%s3960_s24 + $0x78] sm:$0xff] }
  0x33   : > { %v3247_v18 = vpop.eup %3246  ;;  %v4001_v19 = vadd.f32 1.0, %v3245_v17  ;;  %3258 = vpow2.f32 %v3063_v15  ;;  %p3804_p9 = pnand %p3803_p6, %p3918_p11  ;;  %p3809_p3 = por %p3808_p1, %p3807_p0 }
  0x34   : > { %v3249_v20 = vpop.eup %3248  ;;  %v4003_v21 = vadd.f32 1.0, %v3247_v18 }
  0x35   : > { %v3251_v23 = vpop.eup %3250  ;;  %3260 = vrcp.f32 %v4001_v19  ;;  %v791_v24 = vand.u32 2147483648, %v4001_v19  ;;  %v789_v26 = vand.u32 2147483647, %v4001_v19  ;;  %v4012_v30 = vadd.f32 1.0, %v3249_v20  ;;  %p3805_p13 = pneg %p3804_p9 }
  0x36   : > { %v3253_v25 = vpop.eup %3252  ;;  %3262 = vrcp.f32 %v4003_v21  ;;  %v804_v28 = vand.u32 2147483647, %v4003_v21  ;;  %v806_v29 = vand.u32 2147483648, %v4003_v21  ;;  %v4014_v31 = vadd.f32 1.0, %v3251_v23 }
  0x37   : > { %v3255_v27 = vpop.eup %3254  ;;  %vm785_vm0 = vweird.f32 %v4001_v19  ;;  %v4017_v32 = vadd.f32 1.0, %v3253_v25  ;;  %3264 = vpow2.f32 %v3064_v22  ;;  %v4019_v34 = vor.u32 1.1754944e-38, %v791_v24  ;;  %p3810_p4 = pnand %p3809_p3, %p3805_p13 }
  0x38   : > { %v3257_v33 = vpop.eup %3256  ;;  %vm800_vm1 = vweird.f32 %v4003_v21  ;;  %3266 = vrcp.f32 %v4012_v30  ;;  %v821_v35 = vand.u32 2147483648, %v4012_v30  ;;  %vm4024_vm2 = vcmp.eq.f32.partialorder %v789_v26, 8.507059e+37 }
  0x39   : > { %v3259_v36 = vpop.eup %3258  ;;  %v819_v38 = vand.u32 2147483647, %v4012_v30  ;;  %3268 = vrcp.f32 %v4014_v31  ;;  %v836_v39 = vand.u32 2147483648, %v4014_v31  ;;  %v4031_v40 = vadd.f32 1.0, %v3255_v27 }
  0x3a   : > { %vm4033_vm3 = vcmp.eq.f32.partialorder %v804_v28, 8.507059e+37  ;;  %v807_v43 = vor.u32 1.1754944e-38, %v806_v29  ;;  %vm815_vm4 = vweird.f32 %v4012_v30  ;;  %v834_v44 = vand.u32 2147483647, %v4014_v31 }
  0x3b   : > { %v3261_v41 = vpop.eup %3260  ;;  %3270 = vrcp.f32 %v4017_v32  ;;  %v4041_v47 = vor.u32 1.1754944e-38, %v821_v35  ;;  %vm830_vm5 = vweird.f32 %v4014_v31  ;;  %vm845_vm6 = vweird.f32 %v4017_v32 }
  0x3c   : > { %v3263_v45 = vpop.eup %3262  ;;  %v781_v46 = vmul.f32 %v3261_v41, %v4001_v19  ;;  %vm786_vm7 = vweird.f32 %v3261_v41  ;;  %v849_v49 = vand.u32 2147483647, %v4017_v32  ;;  %v851_v50 = vand.u32 2147483648, %v4017_v32 }
  0x3d   : > { %v796_v48 = vmul.f32 %v3263_v45, %v4003_v21  ;;  %v3265_v51 = vpop.eup %3264  ;;  %vm801_vm8 = vweird.f32 %v3263_v45  ;;  %vm4048_vm9 = vcmp.eq.f32.partialorder %v819_v38, 8.507059e+37  ;;  %v4052_v54 = vor.u32 1.1754944e-38, %v836_v39  ;;  %vm4070_vm13 = vmor %vm785_vm0, %vm786_vm7 }
  0x3e   : > { %v782_v52 = vsub.f32 1.0, %v781_v46  ;;  %3272 = vrcp.f32 %v4031_v40  ;;  %v3267_v55 = vpop.eup %3266  ;;  %vm4055_vm10 = vcmp.eq.f32.partialorder %v834_v44, 8.507059e+37  ;;  %v864_v58 = vand.u32 2147483647, %v4031_v40  ;;  %vm4078_vm11 = vmor %vm800_vm1, %vm801_vm8 }
  0x3f   : > { %v797_v56 = vsub.f32 1.0, %v796_v48  ;;  %v866_v59 = vand.u32 2147483648, %v4031_v40  ;;  %v3269_v60 = vpop.eup %3268  ;;  %v811_v62 = vmul.f32 %v3267_v55, %v4012_v30  ;;  %vm4063_vm12 = vcmp.eq.f32.partialorder %v849_v49, 8.507059e+37  ;;  %v4138_v48 = vld [vmem:[%s3960_s24 + $0x48] sm:$0xff]  ;;  %v4141_v49 = vld [vmem:[%s3960_s24 + $0x50] sm:$0xff] }
  0x40   : > { %v783_v61 = vmul.f32 %v3261_v41, %v782_v52  ;;  %v852_v3 = vor.u32 1.1754944e-38, %v851_v50  ;;  %vm816_vm14 = vweird.f32 %v3267_v55  ;;  %v826_v10 = vmul.f32 %v3269_v60, %v4014_v31 }
  0x41   : > { %v3271_v4 = vpop.eup %3270  ;;  %v798_v9 = vmul.f32 %v3263_v45, %v797_v56  ;;  %vm831_vm15 = vweird.f32 %v3269_v60  ;;  %v812_v15 = vsub.f32 1.0, %v811_v62  ;;  %v867_v18 = vor.u32 1.1754944e-38, %v866_v59  ;;  %vm4097_vm1 = vmor %vm815_vm4, %vm816_vm14 }
  0x42   : > { %v784_v11 = vadd.f32 %v3261_v41, %v783_v61  ;;  %v841_v17 = vmul.f32 %v3271_v4, %v4017_v32  ;;  %v827_v20 = vsub.f32 1.0, %v826_v10  ;;  %vm846_vm0 = vweird.f32 %v3271_v4 }
  0x43   : > { %v799_v19 = vadd.f32 %v3263_v45, %v798_v9  ;;  %v4083_v22 = vadd.f32 1.0, %v3257_v33  ;;  %v813_v25 = vmul.f32 %v3267_v55, %v812_v15  ;;  %v4087_v21 = vadd.f32 1.0, %v3259_v36  ;;  %vm4116_vm4 = vmor %vm845_vm6, %vm846_vm0 }
  0x44   : > { %v3273_v23 = vpop.eup %3272  ;;  %v788_v24 = vsel %vm4070_vm13, %v3261_v41, %v784_v11  ;;  %v842_v26 = vsub.f32 1.0, %v841_v17  ;;  %v828_v33 = vmul.f32 %v3269_v60, %v827_v20  ;;  %v4128_v32 = vadd.f32 1.0, %v3265_v51  ;;  %v4193_v11 = vld [vmem:[%s3960_s24 + $0x70] sm:$0xff]  ;;  %v4201_v17 = vld [vmem:[%s3960_s24 + $0x80] sm:$0xff] }
  0x45   : > { %v793_v27 = vsel %vm4024_vm2, %v4019_v34, %v788_v24  ;;  %v803_v28 = vsel %vm4078_vm11, %v3263_v45, %v799_v19  ;;  %v856_v35 = vmul.f32 %v3273_v23, %v4031_v40  ;;  %v814_v38 = vadd.f32 %v3267_v55, %v813_v25  ;;  %vm4108_vm2 = vmor %vm830_vm5, %vm831_vm15 }
  0x46   : > { %v2700_v36 = vmul.f32 %v793_v27, %v3967_v0  ;;  %v808_v37 = vsel %vm4033_vm3, %v807_v43, %v803_v28  ;;  %v843_v30 = vmul.f32 %v3271_v4, %v842_v26  ;;  %v829_v41 = vadd.f32 %v3269_v60, %v828_v33 }
  0x47   : > { %v2701_v39 = vmul.f32 %v808_v37, %v3970_v1  ;;  %v857_v42 = vsub.f32 1.0, %v856_v35  ;;  %vm861_vm3 = vweird.f32 %v3273_v23  ;;  %v818_v1 = vsel %vm4097_vm1, %v3267_v55, %v814_v38  ;;  %v4158_v55 = vld [vmem:[%s3960_s24 + $0x58] sm:$0xff] }
  0x48   : > { %2828 = vst [vmem:[%s4122_s17] sm:$0xff] %v2700_v36  ;;  %v844_v31 = vadd.f32 %v3271_v4, %v843_v30  ;;  %3274 = vrcp.f32 %v4083_v22  ;;  %v823_v43 = vsel %vm4048_vm9, %v4041_v47, %v818_v1  ;;  %v833_v44 = vsel %vm4108_vm2, %v3269_v60, %v829_v41 }
  0x49   : > { %2829 = vst [vmem:[%s4122_s17 + $0x8] sm:$0xff] %v2701_v39  ;;  %v858_v45 = vmul.f32 %v3273_v23, %v857_v42  ;;  %v879_v46 = vand.u32 2147483647, %v4083_v22  ;;  %v2702_v50 = vmul.f32 %v823_v43, %v3973_v2  ;;  %v838_v51 = vsel %vm4055_vm10, %v4052_v54, %v833_v44 }
  0x4a   : > { %v848_v47 = vsel %vm4116_vm4, %v3271_v4, %v844_v31  ;;  %vm7591_vm5 = vweird.f32 %v4031_v40  ;;  %v881_v53 = vand.u32 2147483648, %v4083_v22  ;;  %v2703_v2 = vmul.f32 %v838_v51, %v3979_v6 }
  0x4b   : > { %vm4152_vm6 = vmor %vm7591_vm5, %vm861_vm3  ;;  %v853_v54 = vsel %vm4063_vm12, %v852_v3, %v848_v47  ;;  %v859_v56 = vadd.f32 %v3273_v23, %v858_v45  ;;  %vm865_vm7 = vcmp.eq.f32.partialorder %v864_v58, 8.507059e+37  ;;  %2830 = vst [vmem:[%s4122_s17 + $0x10] sm:$0xff] %v2702_v50  ;;  %3276 = vrcp.f32 %v4087_v21  ;;  %v4186_v3 = vld [vmem:[%s3960_s24 + $0x68] sm:$0xff] }
  0x4c   : > { %v2704_v57 = vmul.f32 %v853_v54, %v3982_v7  ;;  %v3065_v59 = vmul.f32 -1.442695, %v4138_v48  ;;  %v3066_v60 = vmul.f32 -1.442695, %v4141_v49  ;;  %2831 = vst [vmem:[%s4122_s17 + $0x18] sm:$0xff] %v2703_v2  ;;  %vm875_vm8 = vweird.f32 %v4083_v22  ;;  %v4251_v2 = vld [vmem:[%s3960_s24 + $0x90] sm:$0xff] }
  0x4d   : > { %v863_v6 = vsel %vm4152_vm6, %v3273_v23, %v859_v56  ;;  %3278 = vrcp.f32 %v4128_v32  ;;  %v3067_v40 = vmul.f32 -1.442695, %v4158_v55  ;;  %vm4177_vm9 = vcmp.eq.f32.partialorder %v879_v46, 8.507059e+37  ;;  %v4254_v54 = vld [vmem:[%s3960_s24 + $0x98] sm:$0xff] }
  0x4e   : > { %v3275_v7 = vpop.eup %3274  ;;  %2832 = vst [vmem:[%s4122_s17 + $0x20] sm:$0xff] %v2704_v57  ;;  %v868_v58 = vsel %vm865_vm7, %v867_v18, %v863_v6  ;;  %v882_v62 = vor.u32 1.1754944e-38, %v881_v53  ;;  %vm890_vm10 = vweird.f32 %v4087_v21  ;;  %v894_v9 = vand.u32 2147483647, %v4087_v21  ;;  %v4204_v18 = vld [vmem:[%s3960_s24 + $0x88] sm:$0xff] }
  0x4f   : > { %v2705_v4 = vmul.f32 %v868_v58, %v3985_v8  ;;  %v871_v5 = vmul.f32 %v3275_v7, %v4083_v22  ;;  %v896_v10 = vand.u32 2147483648, %v4087_v21  ;;  %vm876_vm11 = vweird.f32 %v3275_v7 }
  0x50   : > { %vm905_vm12 = vweird.f32 %v4128_v32  ;;  %v909_v15 = vand.u32 2147483647, %v4128_v32  ;;  %3280 = vpow2.f32 %v3065_v59  ;;  %v3068_v19 = vmul.f32 -1.442695, %v4183_v63  ;;  %vm4217_vm13 = vmor %vm875_vm8, %vm876_vm11 }
  0x51   : > { %2833 = vst [vmem:[%s4122_s17 + $0x28] sm:$0xff] %v2705_v4  ;;  %v872_v8 = vsub.f32 1.0, %v871_v5  ;;  %3282 = vpow2.f32 %v3066_v60  ;;  %v3069_v20 = vmul.f32 -1.442695, %v4186_v3  ;;  %v3277_v23 = vpop.eup %3276  ;;  %v911_v24 = vand.u32 2147483648, %v4128_v32 }
  0x52   : > { %3284 = vpow2.f32 %v3067_v40  ;;  %v3070_v25 = vmul.f32 -1.442695, %v4193_v11  ;;  %v3071_v26 = vmul.f32 -1.442695, %v4196_v14  ;;  %v886_v29 = vmul.f32 %v3277_v23, %v4087_v21 }
  0x53   : > { %v3279_v27 = vpop.eup %3278  ;;  %v873_v28 = vmul.f32 %v3275_v7, %v872_v8  ;;  %3286 = vpow2.f32 %v3068_v19  ;;  %v3072_v33 = vmul.f32 -1.442695, %v4201_v17  ;;  %vm4221_vm14 = vcmp.eq.f32.partialorder %v894_v9, 8.507059e+37 }
  0x54   : > { %v901_v37 = vmul.f32 %v3279_v27, %v4128_v32  ;;  %3288 = vpow2.f32 %v3069_v20  ;;  %v3073_v38 = vmul.f32 -1.442695, %v4204_v18  ;;  %v887_v30 = vsub.f32 1.0, %v886_v29  ;;  %v4263_v32 = vld [vmem:[%s3960_s24 + $0xa0] sm:$0xff] }
  0x55   : > { %v874_v34 = vadd.f32 %v3275_v7, %v873_v28  ;;  %vm891_vm15 = vweird.f32 %v3277_v23  ;;  %3290 = vpow2.f32 %v3070_v25  ;;  %v897_v41 = vor.u32 1.1754944e-38, %v896_v10 }
  0x56   : > { %v3281_v39 = vpop.eup %3280  ;;  %v902_v22 = vsub.f32 1.0, %v901_v37  ;;  %vm906_vm0 = vweird.f32 %v3279_v27  ;;  %3292 = vpow2.f32 %v3071_v26  ;;  %v888_v1 = vmul.f32 %v3277_v23, %v887_v30  ;;  %vm4235_vm1 = vmor %vm890_vm10, %vm891_vm15 }
  0x57   : > { %v3283_v0 = vpop.eup %3282  ;;  %v878_v42 = vsel %vm4217_vm13, %v3275_v7, %v874_v34  ;;  %v4229_v31 = vadd.f32 1.0, %v3281_v39  ;;  %3294 = vpow2.f32 %v3072_v33  ;;  %vm4245_vm2 = vmor %vm905_vm12, %vm906_vm0  ;;  %v912_v21 = vor.u32 1.1754944e-38, %v911_v24 }
  0x58   : > { %v3285_v43 = vpop.eup %3284  ;;  %v883_v44 = vsel %vm4177_vm9, %v882_v62, %v878_v42  ;;  %v903_v46 = vmul.f32 %v3279_v27, %v902_v22  ;;  %v4239_v50 = vadd.f32 1.0, %v3283_v0  ;;  %3296 = vpow2.f32 %v3073_v38 }
  0x59   : > { %v3287_v51 = vpop.eup %3286  ;;  %v2706_v47 = vmul.f32 %v883_v44, %v3991_v12  ;;  %v889_v52 = vadd.f32 %v3277_v23, %v888_v1  ;;  %3298 = vrcp.f32 %v4229_v31  ;;  %vm4256_vm4 = vcmp.eq.f32.partialorder %v909_v15, 8.507059e+37 }
  0x5a   : > { %v3289_v56 = vpop.eup %3288  ;;  %v904_v57 = vadd.f32 %v3279_v27, %v903_v46  ;;  %v924_v12 = vand.u32 2147483647, %v4229_v31  ;;  %3300 = vrcp.f32 %v4239_v50  ;;  %v926_v40 = vand.u32 2147483648, %v4229_v31 }
  0x5b   : > { %v3291_v60 = vpop.eup %3290  ;;  %2834 = vst [vmem:[%s4122_s17 + $0x30] sm:$0xff] %v2706_v47  ;;  %v893_v6 = vsel %vm4235_vm1, %v3277_v23, %v889_v52  ;;  %v939_v7 = vand.u32 2147483647, %v4239_v50  ;;  %v941_v58 = vand.u32 2147483648, %v4239_v50  ;;  %v4276_v5 = vmul.f32 -1.442695, %v4251_v2 }
  0x5c   : > { %v3293_v61 = vpop.eup %3292  ;;  %v898_v62 = vsel %vm4221_vm14, %v897_v41, %v893_v6  ;;  %v908_v4 = vsel %vm4245_vm2, %v3279_v27, %v904_v57  ;;  %v4279_v9 = vmul.f32 -1.442695, %v4254_v54  ;;  %vm920_vm3 = vweird.f32 %v4229_v31 }
  0x5d   : > { %v3295_v10 = vpop.eup %3294  ;;  %v2707_v15 = vmul.f32 %v898_v62, %v3994_v13  ;;  %v913_v8 = vsel %vm4256_vm4, %v912_v21, %v908_v4  ;;  %v4286_v19 = vmul.f32 -1.442695, %v4263_v32  ;;  %vm935_vm5 = vweird.f32 %v4239_v50 }
  0x5e   : > { %v3297_v20 = vpop.eup %3296  ;;  %v2708_v23 = vmul.f32 %v913_v8, %v3999_v16  ;;  %v4290_v24 = vadd.f32 1.0, %v3285_v43  ;;  %v4292_v25 = vadd.f32 1.0, %v3287_v51  ;;  %vm4295_vm6 = vcmp.eq.f32.partialorder %v924_v12, 8.507059e+37 }
  0x5f   : > { %v3299_v26 = vpop.eup %3298  ;;  %2835 = vst [vmem:[%s4122_s17 + $0x38] sm:$0xff] %v2707_v15  ;;  %v927_v27 = vor.u32 1.1754944e-38, %v926_v40  ;;  %vm4299_vm7 = vcmp.eq.f32.partialorder %v939_v7, 8.507059e+37  ;;  %v942_v29 = vor.u32 1.1754944e-38, %v941_v58  ;;  %v4306_v35 = vadd.f32 1.0, %v3289_v56 }
  0x60   : > { %v3301_v33 = vpop.eup %3300  ;;  %2836 = vst [vmem:[%s4122_s17 + $0x40] sm:$0xff] %v2708_v23  ;;  %v916_v16 = vmul.f32 %v3299_v26, %v4229_v31  ;;  %3302 = vrcp.f32 %v4290_v24  ;;  %v4308_v36 = vadd.f32 1.0, %v3291_v60  ;;  %v954_v38 = vand.u32 2147483647, %v4290_v24 }
  0x61   : > { %v931_v37 = vmul.f32 %v3301_v33, %v4239_v50  ;;  %v956_v34 = vand.u32 2147483648, %v4290_v24  ;;  %v4313_v30 = vadd.f32 1.0, %v3293_v61  ;;  %vm921_vm8 = vweird.f32 %v3299_v26 }
  0x62   : > { %v917_v39 = vsub.f32 1.0, %v916_v16  ;;  %3304 = vrcp.f32 %v4292_v25  ;;  %v4316_v41 = vadd.f32 1.0, %v3295_v10  ;;  %vm936_vm9 = vweird.f32 %v3301_v33  ;;  %vm4326_vm11 = vmor %vm920_vm3, %vm921_vm8 }
  0x63   : > { %v932_v22 = vsub.f32 1.0, %v931_v37  ;;  %v969_v0 = vand.u32 2147483647, %v4292_v25  ;;  %v971_v42 = vand.u32 2147483648, %v4292_v25  ;;  %vm950_vm10 = vweird.f32 %v4290_v24  ;;  %vm4337_vm14 = vmor %vm935_vm5, %vm936_vm9 }
  0x64   : > { %v918_v1 = vmul.f32 %v3299_v26, %v917_v39  ;;  %3306 = vrcp.f32 %v4306_v35  ;;  %v4322_v43 = vadd.f32 1.0, %v3297_v20  ;;  %vm4330_vm12 = vcmp.eq.f32.partialorder %v954_v38, 8.507059e+37 }
  0x65   : > { %v933_v45 = vmul.f32 %v3301_v33, %v932_v22  ;;  %v957_v51 = vor.u32 1.1754944e-38, %v956_v34  ;;  %vm965_vm13 = vweird.f32 %v4292_v25  ;;  %vm980_vm15 = vweird.f32 %v4306_v35 }
  0x66   : > { %v3303_v47 = vpop.eup %3302  ;;  %v919_v52 = vadd.f32 %v3299_v26, %v918_v1  ;;  %v984_v31 = vand.u32 2147483647, %v4306_v35  ;;  %3308 = vrcp.f32 %v4308_v36  ;;  %vm4345_vm0 = vcmp.eq.f32.partialorder %v969_v0, 8.507059e+37 }
  0x67   : > { %v934_v21 = vadd.f32 %v3301_v33, %v933_v45  ;;  %v946_v56 = vmul.f32 %v3303_v47, %v4290_v24  ;;  %v972_v59 = vor.u32 1.1754944e-38, %v971_v42  ;;  %v986_v50 = vand.u32 2147483648, %v4306_v35 }
  0x68   : > { %v3305_v12 = vpop.eup %3304  ;;  %v923_v60 = vsel %vm4326_vm11, %v3299_v26, %v919_v52  ;;  %vm951_vm1 = vweird.f32 %v3303_v47  ;;  %vm995_vm2 = vweird.f32 %v4308_v36  ;;  %v999_v6 = vand.u32 2147483647, %v4308_v36 }
  0x69   : > { %v928_v40 = vsel %vm4295_vm6, %v927_v27, %v923_v60  ;;  %v938_v7 = vsel %vm4337_vm14, %v3301_v33, %v934_v21  ;;  %v947_v58 = vsub.f32 1.0, %v946_v56  ;;  %v961_v61 = vmul.f32 %v3305_v12, %v4292_v25  ;;  %vm4372_vm5 = vmor %vm950_vm10, %vm951_vm1 }
  0x6a   : > { %v3307_v62 = vpop.eup %3306  ;;  %v2709_v4 = vmul.f32 %v928_v40, %v4138_v48  ;;  %v943_v10 = vsel %vm4299_vm7, %v942_v29, %v938_v7  ;;  %vm966_vm4 = vweird.f32 %v3305_v12  ;;  %vm4362_vm3 = vcmp.eq.f32.partialorder %v984_v31, 8.507059e+37 }
  0x6b   : > { %v2710_v8 = vmul.f32 %v943_v10, %v4141_v49  ;;  %v948_v20 = vmul.f32 %v3303_v47, %v947_v58  ;;  %v962_v23 = vsub.f32 1.0, %v961_v61  ;;  %v976_v26 = vmul.f32 %v3307_v62, %v4306_v35  ;;  %vm4384_vm7 = vmor %vm965_vm13, %vm966_vm4  ;;  %v4439_v58 = vld [vmem:[%s3960_s24 + $0xa8] sm:$0xff] }
  0x6c   : > { %v3309_v13 = vpop.eup %3308  ;;  %2837 = vst [vmem:[%s4122_s17 + $0x48] sm:$0xff] %v2709_v4  ;;  %vm981_vm6 = vweird.f32 %v3307_v62  ;;  %v1001_v27 = vand.u32 2147483648, %v4308_v36  ;;  %3310 = vrcp.f32 %v4313_v30  ;;  %v1014_v49 = vand.u32 2147483647, %v4313_v30 }
  0x6d   : > { %2838 = vst [vmem:[%s4122_s17 + $0x50] sm:$0xff] %v2710_v8  ;;  %v949_v28 = vadd.f32 %v3303_v47, %v948_v20  ;;  %v963_v29 = vmul.f32 %v3305_v12, %v962_v23  ;;  %v977_v33 = vsub.f32 1.0, %v976_v26  ;;  %v991_v16 = vmul.f32 %v3309_v13, %v4308_v36  ;;  %vm4400_vm10 = vmor %vm980_vm15, %vm981_vm6  ;;  %v4451_v8 = vld [vmem:[%s3960_s24 + $0xb0] sm:$0xff]  ;;  %v4454_v20 = vld [vmem:[%s3960_s24 + $0xb8] sm:$0xff] }
  0x6e   : > { %v987_v37 = vor.u32 1.1754944e-38, %v986_v50  ;;  %vm996_vm8 = vweird.f32 %v3309_v13  ;;  %vm4388_vm9 = vcmp.eq.f32.partialorder %v999_v6, 8.507059e+37  ;;  %3312 = vrcp.f32 %v4316_v41 }
  0x6f   : > { %v953_v34 = vsel %vm4372_vm5, %v3303_v47, %v949_v28  ;;  %v964_v39 = vadd.f32 %v3305_v12, %v963_v29  ;;  %v978_v22 = vmul.f32 %v3307_v62, %v977_v33  ;;  %v992_v0 = vsub.f32 1.0, %v991_v16  ;;  %vm4418_vm13 = vmor %vm995_vm2, %vm996_vm8 }
  0x70   : > { %v958_v25 = vsel %vm4330_vm12, %v957_v51, %v953_v34  ;;  %v1002_v1 = vor.u32 1.1754944e-38, %v1001_v27  ;;  %vm1010_vm11 = vweird.f32 %v4313_v30  ;;  %v1016_v44 = vand.u32 2147483648, %v4313_v30 }
  0x71   : > { %v2711_v45 = vmul.f32 %v958_v25, %v4158_v55  ;;  %v968_v47 = vsel %vm4384_vm7, %v3305_v12, %v964_v39  ;;  %v979_v46 = vadd.f32 %v3307_v62, %v978_v22  ;;  %v993_v51 = vmul.f32 %v3309_v13, %v992_v0  ;;  %v4491_v39 = vld [vmem:[%s3960_s24 + $0xc8] sm:$0xff] }
  0x72   : > { %vm4409_vm12 = vcmp.eq.f32.partialorder %v1014_v49, 8.507059e+37  ;;  %v3311_v35 = vpop.eup %3310  ;;  %v973_v53 = vsel %vm4345_vm0, %v972_v59, %v968_v47  ;;  %v1029_v55 = vand.u32 2147483647, %v4316_v41  ;;  %v1031_v21 = vand.u32 2147483648, %v4316_v41 }
  0x73   : > { %3314 = vrcp.f32 %v4322_v43  ;;  %2839 = vst [vmem:[%s4122_s17 + $0x58] sm:$0xff] %v2711_v45  ;;  %v2712_v56 = vmul.f32 %v973_v53, %v4183_v63  ;;  %v983_v57 = vsel %vm4400_vm10, %v3307_v62, %v979_v46  ;;  %v994_v59 = vadd.f32 %v3309_v13, %v993_v51 }
  0x74   : > { %v1006_v36 = vmul.f32 %v3311_v35, %v4313_v30  ;;  %v3313_v50 = vpop.eup %3312  ;;  %v988_v12 = vsel %vm4362_vm3, %v987_v37, %v983_v57  ;;  %vm1011_vm14 = vweird.f32 %v3311_v35  ;;  %v1017_v60 = vor.u32 1.1754944e-38, %v1016_v44 }
  0x75   : > { %vm1025_vm15 = vweird.f32 %v4316_v41  ;;  %2840 = vst [vmem:[%s4122_s17 + $0x60] sm:$0xff] %v2712_v56  ;;  %v2713_v63 = vmul.f32 %v988_v12, %v4186_v3  ;;  %v998_v6 = vsel %vm4418_vm13, %v3309_v13, %v994_v59  ;;  %v1021_v7 = vmul.f32 %v3313_v50, %v4316_v41  ;;  %vm4459_vm2 = vmor %vm1010_vm11, %vm1011_vm14  ;;  %v4483_v41 = vld [vmem:[%s3960_s24 + $0xc0] sm:$0xff] }
  0x76   : > { %v1007_v40 = vsub.f32 1.0, %v1006_v36  ;;  %v1003_v61 = vsel %vm4388_vm9, %v1002_v1, %v998_v6  ;;  %vm1026_vm0 = vweird.f32 %v3313_v50  ;;  %vm4443_vm1 = vcmp.eq.f32.partialorder %v1029_v55, 8.507059e+37 }
  0x77   : > { %v1032_v4 = vor.u32 1.1754944e-38, %v1031_v21  ;;  %2841 = vst [vmem:[%s4122_s17 + $0x68] sm:$0xff] %v2713_v63  ;;  %v2714_v3 = vmul.f32 %v1003_v61, %v4193_v11  ;;  %v1022_v15 = vsub.f32 1.0, %v1021_v7  ;;  %3316 = vpow2.f32 %v4276_v5  ;;  %vm4473_vm3 = vmor %vm1025_vm15, %vm1026_vm0 }
  0x78   : > { %v1008_v10 = vmul.f32 %v3311_v35, %v1007_v40  ;;  %vm1040_vm4 = vweird.f32 %v4322_v43  ;;  %v1044_v11 = vand.u32 2147483647, %v4322_v43  ;;  %3318 = vpow2.f32 %v4279_v9 }
  0x79   : > { %v3315_v23 = vpop.eup %3314  ;;  %v3077_v5 = vmul.f32 -1.442695, %v4439_v58  ;;  %2842 = vst [vmem:[%s4122_s17 + $0x70] sm:$0xff] %v2714_v3  ;;  %v1023_v48 = vmul.f32 %v3313_v50, %v1022_v15  ;;  %v1046_v30 = vand.u32 2147483648, %v4322_v43  ;;  %3320 = vpow2.f32 %v4286_v19 }
  0x7a   : > { %v1009_v13 = vadd.f32 %v3311_v35, %v1008_v10  ;;  %v1036_v27 = vmul.f32 %v3315_v23, %v4322_v43  ;;  %vm1041_vm5 = vweird.f32 %v3315_v23  ;;  %v3078_v9 = vmul.f32 -1.442695, %v4451_v8 }
  0x7b   : > { %v3079_v28 = vmul.f32 -1.442695, %v4454_v20  ;;  %v1024_v33 = vadd.f32 %v3313_v50, %v1023_v48  ;;  %3322 = vpow2.f32 %v3077_v5  ;;  %vm4498_vm6 = vmor %vm1040_vm4, %vm1041_vm5  ;;  %v3080_v1 = vmul.f32 -1.442695, %v4483_v41 }
  0x7c   : > { %v1013_v29 = vsel %vm4459_vm2, %v3311_v35, %v1009_v13  ;;  %v1037_v16 = vsub.f32 1.0, %v1036_v27  ;;  %3324 = vpow2.f32 %v3078_v9  ;;  %vm1045_vm7 = vcmp.eq.f32.partialorder %v1044_v11, 8.507059e+37 }
  0x7d   : > { %v1018_v24 = vsel %vm4409_vm12, %v1017_v60, %v1013_v29  ;;  %v3317_v37 = vpop.eup %3316  ;;  %v1028_v38 = vsel %vm4473_vm3, %v3313_v50, %v1024_v33  ;;  %3326 = vpow2.f32 %v3079_v28  ;;  %v3081_v43 = vmul.f32 -1.442695, %v4491_v39 }
  0x7e   : > { %v2715_v19 = vmul.f32 %v1018_v24, %v4196_v14  ;;  %v1038_v34 = vmul.f32 %v3315_v23, %v1037_v16  ;;  %v3319_v22 = vpop.eup %3318  ;;  %v1033_v0 = vsel %vm4443_vm1, %v1032_v4, %v1028_v38  ;;  %v1047_v14 = vor.u32 1.1754944e-38, %v1046_v30 }
  0x7f   : > { %v4502_v42 = vadd.f32 1.0, %v3317_v37  ;;  %v2716_v44 = vmul.f32 %v1033_v0, %v4201_v17  ;;  %v4507_v47 = vadd.f32 1.0, %v3319_v22  ;;  %v3321_v46 = vpop.eup %3320  ;;  %v4518_v17 = vld [vmem:[%s3960_s24 + $0xd0] sm:$0xff] }
  0x80   : > { %2843 = vst [vmem:[%s4122_s17 + $0x78] sm:$0xff] %v2715_v19  ;;  %v1039_v45 = vadd.f32 %v3315_v23, %v1038_v34  ;;  %v4523_v36 = vadd.f32 1.0, %v3321_v46  ;;  %v3082_v12 = vmul.f32 -1.442695, %v4518_v17 }
  0x81   : > { %3328 = vrcp.f32 %v4502_v42  ;;  %v3323_v51 = vpop.eup %3322  ;;  %2844 = vst [vmem:[%s4122_s17 + $0x80] sm:$0xff] %v2716_v44  ;;  %v1059_v35 = vand.u32 2147483647, %v4502_v42  ;;  %v1061_v53 = vand.u32 2147483648, %v4502_v42  ;;  %v1074_v21 = vand.u32 2147483647, %v4507_v47 }
  0x82   : > { %v1043_v52 = vsel %vm4498_vm6, %v3315_v23, %v1039_v45  ;;  %3330 = vrcp.f32 %v4507_v47  ;;  %v3325_v31 = vpop.eup %3324  ;;  %v1076_v59 = vand.u32 2147483648, %v4507_v47  ;;  %v4525_v50 = vadd.f32 1.0, %v3323_v51 }
  0x83   : > { %v1048_v55 = vsel %vm1045_vm7, %v1047_v14, %v1043_v52  ;;  %3332 = vpow2.f32 %v3080_v1  ;;  %v3327_v56 = vpop.eup %3326  ;;  %vm1055_vm8 = vweird.f32 %v4502_v42  ;;  %vm1070_vm9 = vweird.f32 %v4507_v47 }
  0x84   : > { %v2717_v57 = vmul.f32 %v1048_v55, %v4204_v18  ;;  %3334 = vpow2.f32 %v3081_v43  ;;  %vm4531_vm10 = vcmp.eq.f32.partialorder %v1059_v35, 8.507059e+37  ;;  %v1062_v63 = vor.u32 1.1754944e-38, %v1061_v53 }
  0x85   : > { %3336 = vrcp.f32 %v4523_v36  ;;  %v1091_v18 = vand.u32 2147483648, %v4523_v36  ;;  %v4537_v6 = vadd.f32 1.0, %v3325_v31  ;;  %vm4539_vm11 = vcmp.eq.f32.partialorder %v1074_v21, 8.507059e+37 }
  0x86   : > { %2845 = vst [vmem:[%s4122_s17 + $0x88] sm:$0xff] %v2717_v57  ;;  %v1089_v61 = vand.u32 2147483647, %v4523_v36  ;;  %3338 = vrcp.f32 %v4525_v50  ;;  %v4545_v62 = vadd.f32 1.0, %v3327_v56  ;;  %v1077_v10 = vor.u32 1.1754944e-38, %v1076_v59  ;;  %v4707_v59 = vld [vmem:[%s3960_s24 + $0x100] sm:$0xff] }
  0x87   : > { %v3329_v40 = vpop.eup %3328  ;;  %v1104_v15 = vand.u32 2147483647, %v4525_v50  ;;  %v1106_v23 = vand.u32 2147483648, %v4525_v50  ;;  %vm1085_vm12 = vweird.f32 %v4523_v36  ;;  %vm1100_vm13 = vweird.f32 %v4525_v50 }
  0x88   : > { %v3331_v4 = vpop.eup %3330  ;;  %v1051_v3 = vmul.f32 %v3329_v40, %v4502_v42  ;;  %3340 = vpow2.f32 %v3082_v12  ;;  %vm1056_vm14 = vweird.f32 %v3329_v40  ;;  %v1092_v13 = vor.u32 1.1754944e-38, %v1091_v18 }
  0x89   : > { %v3333_v26 = vpop.eup %3332  ;;  %v1066_v11 = vmul.f32 %v3331_v4, %v4507_v47  ;;  %3342 = vrcp.f32 %v4537_v6  ;;  %vm1071_vm15 = vweird.f32 %v3331_v4  ;;  %vm4554_vm0 = vcmp.eq.f32.partialorder %v1089_v61, 8.507059e+37  ;;  %vm4568_vm4 = vmor %vm1055_vm8, %vm1056_vm14 }
  0x8a   : > { %v1052_v5 = vsub.f32 1.0, %v1051_v3  ;;  %v3335_v48 = vpop.eup %3334  ;;  %v1119_v49 = vand.u32 2147483647, %v4537_v6  ;;  %3344 = vrcp.f32 %v4545_v62  ;;  %vm4560_vm1 = vcmp.eq.f32.partialorder %v1104_v15, 8.507059e+37  ;;  %vm4578_vm5 = vmor %vm1070_vm9, %vm1071_vm15 }
  0x8b   : > { %v1067_v27 = vsub.f32 1.0, %v1066_v11  ;;  %v3337_v9 = vpop.eup %3336  ;;  %v1107_v33 = vor.u32 1.1754944e-38, %v1106_v23  ;;  %vm1115_vm2 = vweird.f32 %v4537_v6  ;;  %v1121_v38 = vand.u32 2147483648, %v4537_v6 }
  0x8c   : > { %v1053_v28 = vmul.f32 %v3329_v40, %v1052_v5  ;;  %v3339_v16 = vpop.eup %3338  ;;  %v1081_v19 = vmul.f32 %v3337_v9, %v4523_v36  ;;  %vm1130_vm3 = vweird.f32 %v4545_v62  ;;  %v1134_v25 = vand.u32 2147483647, %v4545_v62 }
  0x8d   : > { %v1068_v37 = vmul.f32 %v3331_v4, %v1067_v27  ;;  %v1096_v0 = vmul.f32 %v3339_v16, %v4525_v50  ;;  %v1136_v14 = vand.u32 2147483648, %v4545_v62  ;;  %vm1086_vm6 = vweird.f32 %v3337_v9 }
  0x8e   : > { %v1054_v34 = vadd.f32 %v3329_v40, %v1053_v28  ;;  %v3341_v42 = vpop.eup %3340  ;;  %v1082_v44 = vsub.f32 1.0, %v1081_v19  ;;  %vm1101_vm7 = vweird.f32 %v3339_v16  ;;  %vm4585_vm8 = vcmp.eq.f32.partialorder %v1119_v49, 8.507059e+37  ;;  %vm4606_vm9 = vmor %vm1085_vm12, %vm1086_vm6  ;;  %v4674_v19 = vld [vmem:[%s3960_s24 + $0xe8] sm:$0xff] }
  0x8f   : > { %v1069_v1 = vadd.f32 %v3331_v4, %v1068_v37  ;;  %v3343_v47 = vpop.eup %3342  ;;  %v1097_v43 = vsub.f32 1.0, %v1096_v0  ;;  %v4591_v51 = vadd.f32 1.0, %v3333_v26  ;;  %v4593_v52 = vadd.f32 1.0, %v3335_v48  ;;  %vm4614_vm14 = vmor %vm1100_vm13, %vm1101_vm7  ;;  %v4643_v48 = vld [vmem:[%s3960_s24 + $0xd8] sm:$0xff]  ;;  %v4671_v37 = vld [vmem:[%s3960_s24 + $0xe0] sm:$0xff] }
  0x90   : > { %v1058_v46 = vsel %vm4568_vm4, %v3329_v40, %v1054_v34  ;;  %v3345_v35 = vpop.eup %3344  ;;  %v1083_v55 = vmul.f32 %v3337_v9, %v1082_v44  ;;  %v1111_v21 = vmul.f32 %v3343_v47, %v4537_v6  ;;  %v1122_v7 = vor.u32 1.1754944e-38, %v1121_v38  ;;  %v4679_v0 = vld [vmem:[%s3960_s24 + $0xf0] sm:$0xff] }
  0x91   : > { %v1063_v53 = vsel %vm4531_vm10, %v1062_v63, %v1058_v46  ;;  %v1073_v31 = vsel %vm4578_vm5, %v3331_v4, %v1069_v1  ;;  %v1098_v12 = vmul.f32 %v3339_v16, %v1097_v43  ;;  %vm1116_vm10 = vweird.f32 %v3343_v47  ;;  %v4685_v1 = vld [vmem:[%s3960_s24 + $0xf8] sm:$0xff] }
  0x92   : > { %v2718_v56 = vmul.f32 %v1063_v53, %v4251_v2  ;;  %v1078_v57 = vsel %vm4539_vm11, %v1077_v10, %v1073_v31  ;;  %v1084_v63 = vadd.f32 %v3337_v9, %v1083_v55  ;;  %v1112_v18 = vsub.f32 1.0, %v1111_v21  ;;  %vm4633_vm12 = vmor %vm1115_vm2, %vm1116_vm10 }
  0x93   : > { %v2719_v60 = vmul.f32 %v1078_v57, %v4254_v54  ;;  %v1126_v40 = vmul.f32 %v3345_v35, %v4545_v62  ;;  %v1099_v36 = vadd.f32 %v3339_v16, %v1098_v12  ;;  %3346 = vrcp.f32 %v4591_v51  ;;  %v4710_v12 = vld [vmem:[%s3960_s24 + $0x108] sm:$0xff] }
  0x94   : > { %2846 = vst [vmem:[%s4122_s17 + $0x90] sm:$0xff] %v2718_v56  ;;  %v4621_v61 = vadd.f32 1.0, %v3341_v42  ;;  %v1088_v54 = vsel %vm4606_vm9, %v3337_v9, %v1084_v63  ;;  %v1113_v50 = vmul.f32 %v3343_v47, %v1112_v18  ;;  %vm1131_vm11 = vweird.f32 %v3345_v35 }
  0x95   : > { %2847 = vst [vmem:[%s4122_s17 + $0x98] sm:$0xff] %v2719_v60  ;;  %v1127_v4 = vsub.f32 1.0, %v1126_v40  ;;  %v1093_v3 = vsel %vm4554_vm0, %v1092_v13, %v1088_v54  ;;  %v1103_v10 = vsel %vm4614_vm14, %v3339_v16, %v1099_v36  ;;  %v1149_v23 = vand.u32 2147483647, %v4591_v51  ;;  %vm4648_vm13 = vmor %vm1130_vm3, %vm1131_vm11 }
  0x96   : > { %3348 = vrcp.f32 %v4593_v52  ;;  %v2720_v26 = vmul.f32 %v1093_v3, %v4263_v32  ;;  %v1108_v11 = vsel %vm4560_vm1, %v1107_v33, %v1103_v10  ;;  %v1114_v5 = vadd.f32 %v3343_v47, %v1113_v50  ;;  %v4729_v3 = vld [vmem:[%s3960_s24 + $0x118] sm:$0xff] }
  0x97   : > { %v1128_v13 = vmul.f32 %v3345_v35, %v1127_v4  ;;  %v2721_v6 = vmul.f32 %v1108_v11, %v4439_v58  ;;  %v1137_v30 = vor.u32 1.1754944e-38, %v1136_v14  ;;  %v1151_v49 = vand.u32 2147483648, %v4591_v51  ;;  %v4737_v11 = vld [vmem:[%s3960_s24 + $0x120] sm:$0xff] }
  0x98   : > { %2848 = vst [vmem:[%s4122_s17 + $0xa0] sm:$0xff] %v2720_v26  ;;  %v1118_v32 = vsel %vm4633_vm12, %v3343_v47, %v1114_v5  ;;  %vm1135_vm15 = vcmp.eq.f32.partialorder %v1134_v25, 8.507059e+37  ;;  %vm1145_vm0 = vweird.f32 %v4591_v51  ;;  %3350 = vrcp.f32 %v4621_v61 }
  0x99   : > { %v1129_v9 = vadd.f32 %v3345_v35, %v1128_v13  ;;  %v3347_v28 = vpop.eup %3346  ;;  %2849 = vst [vmem:[%s4122_s17 + $0xa8] sm:$0xff] %v2721_v6  ;;  %v1123_v58 = vsel %vm4585_vm8, %v1122_v7, %v1118_v32  ;;  %v3083_v62 = vmul.f32 -1.442695, %v4643_v48  ;;  %vm4666_vm1 = vcmp.eq.f32.partialorder %v1149_v23, 8.507059e+37  ;;  %v4722_v7 = vld [vmem:[%s3960_s24 + $0x110] sm:$0xff] }
  0x9a   : > { %v2722_v29 = vmul.f32 %v1123_v58, %v4451_v8  ;;  %v1141_v16 = vmul.f32 %v3347_v28, %v4591_v51  ;;  %v1152_v22 = vor.u32 1.1754944e-38, %v1151_v49  ;;  %vm1160_vm2 = vweird.f32 %v4593_v52  ;;  %v4754_v49 = vld [vmem:[%s3960_s24 + $0x128] sm:$0xff] }
  0x9b   : > { %v1133_v33 = vsel %vm4648_vm13, %v3345_v35, %v1129_v9  ;;  %v1164_v8 = vand.u32 2147483647, %v4593_v52  ;;  %vm1146_vm4 = vweird.f32 %v3347_v28  ;;  %v1166_v44 = vand.u32 2147483648, %v4593_v52 }
  0x9c   : > { %v3349_v38 = vpop.eup %3348  ;;  %v1138_v34 = vsel %vm1135_vm15, %v1137_v30, %v1133_v33  ;;  %2850 = vst [vmem:[%s4122_s17 + $0xb0] sm:$0xff] %v2722_v29  ;;  %v1142_v14 = vsub.f32 1.0, %v1141_v16  ;;  %3352 = vpow2.f32 %v3083_v62  ;;  %v3084_v45 = vmul.f32 -1.442695, %v4671_v37  ;;  %vm4694_vm5 = vmor %vm1145_vm0, %vm1146_vm4 }
  0x9d   : > { %v2723_v25 = vmul.f32 %v1138_v34, %v4454_v20  ;;  %v1156_v42 = vmul.f32 %v3349_v38, %v4593_v52  ;;  %v3085_v47 = vmul.f32 -1.442695, %v4674_v19  ;;  %vm1161_vm3 = vweird.f32 %v3349_v38  ;;  %v4780_v34 = vld [vmem:[%s3960_s24 + $0x138] sm:$0xff] }
  0x9e   : > { %v1143_v46 = vmul.f32 %v3347_v28, %v1142_v14  ;;  %v3086_v20 = vmul.f32 -1.442695, %v4679_v0  ;;  %v3351_v35 = vpop.eup %3350  ;;  %vm1175_vm6 = vweird.f32 %v4621_v61  ;;  %v1179_v31 = vand.u32 2147483647, %v4621_v61  ;;  %vm4714_vm8 = vmor %vm1160_vm2, %vm1161_vm3 }
  0x9f   : > { %2851 = vst [vmem:[%s4122_s17 + $0xb8] sm:$0xff] %v2723_v25  ;;  %v1157_v43 = vsub.f32 1.0, %v1156_v42  ;;  %3354 = vpow2.f32 %v3084_v45  ;;  %v3087_v55 = vmul.f32 -1.442695, %v4685_v1  ;;  %vm4701_vm7 = vcmp.eq.f32.partialorder %v1164_v8, 8.507059e+37 }
  0xa0   : > { %v1144_v21 = vadd.f32 %v3347_v28, %v1143_v46  ;;  %v1171_v51 = vmul.f32 %v3351_v35, %v4621_v61  ;;  %v1167_v63 = vor.u32 1.1754944e-38, %v1166_v44  ;;  %vm1176_vm9 = vweird.f32 %v3351_v35 }
  0xa1   : > { %v1158_v56 = vmul.f32 %v3349_v38, %v1157_v43  ;;  %v1181_v2 = vand.u32 2147483648, %v4621_v61  ;;  %3356 = vpow2.f32 %v3085_v47  ;;  %v3088_v50 = vmul.f32 -1.442695, %v4707_v59  ;;  %vm4744_vm10 = vmor %vm1175_vm6, %vm1176_vm9 }
  0xa2   : > { %v1148_v18 = vsel %vm4694_vm5, %v3347_v28, %v1144_v21  ;;  %v1172_v36 = vsub.f32 1.0, %v1171_v51  ;;  %3358 = vpow2.f32 %v3086_v20  ;;  %v3353_v52 = vpop.eup %3352  ;;  %v3089_v4 = vmul.f32 -1.442695, %v4710_v12  ;;  %v4763_v28 = vld [vmem:[%s3960_s24 + $0x130] sm:$0xff] }
  0xa3   : > { %v1159_v40 = vadd.f32 %v3349_v38, %v1158_v56  ;;  %v1153_v54 = vsel %vm4666_vm1, %v1152_v22, %v1148_v18  ;;  %3360 = vpow2.f32 %v3087_v55  ;;  %v4734_v26 = vadd.f32 1.0, %v3353_v52 }
  0xa4   : > { %v2724_v10 = vmul.f32 %v1153_v54, %v4483_v41  ;;  %v1173_v23 = vmul.f32 %v3351_v35, %v1172_v36  ;;  %vm4748_vm14 = vcmp.eq.f32.partialorder %v1179_v31, 8.507059e+37  ;;  %v1182_v27 = vor.u32 1.1754944e-38, %v1181_v2 }
  0xa5   : > { %v1163_v15 = vsel %vm4714_vm8, %v3349_v38, %v1159_v40  ;;  %v3355_v5 = vpop.eup %3354  ;;  %v3090_v30 = vmul.f32 -1.442695, %v4722_v7  ;;  %3362 = vrcp.f32 %v4734_v26  ;;  %v4760_v61 = vmul.f32 -1.442695, %v4729_v3 }
  0xa6   : > { %v1168_v13 = vsel %vm4701_vm7, %v1167_v63, %v1163_v15  ;;  %2852 = vst [vmem:[%s4122_s17 + $0xc0] sm:$0xff] %v2724_v10  ;;  %v1174_v9 = vadd.f32 %v3351_v35, %v1173_v23  ;;  %v1194_v62 = vand.u32 2147483647, %v4734_v26  ;;  %v4766_v29 = vadd.f32 1.0, %v3355_v5 }
  0xa7   : > { %v2725_v32 = vmul.f32 %v1168_v13, %v4491_v39  ;;  %v3357_v58 = vpop.eup %3356  ;;  %3364 = vpow2.f32 %v3088_v50  ;;  %v4769_v33 = vmul.f32 -1.442695, %v4737_v11  ;;  %v4777_v38 = vmul.f32 -1.442695, %v4754_v49 }
  0xa8   : > { %v3359_v16 = vpop.eup %3358  ;;  %v1178_v39 = vsel %vm4744_vm10, %v3351_v35, %v1174_v9  ;;  %v4774_v24 = vadd.f32 1.0, %v3357_v58  ;;  %3366 = vpow2.f32 %v3089_v4  ;;  %v1196_v25 = vand.u32 2147483648, %v4734_v26 }
  0xa9   : > { %2853 = vst [vmem:[%s4122_s17 + $0xc8] sm:$0xff] %v2725_v32  ;;  %v3361_v22 = vpop.eup %3360  ;;  %v1183_v8 = vsel %vm4748_vm14, %v1182_v27, %v1178_v39  ;;  %3368 = vrcp.f32 %v4766_v29  ;;  %v4787_v14 = vmul.f32 -1.442695, %v4763_v28  ;;  %v1209_v44 = vand.u32 2147483647, %v4766_v29 }
  0xaa   : > { %v2726_v42 = vmul.f32 %v1183_v8, %v4518_v17  ;;  %v1211_v45 = vand.u32 2147483648, %v4766_v29  ;;  %3370 = vpow2.f32 %v3090_v30  ;;  %vm1190_vm11 = vweird.f32 %v4734_v26  ;;  %v4931_v8 = vld [vmem:[%s3960_s24 + $0x148] sm:$0xff] }
  0xab   : > { %vm4793_vm12 = vcmp.eq.f32.partialorder %v1194_v62, 8.507059e+37  ;;  %3372 = vrcp.f32 %v4774_v24  ;;  %v4799_v46 = vmul.f32 -1.442695, %v4780_v34  ;;  %v3363_v43 = vpop.eup %3362  ;;  %v1224_v17 = vand.u32 2147483647, %v4774_v24 }
  0xac   : > { %2854 = vst [vmem:[%s4122_s17 + $0xd0] sm:$0xff] %v2726_v42  ;;  %v1226_v20 = vand.u32 2147483648, %v4774_v24  ;;  %v4804_v35 = vadd.f32 1.0, %v3359_v16  ;;  %v4806_v53 = vadd.f32 1.0, %v3361_v22  ;;  %v1186_v55 = vmul.f32 %v3363_v43, %v4734_v26 }
  0xad   : > { %v3365_v31 = vpop.eup %3364  ;;  %v1197_v21 = vor.u32 1.1754944e-38, %v1196_v25  ;;  %vm1205_vm13 = vweird.f32 %v4766_v29  ;;  %vm1220_vm15 = vweird.f32 %v4774_v24  ;;  %vm1191_vm0 = vweird.f32 %v3363_v43 }
  0xae   : > { %v3367_v56 = vpop.eup %3366  ;;  %vm4811_vm1 = vcmp.eq.f32.partialorder %v1209_v44, 8.507059e+37  ;;  %v1212_v51 = vor.u32 1.1754944e-38, %v1211_v45  ;;  %3374 = vrcp.f32 %v4804_v35  ;;  %v1187_v63 = vsub.f32 1.0, %v1186_v55  ;;  %vm4835_vm5 = vmor %vm1190_vm11, %vm1191_vm0 }
  0xaf   : > { %v3369_v60 = vpop.eup %3368  ;;  %v1239_v2 = vand.u32 2147483647, %v4804_v35  ;;  %v1241_v18 = vand.u32 2147483648, %v4804_v35  ;;  %3376 = vrcp.f32 %v4806_v53  ;;  %vm4822_vm2 = vcmp.eq.f32.partialorder %v1224_v17, 8.507059e+37 }
  0xb0   : > { %v4819_v40 = vpop.eup %3370  ;;  %v1201_v36 = vmul.f32 %v3369_v60, %v4766_v29  ;;  %v1227_v54 = vor.u32 1.1754944e-38, %v1226_v20  ;;  %vm1235_vm4 = vweird.f32 %v4804_v35  ;;  %v1254_v50 = vand.u32 2147483647, %v4806_v53 }
  0xb1   : > { %v3373_v4 = vpop.eup %3372  ;;  %v1188_v10 = vmul.f32 %v3363_v43, %v1187_v63  ;;  %vm1250_vm3 = vweird.f32 %v4806_v53  ;;  %v1256_v15 = vand.u32 2147483648, %v4806_v53  ;;  %v4830_v23 = vadd.f32 1.0, %v3365_v31 }
  0xb2   : > { %v1202_v13 = vsub.f32 1.0, %v1201_v36  ;;  %vm1206_vm6 = vweird.f32 %v3369_v60  ;;  %v1216_v6 = vmul.f32 %v3373_v4, %v4774_v24  ;;  %v4840_v41 = vadd.f32 1.0, %v3367_v56 }
  0xb3   : > { %v1189_v27 = vadd.f32 %v3363_v43, %v1188_v10  ;;  %vm4842_vm7 = vcmp.eq.f32.partialorder %v1239_v2, 8.507059e+37  ;;  %v1242_v32 = vor.u32 1.1754944e-38, %v1241_v18  ;;  %3378 = vrcp.f32 %v4830_v23  ;;  %vm4856_vm10 = vmor %vm1205_vm13, %vm1206_vm6 }
  0xb4   : > { %v3375_v9 = vpop.eup %3374  ;;  %v1203_v26 = vmul.f32 %v3369_v60, %v1202_v13  ;;  %v1217_v58 = vsub.f32 1.0, %v1216_v6  ;;  %vm1221_vm8 = vweird.f32 %v3373_v4  ;;  %vm4847_vm9 = vcmp.eq.f32.partialorder %v1254_v50, 8.507059e+37 }
  0xb5   : > { %v1257_v16 = vor.u32 1.1754944e-38, %v1256_v15  ;;  %v3377_v39 = vpop.eup %3376  ;;  %v1193_v22 = vsel %vm4835_vm5, %v3363_v43, %v1189_v27  ;;  %v1231_v25 = vmul.f32 %v3375_v9, %v4804_v35  ;;  %vm1265_vm14 = vweird.f32 %v4830_v23  ;;  %vm4869_vm11 = vmor %vm1220_vm15, %vm1221_vm8 }
  0xb6   : > { %3380 = vrcp.f32 %v4840_v41  ;;  %v1198_v42 = vsel %vm4793_vm12, %v1197_v21, %v1193_v22  ;;  %v1204_v44 = vadd.f32 %v3369_v60, %v1203_v26  ;;  %v1218_v45 = vmul.f32 %v3373_v4, %v1217_v58  ;;  %v4916_v58 = vld [vmem:[%s3960_s24 + $0x140] sm:$0xff] }
  0xb7   : > { %v1246_v43 = vmul.f32 %v3377_v39, %v4806_v53  ;;  %v2727_v29 = vmul.f32 %v1198_v42, %v4643_v48  ;;  %v1232_v20 = vsub.f32 1.0, %v1231_v25  ;;  %vm1236_vm13 = vweird.f32 %v3375_v9 }
  0xb8   : > { %v1269_v31 = vand.u32 2147483647, %v4830_v23  ;;  %v1208_v47 = vsel %vm4856_vm10, %v3369_v60, %v1204_v44  ;;  %v1219_v55 = vadd.f32 %v3373_v4, %v1218_v45  ;;  %vm1251_vm12 = vweird.f32 %v3377_v39  ;;  %vm4886_vm0 = vmor %vm1235_vm4, %vm1236_vm13 }
  0xb9   : > { %v1247_v21 = vsub.f32 1.0, %v1246_v43  ;;  %v3379_v56 = vpop.eup %3378  ;;  %2855 = vst [vmem:[%s4122_s17 + $0xd8] sm:$0xff] %v2727_v29  ;;  %v1213_v48 = vsel %vm4811_vm1, %v1212_v51, %v1208_v47  ;;  %v1233_v24 = vmul.f32 %v3375_v9, %v1232_v20  ;;  %v1271_v63 = vand.u32 2147483648, %v4830_v23  ;;  %vm4896_vm1 = vmor %vm1250_vm3, %vm1251_vm12 }
  0xba   : > { %vm1280_vm15 = vweird.f32 %v4840_v41  ;;  %v2728_v2 = vmul.f32 %v1213_v48, %v4671_v37  ;;  %v1223_v18 = vsel %vm4869_vm11, %v3373_v4, %v1219_v55  ;;  %v1261_v57 = vmul.f32 %v3379_v56, %v4830_v23  ;;  %v4975_v48 = vld [vmem:[%s3960_s24 + $0x168] sm:$0xff] }
  0xbb   : > { %v1248_v36 = vmul.f32 %v3377_v39, %v1247_v21  ;;  %v1228_v50 = vsel %vm4822_vm2, %v1227_v54, %v1223_v18  ;;  %v1234_v10 = vadd.f32 %v3375_v9, %v1233_v24  ;;  %vm1266_vm4 = vweird.f32 %v3379_v56 }
  0xbc   : > { %v3381_v51 = vpop.eup %3380  ;;  %v1284_v35 = vand.u32 2147483647, %v4840_v41  ;;  %2856 = vst [vmem:[%s4122_s17 + $0xe0] sm:$0xff] %v2728_v2  ;;  %v2729_v4 = vmul.f32 %v1228_v50, %v4674_v19  ;;  %v1262_v5 = vsub.f32 1.0, %v1261_v57  ;;  %v1286_v53 = vand.u32 2147483648, %v4840_v41  ;;  %vm4924_vm3 = vmor %vm1265_vm14, %vm1266_vm4 }
  0xbd   : > { %v1249_v15 = vadd.f32 %v3377_v39, %v1248_v36  ;;  %v1276_v52 = vmul.f32 %v3381_v51, %v4840_v41  ;;  %v1238_v54 = vsel %vm4886_vm0, %v3375_v9, %v1234_v10  ;;  %vm1281_vm2 = vweird.f32 %v3381_v51  ;;  %v4951_v41 = vld [vmem:[%s3960_s24 + $0x158] sm:$0xff] }
  0xbe   : > { %v4908_v13 = vadd.f32 1.0, %v4819_v40  ;;  %2857 = vst [vmem:[%s4122_s17 + $0xe8] sm:$0xff] %v2729_v4  ;;  %v1243_v6 = vsel %vm4842_vm7, %v1242_v32, %v1238_v54  ;;  %v1263_v27 = vmul.f32 %v3379_v56, %v1262_v5  ;;  %v1272_v32 = vor.u32 1.1754944e-38, %v1271_v63  ;;  %vm4937_vm6 = vmor %vm1280_vm15, %vm1281_vm2 }
  0xbf   : > { %v1253_v19 = vsel %vm4896_vm1, %v3377_v39, %v1249_v15  ;;  %v1277_v26 = vsub.f32 1.0, %v1276_v52  ;;  %v2730_v9 = vmul.f32 %v1243_v6, %v4679_v0  ;;  %vm1270_vm5 = vcmp.eq.f32.partialorder %v1269_v31, 8.507059e+37 }
  0xc0   : > { %v1258_v40 = vsel %vm4847_vm9, %v1257_v16, %v1253_v19  ;;  %3382 = vrcp.f32 %v4908_v13  ;;  %v1264_v22 = vadd.f32 %v3379_v56, %v1263_v27  ;;  %v1287_v62 = vor.u32 1.1754944e-38, %v1286_v53 }
  0xc1   : > { %v2731_v39 = vmul.f32 %v1258_v40, %v4685_v1  ;;  %v1278_v0 = vmul.f32 %v3381_v51, %v1277_v26  ;;  %2858 = vst [vmem:[%s4122_s17 + $0xf0] sm:$0xff] %v2730_v9  ;;  %3384 = vpow2.f32 %v4760_v61  ;;  %v3096_v16 = vmul.f32 -1.442695, %v4916_v58  ;;  %v4944_v1 = vld [vmem:[%s3960_s24 + $0x150] sm:$0xff] }
  0xc2   : > { %v1268_v25 = vsel %vm4924_vm3, %v3379_v56, %v1264_v22  ;;  %vm1285_vm7 = vcmp.eq.f32.partialorder %v1284_v35, 8.507059e+37  ;;  %3386 = vpow2.f32 %v4769_v33  ;;  %v3097_v61 = vmul.f32 -1.442695, %v4931_v8  ;;  %v4972_v56 = vld [vmem:[%s3960_s24 + $0x160] sm:$0xff] }
  0xc3   : > { %2859 = vst [vmem:[%s4122_s17 + $0xf8] sm:$0xff] %v2731_v39  ;;  %v1279_v42 = vadd.f32 %v3381_v51, %v1278_v0  ;;  %v1273_v44 = vsel %vm1270_vm5, %v1272_v32, %v1268_v25  ;;  %3388 = vpow2.f32 %v4777_v38  ;;  %v3098_v29 = vmul.f32 -1.442695, %v4944_v1 }
  0xc4   : > { %v2732_v45 = vmul.f32 %v1273_v44, %v4707_v59  ;;  %3390 = vpow2.f32 %v4787_v14  ;;  %v1299_v33 = vand.u32 2147483647, %v4908_v13  ;;  %v3099_v38 = vmul.f32 -1.442695, %v4951_v41 }
  0xc5   : > { %v1283_v43 = vsel %vm4937_vm6, %v3381_v51, %v1279_v42  ;;  %3392 = vpow2.f32 %v4799_v46  ;;  %v1301_v14 = vand.u32 2147483648, %v4908_v13  ;;  %vm1295_vm8 = vweird.f32 %v4908_v13 }
  0xc6   : > { %v3383_v17 = vpop.eup %3382  ;;  %v1288_v20 = vsel %vm1285_vm7, %v1287_v62, %v1283_v43  ;;  %2860 = vst [vmem:[%s4122_s17 + $0x100] sm:$0xff] %v2732_v45  ;;  %3394 = vpow2.f32 %v3096_v16  ;;  %vm4982_vm10 = vcmp.eq.f32.partialorder %v1299_v33, 8.507059e+37  ;;  %v4996_v50 = vmul.f32 -1.442695, %v4972_v56 }
  0xc7   : > { %v2733_v59 = vmul.f32 %v1288_v20, %v4710_v12  ;;  %v1291_v31 = vmul.f32 %v3383_v17, %v4908_v13  ;;  %v3385_v47 = vpop.eup %3384  ;;  %3396 = vpow2.f32 %v3097_v61  ;;  %vm1296_vm9 = vweird.f32 %v3383_v17  ;;  %v4978_v12 = vld [vmem:[%s3960_s24 + $0x170] sm:$0xff] }
  0xc8   : > { %v3387_v55 = vpop.eup %3386  ;;  %v4969_v21 = vadd.f32 1.0, %v3385_v47  ;;  %3398 = vpow2.f32 %v3098_v29  ;;  %v1302_v36 = vor.u32 1.1754944e-38, %v1301_v14  ;;  %vm4990_vm14 = vmor %vm1295_vm8, %vm1296_vm9  ;;  %v4999_v10 = vmul.f32 -1.442695, %v4975_v48 }
  0xc9   : > { %2861 = vst [vmem:[%s4122_s17 + $0x108] sm:$0xff] %v2733_v59  ;;  %v1292_v46 = vsub.f32 1.0, %v1291_v31  ;;  %v3389_v24 = vpop.eup %3388  ;;  %v4980_v63 = vadd.f32 1.0, %v3387_v55  ;;  %3400 = vpow2.f32 %v3099_v38  ;;  %v5002_v37 = vmul.f32 -1.442695, %v4978_v12 }
  0xca   : > { %v3391_v2 = vpop.eup %3390  ;;  %3402 = vrcp.f32 %v4969_v21  ;;  %v1314_v15 = vand.u32 2147483647, %v4969_v21  ;;  %v1316_v5 = vand.u32 2147483648, %v4969_v21  ;;  %v5006_v52 = vadd.f32 1.0, %v3389_v24  ;;  %v5145_v24 = vld [vmem:[%s3960_s24 + $0x178] sm:$0xff] }
  0xcb   : > { %v1293_v18 = vmul.f32 %v3383_v17, %v1292_v46  ;;  %v3393_v57 = vpop.eup %3392  ;;  %3404 = vrcp.f32 %v4980_v63  ;;  %vm1310_vm11 = vweird.f32 %v4969_v21  ;;  %v1329_v53 = vand.u32 2147483647, %v4980_v63 }
  0xcc   : > { %v3395_v35 = vpop.eup %3394  ;;  %v1331_v13 = vand.u32 2147483648, %v4980_v63  ;;  %v5011_v6 = vadd.f32 1.0, %v3391_v2  ;;  %vm1325_vm13 = vweird.f32 %v4980_v63  ;;  %3406 = vrcp.f32 %v5006_v52 }
  0xcd   : > { %v1294_v4 = vadd.f32 %v3383_v17, %v1293_v18  ;;  %v3397_v54 = vpop.eup %3396  ;;  %v5019_v26 = vadd.f32 1.0, %v3393_v57  ;;  %v1344_v30 = vand.u32 2147483647, %v5006_v52  ;;  %v1346_v32 = vand.u32 2147483648, %v5006_v52 }
  0xce   : > { %v5013_v19 = vpop.eup %3398  ;;  %3408 = vrcp.f32 %v5011_v6  ;;  %vm5029_vm12 = vcmp.eq.f32.partialorder %v1314_v15, 8.507059e+37  ;;  %v1317_v23 = vor.u32 1.1754944e-38, %v1316_v5  ;;  %v1359_v62 = vand.u32 2147483647, %v5011_v6 }
  0xcf   : > { %v1298_v27 = vsel %vm4990_vm14, %v3383_v17, %v1294_v4  ;;  %v5021_v9 = vpop.eup %3400  ;;  %vm5035_vm15 = vcmp.eq.f32.partialorder %v1329_v53, 8.507059e+37  ;;  %v1332_v44 = vor.u32 1.1754944e-38, %v1331_v13  ;;  %vm1340_vm0 = vweird.f32 %v5006_v52 }
  0xd0   : > { %v1303_v40 = vsel %vm4982_vm10, %v1302_v36, %v1298_v27  ;;  %v3403_v39 = vpop.eup %3402  ;;  %vm1355_vm4 = vweird.f32 %v5011_v6  ;;  %v1361_v61 = vand.u32 2147483648, %v5011_v6  ;;  %vm5044_vm3 = vcmp.eq.f32.partialorder %v1344_v30, 8.507059e+37 }
  0xd1   : > { %v2734_v22 = vmul.f32 %v1303_v40, %v4722_v7  ;;  %v3405_v16 = vpop.eup %3404  ;;  %v1306_v25 = vmul.f32 %v3403_v39, %v4969_v21  ;;  %vm1311_vm1 = vweird.f32 %v3403_v39  ;;  %v1347_v29 = vor.u32 1.1754944e-38, %v1346_v32 }
  0xd2   : > { %v1321_v7 = vmul.f32 %v3405_v16, %v4980_v63  ;;  %vm1326_vm2 = vweird.f32 %v3405_v16  ;;  %3410 = vrcp.f32 %v5019_v26  ;;  %v3407_v17 = vpop.eup %3406  ;;  %vm5049_vm5 = vcmp.eq.f32.partialorder %v1359_v62, 8.507059e+37  ;;  %vm5063_vm6 = vmor %vm1310_vm11, %vm1311_vm1 }
  0xd3   : > { %2862 = vst [vmem:[%s4122_s17 + $0x110] sm:$0xff] %v2734_v22  ;;  %v1307_v45 = vsub.f32 1.0, %v1306_v25  ;;  %v1374_v38 = vand.u32 2147483647, %v5019_v26  ;;  %v5054_v59 = vadd.f32 1.0, %v3395_v35  ;;  %v1336_v47 = vmul.f32 %v3407_v17, %v5006_v52  ;;  %vm5072_vm8 = vmor %vm1325_vm13, %vm1326_vm2 }
  0xd4   : > { %v1322_v20 = vsub.f32 1.0, %v1321_v7  ;;  %v3409_v31 = vpop.eup %3408  ;;  %v1376_v55 = vand.u32 2147483648, %v5019_v26  ;;  %v5058_v46 = vadd.f32 1.0, %v3397_v54  ;;  %v1362_v60 = vor.u32 1.1754944e-38, %v1361_v61 }
  0xd5   : > { %v1308_v14 = vmul.f32 %v3403_v39, %v1307_v45  ;;  %v1351_v18 = vmul.f32 %v3409_v31, %v5011_v6  ;;  %vm1370_vm7 = vweird.f32 %v5019_v26  ;;  %v1337_v51 = vsub.f32 1.0, %v1336_v47 }
  0xd6   : > { %v1323_v2 = vmul.f32 %v3405_v16, %v1322_v20  ;;  %vm1341_vm9 = vweird.f32 %v3407_v17  ;;  %3412 = vrcp.f32 %v5054_v59  ;;  %vm1356_vm10 = vweird.f32 %v3409_v31  ;;  %v5223_v20 = vld [vmem:[%s3960_s24 + $0x1a0] sm:$0xff] }
  0xd7   : > { %v1309_v36 = vadd.f32 %v3403_v39, %v1308_v14  ;;  %v1352_v35 = vsub.f32 1.0, %v1351_v18  ;;  %vm5077_vm14 = vcmp.eq.f32.partialorder %v1374_v38, 8.507059e+37  ;;  %v1338_v63 = vmul.f32 %v3407_v17, %v1337_v51  ;;  %vm5090_vm11 = vmor %vm1340_vm0, %vm1341_vm9 }
  0xd8   : > { %v1324_v21 = vadd.f32 %v3405_v16, %v1323_v2  ;;  %v3411_v15 = vpop.eup %3410  ;;  %v1377_v54 = vor.u32 1.1754944e-38, %v1376_v55  ;;  %3414 = vrcp.f32 %v5058_v46  ;;  %vm5101_vm13 = vmor %vm1355_vm4, %vm1356_vm10  ;;  %v1389_v25 = vand.u32 2147483647, %v5054_v59 }
  0xd9   : > { %v1313_v5 = vsel %vm5063_vm6, %v3403_v39, %v1309_v36  ;;  %v1353_v40 = vmul.f32 %v3409_v31, %v1352_v35  ;;  %v1366_v30 = vmul.f32 %v3411_v15, %v5019_v26  ;;  %v1339_v22 = vadd.f32 %v3407_v17, %v1338_v63  ;;  %v5173_v35 = vld [vmem:[%s3960_s24 + $0x180] sm:$0xff] }
  0xda   : > { %v1318_v53 = vsel %vm5029_vm12, %v1317_v23, %v1313_v5  ;;  %v1328_v13 = vsel %vm5072_vm8, %v3405_v16, %v1324_v21  ;;  %vm1385_vm12 = vweird.f32 %v5054_v59  ;;  %vm1371_vm0 = vweird.f32 %v3411_v15  ;;  %v5185_v5 = vld [vmem:[%s3960_s24 + $0x188] sm:$0xff] }
  0xdb   : > { %v2735_v32 = vmul.f32 %v1318_v53, %v4729_v3  ;;  %v1333_v39 = vsel %vm5035_vm15, %v1332_v44, %v1328_v13  ;;  %v1354_v23 = vadd.f32 %v3409_v31, %v1353_v40  ;;  %v1367_v62 = vsub.f32 1.0, %v1366_v30  ;;  %vm5125_vm1 = vmor %vm1370_vm7, %vm1371_vm0 }
  0xdc   : > { %v2736_v52 = vmul.f32 %v1333_v39, %v4737_v11  ;;  %v3413_v16 = vpop.eup %3412  ;;  %v1343_v3 = vsel %vm5090_vm11, %v3407_v17, %v1339_v22  ;;  %v1391_v6 = vand.u32 2147483648, %v5054_v59  ;;  %vm1400_vm15 = vweird.f32 %v5058_v46 }
  0xdd   : > { %2863 = vst [vmem:[%s4122_s17 + $0x118] sm:$0xff] %v2735_v32  ;;  %v1348_v42 = vsel %vm5044_vm3, %v1347_v29, %v1343_v3  ;;  %v1358_v11 = vsel %vm5101_vm13, %v3409_v31, %v1354_v23  ;;  %v1368_v44 = vmul.f32 %v3411_v15, %v1367_v62  ;;  %v1381_v7 = vmul.f32 %v3413_v16, %v5054_v59 }
  0xde   : > { %2864 = vst [vmem:[%s4122_s17 + $0x120] sm:$0xff] %v2736_v52  ;;  %v3415_v61 = vpop.eup %3414  ;;  %v2737_v45 = vmul.f32 %v1348_v42, %v4754_v49  ;;  %v1363_v17 = vsel %vm5049_vm5, %v1362_v60, %v1358_v11  ;;  %vm1386_vm4 = vweird.f32 %v3413_v16  ;;  %v1404_v43 = vand.u32 2147483647, %v5058_v46 }
  0xdf   : > { %v2738_v29 = vmul.f32 %v1363_v17, %v4763_v28  ;;  %v1369_v38 = vadd.f32 %v3411_v15, %v1368_v44  ;;  %v1382_v31 = vsub.f32 1.0, %v1381_v7  ;;  %v1396_v49 = vmul.f32 %v3415_v61, %v5058_v46  ;;  %vm5152_vm3 = vmor %vm1385_vm12, %vm1386_vm4  ;;  %v5218_v44 = vld [vmem:[%s3960_s24 + $0x198] sm:$0xff] }
  0xe0   : > { %2865 = vst [vmem:[%s4122_s17 + $0x128] sm:$0xff] %v2737_v45  ;;  %vm1401_vm2 = vweird.f32 %v3415_v61  ;;  %v1406_v33 = vand.u32 2147483648, %v5058_v46  ;;  %v5135_v26 = vadd.f32 1.0, %v5013_v19  ;;  %v5138_v14 = vadd.f32 1.0, %v5021_v9 }
  0xe1   : > { %2866 = vst [vmem:[%s4122_s17 + $0x130] sm:$0xff] %v2738_v29  ;;  %v1373_v47 = vsel %vm5125_vm1, %v3411_v15, %v1369_v38  ;;  %v1383_v55 = vmul.f32 %v3413_v16, %v1382_v31  ;;  %v1397_v28 = vsub.f32 1.0, %v1396_v49  ;;  %3416 = vpow2.f32 %v4996_v50  ;;  %vm5166_vm6 = vmor %vm1400_vm15, %vm1401_vm2  ;;  %v5229_v29 = vld [vmem:[%s3960_s24 + $0x1b0] sm:$0xff] }
  0xe2   : > { %v1378_v2 = vsel %vm5077_vm14, %v1377_v54, %v1373_v47  ;;  %vm5156_vm5 = vcmp.eq.f32.partialorder %v1389_v25, 8.507059e+37  ;;  %v1392_v18 = vor.u32 1.1754944e-38, %v1391_v6  ;;  %3418 = vrcp.f32 %v5135_v26 }
  0xe3   : > { %v2739_v50 = vmul.f32 %v1378_v2, %v4780_v34  ;;  %v1384_v60 = vadd.f32 %v3413_v16, %v1383_v55  ;;  %v1398_v36 = vmul.f32 %v3415_v61, %v1397_v28  ;;  %v1419_v57 = vand.u32 2147483647, %v5135_v26 }
  0xe4   : > { %v1407_v51 = vor.u32 1.1754944e-38, %v1406_v33  ;;  %3420 = vrcp.f32 %v5138_v14  ;;  %v3103_v21 = vmul.f32 -1.442695, %v5145_v24  ;;  %vm1405_vm7 = vcmp.eq.f32.partialorder %v1404_v43, 8.507059e+37  ;;  %v5226_v43 = vld [vmem:[%s3960_s24 + $0x1a8] sm:$0xff] }
  0xe5   : > { %2867 = vst [vmem:[%s4122_s17 + $0x138] sm:$0xff] %v2739_v50  ;;  %v1388_v34 = vsel %vm5152_vm3, %v3413_v16, %v1384_v60  ;;  %v1399_v4 = vadd.f32 %v3415_v61, %v1398_v36  ;;  %vm1415_vm8 = vweird.f32 %v5135_v26  ;;  %v1421_v15 = vand.u32 2147483648, %v5135_v26 }
  0xe6   : > { %v1393_v46 = vsel %vm5156_vm5, %v1392_v18, %v1388_v34  ;;  %vm1430_vm9 = vweird.f32 %v5138_v14  ;;  %3422 = vpow2.f32 %v4999_v10  ;;  %vm5190_vm10 = vcmp.eq.f32.partialorder %v1419_v57, 8.507059e+37 }
  0xe7   : > { %v3417_v63 = vpop.eup %3416  ;;  %v2740_v54 = vmul.f32 %v1393_v46, %v4916_v58  ;;  %v1403_v53 = vsel %vm5166_vm6, %v3415_v61, %v1399_v4  ;;  %3424 = vpow2.f32 %v5002_v37  ;;  %v3104_v27 = vmul.f32 -1.442695, %v5173_v35  ;;  %v5205_v37 = vld [vmem:[%s3960_s24 + $0x190] sm:$0xff] }
  0xe8   : > { %v3419_v40 = vpop.eup %3418  ;;  %v1408_v10 = vsel %vm1405_vm7, %v1407_v51, %v1403_v53  ;;  %v1434_v30 = vand.u32 2147483647, %v5138_v14  ;;  %v1436_v32 = vand.u32 2147483648, %v5138_v14  ;;  %v5198_v39 = vadd.f32 1.0, %v3417_v63 }
  0xe9   : > { %2868 = vst [vmem:[%s4122_s17 + $0x140] sm:$0xff] %v2740_v54  ;;  %v2741_v58 = vmul.f32 %v1408_v10, %v4931_v8  ;;  %v1411_v22 = vmul.f32 %v3419_v40, %v5135_v26  ;;  %3426 = vpow2.f32 %v3103_v21  ;;  %v3105_v0 = vmul.f32 -1.442695, %v5185_v5 }
  0xea   : > { %v3421_v52 = vpop.eup %3420  ;;  %vm1416_vm14 = vweird.f32 %v3419_v40  ;;  %v1422_v23 = vor.u32 1.1754944e-38, %v1421_v15  ;;  %3428 = vrcp.f32 %v5198_v39  ;;  %v1451_v62 = vand.u32 2147483648, %v5198_v39 }
  0xeb   : > { %2869 = vst [vmem:[%s4122_s17 + $0x148] sm:$0xff] %v2741_v58  ;;  %v1412_v16 = vsub.f32 1.0, %v1411_v22  ;;  %v1426_v8 = vmul.f32 %v3421_v52, %v5138_v14  ;;  %v1449_v3 = vand.u32 2147483647, %v5198_v39  ;;  %3430 = vpow2.f32 %v3104_v27  ;;  %vm5234_vm12 = vmor %vm1415_vm8, %vm1416_vm14 }
  0xec   : > { %v3423_v25 = vpop.eup %3422  ;;  %vm1431_vm11 = vweird.f32 %v3421_v52  ;;  %vm5212_vm13 = vcmp.eq.f32.partialorder %v1434_v30, 8.507059e+37  ;;  %v1437_v42 = vor.u32 1.1754944e-38, %v1436_v32  ;;  %v3106_v11 = vmul.f32 -1.442695, %v5205_v37 }
  0xed   : > { %v3425_v7 = vpop.eup %3424  ;;  %v1413_v61 = vmul.f32 %v3419_v40, %v1412_v16  ;;  %v1427_v45 = vsub.f32 1.0, %v1426_v8  ;;  %v5220_v17 = vadd.f32 1.0, %v3423_v25  ;;  %3432 = vpow2.f32 %v3105_v0  ;;  %vm5252_vm1 = vmor %vm1430_vm9, %vm1431_vm11 }
  0xee   : > { %vm1445_vm0 = vweird.f32 %v5198_v39  ;;  %v1452_v31 = vor.u32 1.1754944e-38, %v1451_v62  ;;  %v5239_v49 = vadd.f32 1.0, %v3425_v7  ;;  %3434 = vpow2.f32 %v3106_v11 }
  0xef   : > { %v3427_v33 = vpop.eup %3426  ;;  %v1414_v47 = vadd.f32 %v3419_v40, %v1413_v61  ;;  %v1428_v55 = vmul.f32 %v3421_v52, %v1427_v45  ;;  %vm5241_vm15 = vcmp.eq.f32.partialorder %v1449_v3, 8.507059e+37  ;;  %3436 = vrcp.f32 %v5220_v17 }
  0xf0   : > { %v5247_v26 = vmul.f32 -1.442695, %v5218_v44  ;;  %v3429_v2 = vpop.eup %3428  ;;  %3438 = vrcp.f32 %v5239_v49  ;;  %v5258_v9 = vmul.f32 -1.442695, %v5223_v20  ;;  %v5261_v18 = vmul.f32 -1.442695, %v5226_v43 }
  0xf1   : > { %v5264_v50 = vmul.f32 -1.442695, %v5229_v29  ;;  %v3431_v60 = vpop.eup %3430  ;;  %v1418_v36 = vsel %vm5234_vm12, %v3419_v40, %v1414_v47  ;;  %v1429_v14 = vadd.f32 %v3421_v52, %v1428_v55  ;;  %v1441_v57 = vmul.f32 %v3429_v2, %v5198_v39 }
  0xf2   : > { %v1464_v59 = vand.u32 2147483647, %v5220_v17  ;;  %v1423_v51 = vsel %vm5190_vm10, %v1422_v23, %v1418_v36  ;;  %vm1460_vm4 = vweird.f32 %v5220_v17  ;;  %v1466_v21 = vand.u32 2147483648, %v5220_v17  ;;  %v5389_v23 = vld [vmem:[%s3960_s24 + $0x1c0] sm:$0xff] }
  0xf3   : > { %v1479_v34 = vand.u32 2147483647, %v5239_v49  ;;  %v3433_v4 = vpop.eup %3432  ;;  %v2742_v46 = vmul.f32 %v1423_v51, %v4944_v1  ;;  %v1433_v15 = vsel %vm5252_vm1, %v3421_v52, %v1429_v14  ;;  %v1442_v63 = vsub.f32 1.0, %v1441_v57 }
  0xf4   : > { %vm1446_vm2 = vweird.f32 %v3429_v2  ;;  %v3435_v54 = vpop.eup %3434  ;;  %v1438_v53 = vsel %vm5212_vm13, %v1437_v42, %v1433_v15  ;;  %vm1475_vm3 = vweird.f32 %v5239_v49  ;;  %v5281_v13 = vadd.f32 1.0, %v3427_v33 }
  0xf5   : > { %v5283_v27 = vadd.f32 1.0, %v3431_v60  ;;  %v3437_v40 = vpop.eup %3436  ;;  %2870 = vst [vmem:[%s4122_s17 + $0x150] sm:$0xff] %v2742_v46  ;;  %v2743_v1 = vmul.f32 %v1438_v53, %v4951_v41  ;;  %v1443_v10 = vmul.f32 %v3429_v2, %v1442_v63  ;;  %vm5287_vm5 = vcmp.eq.f32.partialorder %v1464_v59, 8.507059e+37  ;;  %vm5294_vm6 = vmor %vm1445_vm0, %vm1446_vm2 }
  0xf6   : > { %v1481_v32 = vand.u32 2147483648, %v5239_v49  ;;  %v3439_v58 = vpop.eup %3438  ;;  %v1456_v0 = vmul.f32 %v3437_v40, %v5220_v17  ;;  %v1467_v52 = vor.u32 1.1754944e-38, %v1466_v21  ;;  %vm5299_vm7 = vcmp.eq.f32.partialorder %v1479_v34, 8.507059e+37 }
  0xf7   : > { %3440 = vrcp.f32 %v5281_v13  ;;  %2871 = vst [vmem:[%s4122_s17 + $0x158] sm:$0xff] %v2743_v1  ;;  %v1444_v41 = vadd.f32 %v3429_v2, %v1443_v10  ;;  %v1471_v62 = vmul.f32 %v3439_v58, %v5239_v49  ;;  %v1494_v16 = vand.u32 2147483647, %v5281_v13  ;;  %v5375_v10 = vld [vmem:[%s3960_s24 + $0x1b8] sm:$0xff] }
  0xf8   : > { %v5307_v39 = vadd.f32 1.0, %v3433_v4  ;;  %v1457_v8 = vsub.f32 1.0, %v1456_v0  ;;  %vm1461_vm8 = vweird.f32 %v3437_v40  ;;  %v1496_v3 = vand.u32 2147483648, %v5281_v13 }
  0xf9   : > { %3442 = vrcp.f32 %v5283_v27  ;;  %v1448_v25 = vsel %vm5294_vm6, %v3429_v2, %v1444_v41  ;;  %v1472_v6 = vsub.f32 1.0, %v1471_v62  ;;  %vm1476_vm9 = vweird.f32 %v3439_v58  ;;  %vm5320_vm11 = vmor %vm1460_vm4, %vm1461_vm8 }
  0xfa   : > { %v1482_v42 = vor.u32 1.1754944e-38, %v1481_v32  ;;  %v1453_v11 = vsel %vm5241_vm15, %v1452_v31, %v1448_v25  ;;  %v1458_v7 = vmul.f32 %v3437_v40, %v1457_v8  ;;  %vm1490_vm10 = vweird.f32 %v5281_v13  ;;  %vm5331_vm12 = vmor %vm1475_vm3, %vm1476_vm9 }
  0xfb   : > { %vm1505_vm14 = vweird.f32 %v5283_v27  ;;  %v2744_v61 = vmul.f32 %v1453_v11, %v4972_v56  ;;  %v1473_v38 = vmul.f32 %v3439_v58, %v1472_v6  ;;  %vm5324_vm13 = vcmp.eq.f32.partialorder %v1494_v16, 8.507059e+37 }
  0xfc   : > { %3444 = vrcp.f32 %v5307_v39  ;;  %v1459_v47 = vadd.f32 %v3437_v40, %v1458_v7  ;;  %v1497_v56 = vor.u32 1.1754944e-38, %v1496_v3  ;;  %v1509_v17 = vand.u32 2147483647, %v5283_v27 }
  0xfd   : > { %v3441_v31 = vpop.eup %3440  ;;  %v1511_v28 = vand.u32 2147483648, %v5283_v27  ;;  %2872 = vst [vmem:[%s4122_s17 + $0x160] sm:$0xff] %v2744_v61  ;;  %v1474_v2 = vadd.f32 %v3439_v58, %v1473_v38  ;;  %v1524_v60 = vand.u32 2147483647, %v5307_v39  ;;  %v1526_v14 = vand.u32 2147483648, %v5307_v39 }
  0xfe   : > { %v1486_v19 = vmul.f32 %v3441_v31, %v5281_v13  ;;  %vm1491_vm0 = vweird.f32 %v3441_v31  ;;  %v1463_v49 = vsel %vm5320_vm11, %v3437_v40, %v1459_v47  ;;  %v5343_v57 = vadd.f32 1.0, %v3435_v54 }
  0xff   : > { %v3443_v36 = vpop.eup %3442  ;;  %3446 = vpow2.f32 %v5247_v26  ;;  %v1468_v59 = vsel %vm5287_vm5, %v1467_v52, %v1463_v49  ;;  %v1478_v51 = vsel %vm5331_vm12, %v3439_v58, %v1474_v2  ;;  %vm5354_vm1 = vcmp.eq.f32.partialorder %v1509_v17, 8.507059e+37  ;;  %vm5364_vm4 = vmor %vm1490_vm10, %vm1491_vm0 }
 0x100   : > { %v1487_v21 = vsub.f32 1.0, %v1486_v19  ;;  %v1501_v34 = vmul.f32 %v3443_v36, %v5283_v27  ;;  %v2745_v4 = vmul.f32 %v1468_v59, %v4975_v48  ;;  %v1483_v46 = vsel %vm5299_vm7, %v1482_v42, %v1478_v51 }
 0x101   : > { %vm1506_vm15 = vweird.f32 %v3443_v36  ;;  %v2746_v63 = vmul.f32 %v1483_v46, %v4978_v12  ;;  %3448 = vrcp.f32 %v5343_v57  ;;  %v1512_v40 = vor.u32 1.1754944e-38, %v1511_v28 }
 0x102   : > { %v3445_v26 = vpop.eup %3444  ;;  %v1488_v54 = vmul.f32 %v3441_v31, %v1487_v21  ;;  %v1502_v53 = vsub.f32 1.0, %v1501_v34  ;;  %2873 = vst [vmem:[%s4122_s17 + $0x168] sm:$0xff] %v2745_v4  ;;  %vm1520_vm2 = vweird.f32 %v5307_v39  ;;  %vm5370_vm3 = vcmp.eq.f32.partialorder %v1524_v60, 8.507059e+37  ;;  %vm5382_vm5 = vmor %vm1505_vm14, %vm1506_vm15 }
 0x103   : > { %v1516_v1 = vmul.f32 %v3445_v26, %v5307_v39  ;;  %2874 = vst [vmem:[%s4122_s17 + $0x170] sm:$0xff] %v2746_v63  ;;  %v1527_v13 = vor.u32 1.1754944e-38, %v1526_v14  ;;  %3450 = vpow2.f32 %v5258_v9  ;;  %vm1521_vm6 = vweird.f32 %v3445_v26 }
 0x104   : > { %v1489_v30 = vadd.f32 %v3441_v31, %v1488_v54  ;;  %v1503_v32 = vmul.f32 %v3443_v36, %v1502_v53  ;;  %v1539_v52 = vand.u32 2147483647, %v5343_v57  ;;  %3452 = vpow2.f32 %v5261_v18  ;;  %vm5406_vm8 = vmor %vm1520_vm2, %vm1521_vm6 }
 0x105   : > { %v3447_v58 = vpop.eup %3446  ;;  %v1517_v0 = vsub.f32 1.0, %v1516_v1  ;;  %v3111_v27 = vmul.f32 -1.442695, %v5375_v10  ;;  %vm1535_vm7 = vweird.f32 %v5343_v57  ;;  %3454 = vpow2.f32 %v5264_v50 }
 0x106   : > { %v1493_v41 = vsel %vm5364_vm4, %v3441_v31, %v1489_v30  ;;  %v1504_v9 = vadd.f32 %v3443_v36, %v1503_v32  ;;  %v5393_v62 = vadd.f32 1.0, %v3447_v58  ;;  %v3112_v42 = vmul.f32 -1.442695, %v5389_v23 }
 0x107   : > { %v1498_v16 = vsel %vm5324_vm13, %v1497_v56, %v1493_v41  ;;  %v1518_v8 = vmul.f32 %v3445_v26, %v1517_v0  ;;  %v3449_v18 = vpop.eup %3448  ;;  %v1541_v7 = vand.u32 2147483648, %v5343_v57  ;;  %vm5418_vm9 = vcmp.eq.f32.partialorder %v1539_v52, 8.507059e+37 }
 0x108   : > { %v2747_v3 = vmul.f32 %v1498_v16, %v5145_v24  ;;  %v1508_v25 = vsel %vm5382_vm5, %v3443_v36, %v1504_v9  ;;  %3456 = vrcp.f32 %v5393_v62  ;;  %v1531_v24 = vmul.f32 %v3449_v18, %v5343_v57 }
 0x109   : > { %v1513_v50 = vsel %vm5354_vm1, %v1512_v40, %v1508_v25  ;;  %v1519_v11 = vadd.f32 %v3445_v26, %v1518_v8  ;;  %v3451_v61 = vpop.eup %3450  ;;  %v1554_v38 = vand.u32 2147483647, %v5393_v62  ;;  %3458 = vpow2.f32 %v3111_v27 }
 0x10a   : > { %2875 = vst [vmem:[%s4122_s17 + $0x178] sm:$0xff] %v2747_v3  ;;  %v2748_v39 = vmul.f32 %v1513_v50, %v5173_v35  ;;  %v3453_v33 = vpop.eup %3452  ;;  %v1532_v47 = vsub.f32 1.0, %v1531_v24  ;;  %vm1536_vm10 = vweird.f32 %v3449_v18  ;;  %v5425_v55 = vadd.f32 1.0, %v3451_v61 }
 0x10b   : > { %v1523_v31 = vsel %vm5406_vm8, %v3445_v26, %v1519_v11  ;;  %v1556_v56 = vand.u32 2147483648, %v5393_v62  ;;  %v5431_v17 = vadd.f32 1.0, %v3453_v33  ;;  %3460 = vpow2.f32 %v3112_v42  ;;  %v3455_v28 = vpop.eup %3454  ;;  %vm5437_vm14 = vmor %vm1535_vm7, %vm1536_vm10 }
 0x10c   : > { %2876 = vst [vmem:[%s4122_s17 + $0x180] sm:$0xff] %v2748_v39  ;;  %v1528_v35 = vsel %vm5370_vm3, %v1527_v13, %v1523_v31  ;;  %v1533_v19 = vmul.f32 %v3449_v18, %v1532_v47  ;;  %v1542_v60 = vor.u32 1.1754944e-38, %v1541_v7  ;;  %3462 = vrcp.f32 %v5425_v55 }
 0x10d   : > { %v2749_v2 = vmul.f32 %v1528_v35, %v5185_v5  ;;  %vm1550_vm11 = vweird.f32 %v5393_v62  ;;  %vm5442_vm13 = vcmp.eq.f32.partialorder %v1554_v38, 8.507059e+37  ;;  %v1569_v59 = vand.u32 2147483647, %v5425_v55 }
 0x10e   : > { %v3457_v36 = vpop.eup %3456  ;;  %3464 = vrcp.f32 %v5431_v17  ;;  %v1534_v5 = vadd.f32 %v3449_v18, %v1533_v19  ;;  %v1571_v57 = vand.u32 2147483648, %v5425_v55  ;;  %v1584_v21 = vand.u32 2147483647, %v5431_v17 }
 0x10f   : > { %2877 = vst [vmem:[%s4122_s17 + $0x188] sm:$0xff] %v2749_v2  ;;  %v1546_v51 = vmul.f32 %v3457_v36, %v5393_v62  ;;  %v3459_v34 = vpop.eup %3458  ;;  %v1557_v4 = vor.u32 1.1754944e-38, %v1556_v56  ;;  %vm1565_vm12 = vweird.f32 %v5425_v55  ;;  %v1586_v46 = vand.u32 2147483648, %v5431_v17  ;;  %v5487_v62 = vld [vmem:[%s3960_s24 + $0x1c8] sm:$0xff]  ;;  %v5525_v2 = vld [vmem:[%s3960_s24 + $0x1d0] sm:$0xff] }
 0x110   : > { %v5454_v15 = vadd.f32 1.0, %v3455_v28  ;;  %v1538_v26 = vsel %vm5437_vm14, %v3449_v18, %v1534_v5  ;;  %vm1551_vm0 = vweird.f32 %v3457_v36  ;;  %v5458_v54 = vadd.f32 1.0, %v3459_v34  ;;  %v5537_v5 = vld [vmem:[%s3960_s24 + $0x1e0] sm:$0xff] }
 0x111   : > { %v1547_v63 = vsub.f32 1.0, %v1546_v51  ;;  %v3461_v53 = vpop.eup %3460  ;;  %v1543_v48 = vsel %vm5418_vm9, %v1542_v60, %v1538_v26  ;;  %vm5462_vm15 = vcmp.eq.f32.partialorder %v1569_v59, 8.507059e+37  ;;  %vm1580_vm1 = vweird.f32 %v5431_v17  ;;  %vm5475_vm2 = vmor %vm1550_vm11, %vm1551_vm0  ;;  %v5530_v60 = vld [vmem:[%s3960_s24 + $0x1d8] sm:$0xff] }
 0x112   : > { %3466 = vrcp.f32 %v5454_v15  ;;  %v3463_v1 = vpop.eup %3462  ;;  %v2750_v12 = vmul.f32 %v1543_v48, %v5205_v37  ;;  %v1572_v32 = vor.u32 1.1754944e-38, %v1571_v57  ;;  %vm5469_vm4 = vcmp.eq.f32.partialorder %v1584_v21, 8.507059e+37 }
 0x113   : > { %v1548_v30 = vmul.f32 %v3457_v36, %v1547_v63  ;;  %v1561_v0 = vmul.f32 %v3463_v1, %v5425_v55  ;;  %v1587_v52 = vor.u32 1.1754944e-38, %v1586_v46  ;;  %vm1595_vm3 = vweird.f32 %v5454_v15 }
 0x114   : > { %v3465_v58 = vpop.eup %3464  ;;  %3468 = vrcp.f32 %v5458_v54  ;;  %2878 = vst [vmem:[%s4122_s17 + $0x190] sm:$0xff] %v2750_v12  ;;  %v1599_v9 = vand.u32 2147483647, %v5454_v15  ;;  %v1601_v27 = vand.u32 2147483648, %v5454_v15  ;;  %vm1566_vm5 = vweird.f32 %v3463_v1 }
 0x115   : > { %v1549_v37 = vadd.f32 %v3457_v36, %v1548_v30  ;;  %v1576_v41 = vmul.f32 %v3465_v58, %v5431_v17  ;;  %v1562_v16 = vsub.f32 1.0, %v1561_v0  ;;  %vm1610_vm6 = vweird.f32 %v5458_v54  ;;  %vm5502_vm8 = vmor %vm1565_vm12, %vm1566_vm5 }
 0x116   : > { %v1614_v8 = vand.u32 2147483647, %v5458_v54  ;;  %vm1581_vm7 = vweird.f32 %v3465_v58  ;;  %v5493_v25 = vadd.f32 1.0, %v3461_v53  ;;  %v1616_v11 = vand.u32 2147483648, %v5458_v54  ;;  %v5557_v53 = vld [vmem:[%s3960_s24 + $0x1f0] sm:$0xff] }
 0x117   : > { %v1553_v18 = vsel %vm5475_vm2, %v3457_v36, %v1549_v37  ;;  %v1577_v3 = vsub.f32 1.0, %v1576_v41  ;;  %v1563_v50 = vmul.f32 %v3463_v1, %v1562_v16  ;;  %v3113_v24 = vmul.f32 -1.442695, %v5487_v62  ;;  %vm5513_vm10 = vmor %vm1580_vm1, %vm1581_vm7 }
 0x118   : > { %v3467_v6 = vpop.eup %3466  ;;  %v1558_v42 = vsel %vm5442_vm13, %v1557_v4, %v1553_v18  ;;  %vm5507_vm9 = vcmp.eq.f32.partialorder %v1599_v9, 8.507059e+37  ;;  %v1602_v47 = vor.u32 1.1754944e-38, %v1601_v27  ;;  %vm5517_vm14 = vcmp.eq.f32.partialorder %v1614_v8, 8.507059e+37  ;;  %v5552_v4 = vld [vmem:[%s3960_s24 + $0x1e8] sm:$0xff]  ;;  %v5584_v9 = vld [vmem:[%s3960_s24 + $0x1f8] sm:$0xff]  ;;  %v5587_v27 = vld [vmem:[%s3960_s24 + $0x200] sm:$0xff] }
 0x119   : > { %v2751_v7 = vmul.f32 %v1558_v42, %v5218_v44  ;;  %v1578_v39 = vmul.f32 %v3465_v58, %v1577_v3  ;;  %v1591_v45 = vmul.f32 %v3467_v6, %v5454_v15  ;;  %v1564_v31 = vadd.f32 %v3463_v1, %v1563_v50  ;;  %v5599_v3 = vld [vmem:[%s3960_s24 + $0x208] sm:$0xff] }
 0x11a   : > { %v3469_v33 = vpop.eup %3468  ;;  %3470 = vrcp.f32 %v5493_v25  ;;  %vm1596_vm11 = vweird.f32 %v3467_v6  ;;  %v1617_v19 = vor.u32 1.1754944e-38, %v1616_v11  ;;  %vm1625_vm0 = vweird.f32 %v5493_v25 }
 0x11b   : > { %2879 = vst [vmem:[%s4122_s17 + $0x198] sm:$0xff] %v2751_v7  ;;  %v1579_v35 = vadd.f32 %v3465_v58, %v1578_v39  ;;  %v1592_v56 = vsub.f32 1.0, %v1591_v45  ;;  %v1606_v28 = vmul.f32 %v3469_v33, %v5458_v54  ;;  %v1568_v17 = vsel %vm5502_vm8, %v3463_v1, %v1564_v31  ;;  %vm5545_vm12 = vmor %vm1595_vm3, %vm1596_vm11  ;;  %v5614_v7 = vld [vmem:[%s3960_s24 + $0x218] sm:$0xff] }
 0x11c   : > { %vm1611_vm13 = vweird.f32 %v3469_v33  ;;  %3472 = vpow2.f32 %v3113_v24  ;;  %v1573_v36 = vsel %vm5462_vm15, %v1572_v32, %v1568_v17  ;;  %v3114_v34 = vmul.f32 -1.442695, %v5525_v2 }
 0x11d   : > { %v1583_v49 = vsel %vm5513_vm10, %v3465_v58, %v1579_v35  ;;  %v1593_v14 = vmul.f32 %v3467_v6, %v1592_v56  ;;  %v1607_v59 = vsub.f32 1.0, %v1606_v28  ;;  %v2752_v51 = vmul.f32 %v1573_v36, %v5223_v20  ;;  %vm5563_vm15 = vmor %vm1610_vm6, %vm1611_vm13 }
 0x11e   : > { %v1588_v57 = vsel %vm5469_vm4, %v1587_v52, %v1583_v49  ;;  %v3115_v63 = vmul.f32 -1.442695, %v5530_v60  ;;  %v1629_v40 = vand.u32 2147483647, %v5493_v25  ;;  %v1631_v1 = vand.u32 2147483648, %v5493_v25 }
 0x11f   : > { %v2753_v46 = vmul.f32 %v1588_v57, %v5226_v43  ;;  %v1594_v20 = vadd.f32 %v3467_v6, %v1593_v14  ;;  %v1608_v26 = vmul.f32 %v3469_v33, %v1607_v59  ;;  %2880 = vst [vmem:[%s4122_s17 + $0x1a0] sm:$0xff] %v2752_v51  ;;  %3474 = vpow2.f32 %v3114_v34 }
 0x120   : > { %v3471_v15 = vpop.eup %3470  ;;  %v3116_v43 = vmul.f32 -1.442695, %v5537_v5  ;;  %v3117_v32 = vmul.f32 -1.442695, %v5552_v4  ;;  %3476 = vpow2.f32 %v3115_v63  ;;  %v3118_v22 = vmul.f32 -1.442695, %v5557_v53 }
 0x121   : > { %2881 = vst [vmem:[%s4122_s17 + $0x1a8] sm:$0xff] %v2753_v46  ;;  %v1598_v12 = vsel %vm5545_vm12, %v3467_v6, %v1594_v20  ;;  %v1609_v30 = vadd.f32 %v3469_v33, %v1608_v26  ;;  %v1621_v54 = vmul.f32 %v3471_v15, %v5493_v25  ;;  %vm1626_vm1 = vweird.f32 %v3471_v15  ;;  %v5602_v6 = vld [vmem:[%s3960_s24 + $0x210] sm:$0xff] }
 0x122   : > { %v3473_v13 = vpop.eup %3472  ;;  %v1603_v58 = vsel %vm5507_vm9, %v1602_v47, %v1598_v12  ;;  %3478 = vpow2.f32 %v3116_v43  ;;  %vm5593_vm4 = vcmp.eq.f32.partialorder %v1629_v40, 8.507059e+37  ;;  %vm5607_vm2 = vmor %vm1625_vm0, %vm1626_vm1  ;;  %v3119_v11 = vmul.f32 -1.442695, %v5584_v9 }
 0x123   : > { %v2754_v0 = vmul.f32 %v1603_v58, %v5229_v29  ;;  %v1613_v52 = vsel %vm5563_vm15, %v3469_v33, %v1609_v30  ;;  %v1622_v37 = vsub.f32 1.0, %v1621_v54  ;;  %v5581_v41 = vadd.f32 1.0, %v3473_v13 }
 0x124   : > { %v1618_v16 = vsel %vm5517_vm14, %v1617_v19, %v1613_v52  ;;  %v3120_v24 = vmul.f32 -1.442695, %v5587_v27  ;;  %v3121_v33 = vmul.f32 -1.442695, %v5599_v3  ;;  %v5627_v44 = vmul.f32 -1.442695, %v5602_v6 }
 0x125   : > { %2882 = vst [vmem:[%s4122_s17 + $0x1b0] sm:$0xff] %v2754_v0  ;;  %v2755_v8 = vmul.f32 %v1618_v16, %v5375_v10  ;;  %v1623_v29 = vmul.f32 %v3471_v15, %v1622_v37  ;;  %3480 = vrcp.f32 %v5581_v41  ;;  %v3475_v42 = vpop.eup %3474  ;;  %v1632_v10 = vor.u32 1.1754944e-38, %v1631_v1 }
 0x126   : > { %3482 = vpow2.f32 %v3117_v32  ;;  %v1644_v39 = vand.u32 2147483647, %v5581_v41  ;;  %v5618_v45 = vadd.f32 1.0, %v3475_v42  ;;  %v3477_v25 = vpop.eup %3476  ;;  %vm1640_vm3 = vweird.f32 %v5581_v41  ;;  %v5747_v32 = vld [vmem:[%s3960_s24 + $0x220] sm:$0xff] }
 0x127   : > { %2883 = vst [vmem:[%s4122_s17 + $0x1b8] sm:$0xff] %v2755_v8  ;;  %v1624_v61 = vadd.f32 %v3471_v15, %v1623_v29  ;;  %3484 = vpow2.f32 %v3118_v22  ;;  %v1646_v38 = vand.u32 2147483648, %v5581_v41  ;;  %v5630_v47 = vmul.f32 -1.442695, %v5614_v7 }
 0x128   : > { %3486 = vrcp.f32 %v5618_v45  ;;  %v3479_v55 = vpop.eup %3478  ;;  %v1659_v56 = vand.u32 2147483647, %v5618_v45  ;;  %v5635_v28 = vadd.f32 1.0, %v3477_v25  ;;  %vm5638_vm5 = vcmp.eq.f32.partialorder %v1644_v39, 8.507059e+37 }
 0x129   : > { %v1628_v31 = vsel %vm5607_vm2, %v3471_v15, %v1624_v61  ;;  %3488 = vpow2.f32 %v3119_v11  ;;  %v5642_v49 = vadd.f32 1.0, %v3479_v55  ;;  %v1647_v51 = vor.u32 1.1754944e-38, %v1646_v38 }
 0x12a   : > { %v1633_v35 = vsel %vm5593_vm4, %v1632_v10, %v1628_v31  ;;  %3490 = vpow2.f32 %v3120_v24  ;;  %v1661_v57 = vand.u32 2147483648, %v5618_v45  ;;  %vm1655_vm6 = vweird.f32 %v5618_v45 }
 0x12b   : > { %v3481_v17 = vpop.eup %3480  ;;  %v2756_v19 = vmul.f32 %v1633_v35, %v5389_v23  ;;  %3492 = vrcp.f32 %v5635_v28  ;;  %v1674_v23 = vand.u32 2147483647, %v5635_v28  ;;  %v1676_v34 = vand.u32 2147483648, %v5635_v28 }
 0x12c   : > { %v3483_v14 = vpop.eup %3482  ;;  %v1636_v59 = vmul.f32 %v3481_v17, %v5581_v41  ;;  %3494 = vrcp.f32 %v5642_v49  ;;  %vm1641_vm7 = vweird.f32 %v3481_v17  ;;  %vm5652_vm8 = vcmp.eq.f32.partialorder %v1659_v56, 8.507059e+37 }
 0x12d   : > { %v3485_v21 = vpop.eup %3484  ;;  %2884 = vst [vmem:[%s4122_s17 + $0x1c0] sm:$0xff] %v2756_v19  ;;  %3496 = vpow2.f32 %v3121_v33  ;;  %v1689_v63 = vand.u32 2147483647, %v5642_v49  ;;  %v1691_v15 = vand.u32 2147483648, %v5642_v49  ;;  %v5658_v48 = vadd.f32 1.0, %v3483_v14  ;;  %vm5666_vm10 = vmor %vm1640_vm3, %vm1641_vm7 }
 0x12e   : > { %v1637_v46 = vsub.f32 1.0, %v1636_v59  ;;  %v3487_v26 = vpop.eup %3486  ;;  %v5660_v40 = vadd.f32 1.0, %v3485_v21  ;;  %v1662_v30 = vor.u32 1.1754944e-38, %v1661_v57  ;;  %vm1670_vm9 = vweird.f32 %v5635_v28 }
 0x12f   : > { %v3489_v1 = vpop.eup %3488  ;;  %v1651_v12 = vmul.f32 %v3487_v26, %v5618_v45  ;;  %vm5670_vm14 = vcmp.eq.f32.partialorder %v1674_v23, 8.507059e+37  ;;  %v1677_v58 = vor.u32 1.1754944e-38, %v1676_v34  ;;  %vm1685_vm11 = vweird.f32 %v5642_v49 }
 0x130   : > { %v1638_v43 = vmul.f32 %v3481_v17, %v1637_v46  ;;  %v3491_v54 = vpop.eup %3490  ;;  %3498 = vrcp.f32 %v5658_v48  ;;  %vm1656_vm13 = vweird.f32 %v3487_v26  ;;  %vm5678_vm12 = vcmp.eq.f32.partialorder %v1689_v63, 8.507059e+37 }
 0x131   : > { %v3493_v22 = vpop.eup %3492  ;;  %v1652_v52 = vsub.f32 1.0, %v1651_v12  ;;  %3500 = vrcp.f32 %v5660_v40  ;;  %v1692_v8 = vor.u32 1.1754944e-38, %v1691_v15  ;;  %vm1700_vm0 = vweird.f32 %v5658_v48  ;;  %vm5691_vm15 = vmor %vm1655_vm6, %vm1656_vm13 }
 0x132   : > { %v1639_v0 = vadd.f32 %v3481_v17, %v1638_v43  ;;  %v3495_v37 = vpop.eup %3494  ;;  %v1666_v41 = vmul.f32 %v3493_v22, %v5635_v28  ;;  %v1704_v10 = vand.u32 2147483647, %v5658_v48  ;;  %vm1671_vm1 = vweird.f32 %v3493_v22 }
 0x133   : > { %v3497_v29 = vpop.eup %3496  ;;  %v1653_v42 = vmul.f32 %v3487_v26, %v1652_v52  ;;  %v1681_v50 = vmul.f32 %v3495_v37, %v5642_v49  ;;  %v1706_v39 = vand.u32 2147483648, %v5658_v48  ;;  %vm1686_vm4 = vweird.f32 %v3495_v37  ;;  %vm5706_vm3 = vmor %vm1670_vm9, %vm1671_vm1 }
 0x134   : > { %v1643_v18 = vsel %vm5666_vm10, %v3481_v17, %v1639_v0  ;;  %v1667_v61 = vsub.f32 1.0, %v1666_v41  ;;  %vm1715_vm2 = vweird.f32 %v5660_v40  ;;  %v1719_v35 = vand.u32 2147483647, %v5660_v40 }
 0x135   : > { %v1648_v11 = vsel %vm5638_vm5, %v1647_v51, %v1643_v18  ;;  %v1654_v38 = vadd.f32 %v3487_v26, %v1653_v42  ;;  %v1682_v33 = vsub.f32 1.0, %v1681_v50  ;;  %v5699_v45 = vadd.f32 1.0, %v3489_v1  ;;  %vm5717_vm5 = vmor %vm1685_vm11, %vm1686_vm4  ;;  %v5777_v50 = vld [vmem:[%s3960_s24 + $0x228] sm:$0xff] }
 0x136   : > { %v2757_v25 = vmul.f32 %v1648_v11, %v5487_v62  ;;  %v3499_v31 = vpop.eup %3498  ;;  %v1668_v55 = vmul.f32 %v3493_v22, %v1667_v61  ;;  %v1721_v14 = vand.u32 2147483648, %v5660_v40  ;;  %v5722_v21 = vadd.f32 1.0, %v3491_v54  ;;  %v5789_v61 = vld [vmem:[%s3960_s24 + $0x230] sm:$0xff] }
 0x137   : > { %v3501_v56 = vpop.eup %3500  ;;  %v1658_v17 = vsel %vm5691_vm15, %v3487_v26, %v1654_v38  ;;  %v1683_v19 = vmul.f32 %v3495_v37, %v1682_v33  ;;  %v1696_v36 = vmul.f32 %v3499_v31, %v5658_v48  ;;  %vm1701_vm6 = vweird.f32 %v3499_v31 }
 0x138   : > { %2885 = vst [vmem:[%s4122_s17 + $0x1c8] sm:$0xff] %v2757_v25  ;;  %v1663_v59 = vsel %vm5652_vm8, %v1662_v30, %v1658_v17  ;;  %v1669_v51 = vadd.f32 %v3493_v22, %v1668_v55  ;;  %v1711_v28 = vmul.f32 %v3501_v56, %v5660_v40  ;;  %vm1716_vm7 = vweird.f32 %v3501_v56  ;;  %vm5742_vm9 = vmor %vm1700_vm0, %vm1701_vm6 }
 0x139   : > { %v2758_v23 = vmul.f32 %v1663_v59, %v5525_v2  ;;  %v1684_v34 = vadd.f32 %v3495_v37, %v1683_v19  ;;  %v1697_v46 = vsub.f32 1.0, %v1696_v36  ;;  %3502 = vrcp.f32 %v5699_v45  ;;  %vm5753_vm10 = vmor %vm1715_vm2, %vm1716_vm7  ;;  %v5811_v36 = vld [vmem:[%s3960_s24 + $0x238] sm:$0xff] }
 0x13a   : > { %v1673_v20 = vsel %vm5706_vm3, %v3493_v22, %v1669_v51  ;;  %v1712_v26 = vsub.f32 1.0, %v1711_v28  ;;  %vm5733_vm8 = vcmp.eq.f32.partialorder %v1704_v10, 8.507059e+37  ;;  %v1707_v30 = vor.u32 1.1754944e-38, %v1706_v39  ;;  %v5817_v28 = vld [vmem:[%s3960_s24 + $0x240] sm:$0xff] }
 0x13b   : > { %2886 = vst [vmem:[%s4122_s17 + $0x1d0] sm:$0xff] %v2758_v23  ;;  %v1678_v49 = vsel %vm5670_vm14, %v1677_v58, %v1673_v20  ;;  %v1688_v63 = vsel %vm5717_vm5, %v3495_v37, %v1684_v34  ;;  %v1698_v2 = vmul.f32 %v3499_v31, %v1697_v46  ;;  %v1722_v22 = vor.u32 1.1754944e-38, %v1721_v14 }
 0x13c   : > { %v2759_v1 = vmul.f32 %v1678_v49, %v5530_v60  ;;  %v1693_v43 = vsel %vm5678_vm12, %v1692_v8, %v1688_v63  ;;  %v1713_v54 = vmul.f32 %v3501_v56, %v1712_v26  ;;  %3504 = vrcp.f32 %v5722_v21 }
 0x13d   : > { %v2760_v13 = vmul.f32 %v1693_v43, %v5537_v5  ;;  %v1699_v58 = vadd.f32 %v3499_v31, %v1698_v2  ;;  %vm1720_vm14 = vcmp.eq.f32.partialorder %v1719_v35, 8.507059e+37  ;;  %v1734_v0 = vand.u32 2147483647, %v5699_v45 }
 0x13e   : > { %2887 = vst [vmem:[%s4122_s17 + $0x1d8] sm:$0xff] %v2759_v1  ;;  %v1714_v48 = vadd.f32 %v3501_v56, %v1713_v54  ;;  %v5763_v52 = vadd.f32 1.0, %v3497_v29  ;;  %3506 = vpow2.f32 %v5627_v44  ;;  %v3124_v40 = vmul.f32 -1.442695, %v5747_v32 }
 0x13f   : > { %2888 = vst [vmem:[%s4122_s17 + $0x1e0] sm:$0xff] %v2760_v13  ;;  %v1703_v5 = vsel %vm5742_vm9, %v3499_v31, %v1699_v58  ;;  %v3503_v37 = vpop.eup %3502  ;;  %v1736_v8 = vand.u32 2147483648, %v5699_v45  ;;  %3508 = vpow2.f32 %v5630_v47  ;;  %v1749_v42 = vand.u32 2147483647, %v5722_v21 }
 0x140   : > { %v1708_v41 = vsel %vm5733_vm8, %v1707_v30, %v1703_v5  ;;  %v1718_v16 = vsel %vm5753_vm10, %v3501_v56, %v1714_v48  ;;  %v1726_v44 = vmul.f32 %v3503_v37, %v5699_v45  ;;  %vm1730_vm11 = vweird.f32 %v5699_v45 }
 0x141   : > { %v2761_v29 = vmul.f32 %v1708_v41, %v5552_v4  ;;  %v1723_v18 = vsel %vm1720_vm14, %v1722_v22, %v1718_v16  ;;  %vm5781_vm13 = vcmp.eq.f32.partialorder %v1734_v0, 8.507059e+37  ;;  %3510 = vrcp.f32 %v5763_v52  ;;  %v5848_v22 = vld [vmem:[%s3960_s24 + $0x248] sm:$0xff] }
 0x142   : > { %v2762_v10 = vmul.f32 %v1723_v18, %v5557_v53  ;;  %v3505_v47 = vpop.eup %3504  ;;  %v1727_v4 = vsub.f32 1.0, %v1726_v44  ;;  %vm1731_vm12 = vweird.f32 %v3503_v37  ;;  %v1751_v24 = vand.u32 2147483648, %v5722_v21 }
 0x143   : > { %2889 = vst [vmem:[%s4122_s17 + $0x1e8] sm:$0xff] %v2761_v29  ;;  %3512 = vpow2.f32 %v3124_v40  ;;  %v1737_v53 = vor.u32 1.1754944e-38, %v1736_v8  ;;  %v1741_v39 = vmul.f32 %v3505_v47, %v5722_v21  ;;  %v1764_v25 = vand.u32 2147483647, %v5763_v52  ;;  %vm5804_vm1 = vmor %vm1730_vm11, %vm1731_vm12 }
 0x144   : > { %2890 = vst [vmem:[%s4122_s17 + $0x1f0] sm:$0xff] %v2762_v10  ;;  %v3125_v38 = vmul.f32 -1.442695, %v5777_v50  ;;  %v3507_v33 = vpop.eup %3506  ;;  %v1728_v31 = vmul.f32 %v3503_v37, %v1727_v4  ;;  %vm1745_vm0 = vweird.f32 %v5722_v21  ;;  %vm5796_vm15 = vcmp.eq.f32.partialorder %v1749_v42, 8.507059e+37 }
 0x145   : > { %v1766_v35 = vand.u32 2147483648, %v5763_v52  ;;  %v3509_v56 = vpop.eup %3508  ;;  %v1742_v62 = vsub.f32 1.0, %v1741_v39  ;;  %vm1746_vm4 = vweird.f32 %v3505_v47  ;;  %v5808_v19 = vadd.f32 1.0, %v3507_v33 }
 0x146   : > { %3514 = vpow2.f32 %v3125_v38  ;;  %v1729_v14 = vadd.f32 %v3503_v37, %v1728_v31  ;;  %v1752_v59 = vor.u32 1.1754944e-38, %v1751_v24  ;;  %v5813_v51 = vadd.f32 1.0, %v3509_v56  ;;  %vm5830_vm5 = vmor %vm1745_vm0, %vm1746_vm4 }
 0x147   : > { %v3126_v57 = vmul.f32 -1.442695, %v5789_v61  ;;  %v3511_v45 = vpop.eup %3510  ;;  %v1743_v23 = vmul.f32 %v3505_v47, %v1742_v62  ;;  %vm1760_vm2 = vweird.f32 %v5763_v52  ;;  %vm5820_vm3 = vcmp.eq.f32.partialorder %v1764_v25, 8.507059e+37 }
 0x148   : > { %3516 = vrcp.f32 %v5808_v19  ;;  %v1733_v20 = vsel %vm5804_vm1, %v3503_v37, %v1729_v14  ;;  %v1756_v49 = vmul.f32 %v3511_v45, %v5763_v52  ;;  %v1767_v63 = vor.u32 1.1754944e-38, %v1766_v35 }
 0x149   : > { %v3513_v46 = vpop.eup %3512  ;;  %v3127_v2 = vmul.f32 -1.442695, %v5811_v36  ;;  %v1738_v15 = vsel %vm5781_vm13, %v1737_v53, %v1733_v20  ;;  %v1744_v1 = vadd.f32 %v3505_v47, %v1743_v23  ;;  %3518 = vrcp.f32 %v5813_v51 }
 0x14a   : > { %v3128_v43 = vmul.f32 -1.442695, %v5817_v28  ;;  %v2763_v21 = vmul.f32 %v1738_v15, %v5584_v9  ;;  %v1757_v12 = vsub.f32 1.0, %v1756_v49  ;;  %vm1761_vm6 = vweird.f32 %v3511_v45 }
 0x14b   : > { %3520 = vpow2.f32 %v3126_v57  ;;  %v1748_v54 = vsel %vm5830_vm5, %v3505_v47, %v1744_v1  ;;  %v1779_v13 = vand.u32 2147483647, %v5808_v19  ;;  %v1781_v58 = vand.u32 2147483648, %v5808_v19  ;;  %vm5859_vm7 = vmor %vm1760_vm2, %vm1761_vm6 }
 0x14c   : > { %v3515_v30 = vpop.eup %3514  ;;  %v5845_v60 = vadd.f32 1.0, %v3513_v46  ;;  %2891 = vst [vmem:[%s4122_s17 + $0x1f8] sm:$0xff] %v2763_v21  ;;  %v1753_v9 = vsel %vm5796_vm15, %v1752_v59, %v1748_v54  ;;  %v1758_v48 = vmul.f32 %v3511_v45, %v1757_v12  ;;  %3522 = vpow2.f32 %v3127_v2 }
 0x14d   : > { %v5853_v0 = vadd.f32 1.0, %v3515_v30  ;;  %v2764_v40 = vmul.f32 %v1753_v9, %v5587_v27  ;;  %v1794_v41 = vand.u32 2147483647, %v5813_v51  ;;  %v1796_v16 = vand.u32 2147483648, %v5813_v51 }
 0x14e   : > { %v3517_v5 = vpop.eup %3516  ;;  %3524 = vrcp.f32 %v5845_v60  ;;  %v1759_v8 = vadd.f32 %v3511_v45, %v1758_v48  ;;  %vm1775_vm8 = vweird.f32 %v5808_v19  ;;  %v5869_v27 = vmul.f32 -1.442695, %v5848_v22 }
 0x14f   : > { %v1771_v29 = vmul.f32 %v3517_v5, %v5808_v19  ;;  %v3519_v18 = vpop.eup %3518  ;;  %2892 = vst [vmem:[%s4122_s17 + $0x200] sm:$0xff] %v2764_v40  ;;  %vm5872_vm9 = vcmp.eq.f32.partialorder %v1779_v13, 8.507059e+37  ;;  %v1782_v44 = vor.u32 1.1754944e-38, %v1781_v58  ;;  %vm1790_vm10 = vweird.f32 %v5813_v51 }
 0x150   : > { %3526 = vrcp.f32 %v5853_v0  ;;  %v1763_v10 = vsel %vm5859_vm7, %v3511_v45, %v1759_v8  ;;  %vm1776_vm14 = vweird.f32 %v3517_v5  ;;  %v1786_v47 = vmul.f32 %v3519_v18, %v5813_v51 }
 0x151   : > { %v3521_v42 = vpop.eup %3520  ;;  %v1772_v11 = vsub.f32 1.0, %v1771_v29  ;;  %v1768_v4 = vsel %vm5820_vm3, %v1767_v63, %v1763_v10  ;;  %vm5883_vm11 = vcmp.eq.f32.partialorder %v1794_v41, 8.507059e+37  ;;  %v1797_v53 = vor.u32 1.1754944e-38, %v1796_v16  ;;  %vm5891_vm0 = vmor %vm1775_vm8, %vm1776_vm14 }
 0x152   : > { %vm1805_vm13 = vweird.f32 %v5845_v60  ;;  %v3523_v39 = vpop.eup %3522  ;;  %v2765_v25 = vmul.f32 %v1768_v4, %v5599_v3  ;;  %v1787_v33 = vsub.f32 1.0, %v1786_v47  ;;  %vm1791_vm12 = vweird.f32 %v3519_v18  ;;  %v6081_v47 = vld [vmem:[%s3960_s24 + $0x290] sm:$0xff] }
 0x153   : > { %v1773_v38 = vmul.f32 %v3517_v5, %v1772_v11  ;;  %v1809_v35 = vand.u32 2147483647, %v5845_v60  ;;  %v1811_v56 = vand.u32 2147483648, %v5845_v60  ;;  %v5897_v17 = vadd.f32 1.0, %v3521_v42  ;;  %vm5904_vm15 = vmor %vm1790_vm10, %vm1791_vm12  ;;  %v5970_v42 = vld [vmem:[%s3960_s24 + $0x258] sm:$0xff] }
 0x154   : > { %v3525_v31 = vpop.eup %3524  ;;  %3528 = vpow2.f32 %v3128_v43  ;;  %2893 = vst [vmem:[%s4122_s17 + $0x208] sm:$0xff] %v2765_v25  ;;  %v1788_v3 = vmul.f32 %v3519_v18, %v1787_v33  ;;  %v1824_v59 = vand.u32 2147483647, %v5853_v0  ;;  %v1826_v45 = vand.u32 2147483648, %v5853_v0  ;;  %v5926_v43 = vld [vmem:[%s3960_s24 + $0x250] sm:$0xff]  ;;  %v5983_v25 = vld [vmem:[%s3960_s24 + $0x260] sm:$0xff] }
 0x155   : > { %v1774_v62 = vadd.f32 %v3517_v5, %v1773_v38  ;;  %v1801_v14 = vmul.f32 %v3525_v31, %v5845_v60  ;;  %vm1806_vm1 = vweird.f32 %v3525_v31  ;;  %3530 = vrcp.f32 %v5897_v17 }
 0x156   : > { %v3527_v57 = vpop.eup %3526  ;;  %v5910_v23 = vadd.f32 1.0, %v3523_v39  ;;  %v1789_v46 = vadd.f32 %v3519_v18, %v1788_v3  ;;  %vm5917_vm4 = vcmp.eq.f32.partialorder %v1809_v35, 8.507059e+37  ;;  %vm1820_vm2 = vweird.f32 %v5853_v0  ;;  %vm5933_vm5 = vmor %vm1805_vm13, %vm1806_vm1  ;;  %v5999_v35 = vld [vmem:[%s3960_s24 + $0x268] sm:$0xff] }
 0x157   : > { %v1778_v34 = vsel %vm5891_vm0, %v3517_v5, %v1774_v62  ;;  %v1802_v20 = vsub.f32 1.0, %v1801_v14  ;;  %v1816_v26 = vmul.f32 %v3527_v57, %v5853_v0  ;;  %vm1821_vm3 = vweird.f32 %v3527_v57 }
 0x158   : > { %v1783_v51 = vsel %vm5872_vm9, %v1782_v44, %v1778_v34  ;;  %v1793_v2 = vsel %vm5904_vm15, %v3519_v18, %v1789_v46  ;;  %vm5937_vm6 = vcmp.eq.f32.partialorder %v1824_v59, 8.507059e+37  ;;  %3532 = vrcp.f32 %v5910_v23  ;;  %vm5947_vm7 = vmor %vm1820_vm2, %vm1821_vm3  ;;  %v6011_v46 = vld [vmem:[%s3960_s24 + $0x270] sm:$0xff] }
 0x159   : > { %v2766_v63 = vmul.f32 %v1783_v51, %v5602_v6  ;;  %v1803_v15 = vmul.f32 %v3525_v31, %v1802_v20  ;;  %v1817_v1 = vsub.f32 1.0, %v1816_v26  ;;  %v1798_v12 = vsel %vm5883_vm11, %v1797_v53, %v1793_v2 }
 0x15a   : > { %v3529_v21 = vpop.eup %3528  ;;  %v1812_v6 = vor.u32 1.1754944e-38, %v1811_v56  ;;  %v2767_v13 = vmul.f32 %v1798_v12, %v5614_v7  ;;  %v1827_v48 = vor.u32 1.1754944e-38, %v1826_v45  ;;  %v1839_v40 = vand.u32 2147483647, %v5897_v17 }
 0x15b   : > { %2894 = vst [vmem:[%s4122_s17 + $0x210] sm:$0xff] %v2766_v63  ;;  %v1804_v58 = vadd.f32 %v3525_v31, %v1803_v15  ;;  %v1818_v9 = vmul.f32 %v3527_v57, %v1817_v1  ;;  %v3531_v5 = vpop.eup %3530  ;;  %v5952_v37 = vadd.f32 1.0, %v3529_v21  ;;  %3534 = vpow2.f32 %v5869_v27 }
 0x15c   : > { %v3130_v7 = vmul.f32 -1.442695, %v5926_v43  ;;  %2895 = vst [vmem:[%s4122_s17 + $0x218] sm:$0xff] %v2767_v13  ;;  %v1831_v0 = vmul.f32 %v3531_v5, %v5897_v17  ;;  %v1841_v8 = vand.u32 2147483648, %v5897_v17  ;;  %vm1835_vm8 = vweird.f32 %v5897_v17 }
 0x15d   : > { %v1808_v41 = vsel %vm5933_vm5, %v3525_v31, %v1804_v58  ;;  %v1819_v16 = vadd.f32 %v3527_v57, %v1818_v9  ;;  %v1854_v18 = vand.u32 2147483647, %v5910_v23  ;;  %3536 = vrcp.f32 %v5952_v37  ;;  %v6043_v58 = vld [vmem:[%s3960_s24 + $0x288] sm:$0xff] }
 0x15e   : > { %v1813_v29 = vsel %vm5917_vm4, %v1812_v6, %v1808_v41  ;;  %v1832_v44 = vsub.f32 1.0, %v1831_v0  ;;  %vm1836_vm9 = vweird.f32 %v3531_v5  ;;  %v3533_v10 = vpop.eup %3532  ;;  %vm5974_vm10 = vcmp.eq.f32.partialorder %v1839_v40, 8.507059e+37 }
 0x15f   : > { %v2768_v27 = vmul.f32 %v1813_v29, %v5747_v32  ;;  %v1823_v52 = vsel %vm5947_vm7, %v3527_v57, %v1819_v16  ;;  %v1856_v4 = vand.u32 2147483648, %v5910_v23  ;;  %3538 = vpow2.f32 %v3130_v7  ;;  %vm5987_vm14 = vmor %vm1835_vm8, %vm1836_vm9 }
 0x160   : > { %v1828_v11 = vsel %vm5937_vm6, %v1827_v48, %v1823_v52  ;;  %v1833_v24 = vmul.f32 %v3531_v5, %v1832_v44  ;;  %v1842_v53 = vor.u32 1.1754944e-38, %v1841_v8  ;;  %v1846_v39 = vmul.f32 %v3533_v10, %v5910_v23 }
 0x161   : > { %2896 = vst [vmem:[%s4122_s17 + $0x220] sm:$0xff] %v2768_v27  ;;  %v2769_v32 = vmul.f32 %v1828_v11, %v5777_v50  ;;  %v3535_v38 = vpop.eup %3534  ;;  %vm1850_vm11 = vweird.f32 %v5910_v23  ;;  %vm5992_vm13 = vcmp.eq.f32.partialorder %v1854_v18, 8.507059e+37  ;;  %v1869_v50 = vand.u32 2147483647, %v5952_v37  ;;  %v6029_v23 = vld [vmem:[%s3960_s24 + $0x278] sm:$0xff] }
 0x162   : > { %v3131_v55 = vmul.f32 -1.442695, %v5970_v42  ;;  %v1834_v56 = vadd.f32 %v3531_v5, %v1833_v24  ;;  %v1847_v17 = vsub.f32 1.0, %v1846_v39  ;;  %vm1851_vm12 = vweird.f32 %v3533_v10 }
 0x163   : > { %2897 = vst [vmem:[%s4122_s17 + $0x228] sm:$0xff] %v2769_v32  ;;  %v6002_v62 = vadd.f32 1.0, %v3535_v38  ;;  %v3537_v3 = vpop.eup %3536  ;;  %v1857_v14 = vor.u32 1.1754944e-38, %v1856_v4  ;;  %vm1865_vm0 = vweird.f32 %v5952_v37  ;;  %v3132_v59 = vmul.f32 -1.442695, %v5983_v25  ;;  %vm6017_vm15 = vmor %vm1850_vm11, %vm1851_vm12  ;;  %v6084_v4 = vld [vmem:[%s3960_s24 + $0x298] sm:$0xff] }
 0x164   : > { %3540 = vpow2.f32 %v3131_v55  ;;  %v1838_v57 = vsel %vm5987_vm14, %v3531_v5, %v1834_v56  ;;  %v1848_v19 = vmul.f32 %v3533_v10, %v1847_v17  ;;  %v1861_v45 = vmul.f32 %v3537_v3, %v5952_v37 }
 0x165   : > { %v3133_v34 = vmul.f32 -1.442695, %v5999_v35  ;;  %v3539_v20 = vpop.eup %3538  ;;  %v1843_v26 = vsel %vm5974_vm10, %v1842_v53, %v1838_v57  ;;  %vm6021_vm1 = vcmp.eq.f32.partialorder %v1869_v50, 8.507059e+37  ;;  %v1871_v63 = vand.u32 2147483648, %v5952_v37 }
 0x166   : > { %3542 = vrcp.f32 %v6002_v62  ;;  %v2770_v2 = vmul.f32 %v1843_v26, %v5789_v61  ;;  %v1849_v15 = vadd.f32 %v3533_v10, %v1848_v19  ;;  %v1862_v1 = vsub.f32 1.0, %v1861_v45  ;;  %v6040_v61 = vld [vmem:[%s3960_s24 + $0x280] sm:$0xff] }
 0x167   : > { %vm1866_vm4 = vweird.f32 %v3537_v3  ;;  %v1884_v21 = vand.u32 2147483647, %v6002_v62  ;;  %v6032_v12 = vadd.f32 1.0, %v3539_v20  ;;  %3544 = vpow2.f32 %v3132_v59 }
 0x168   : > { %v3134_v30 = vmul.f32 -1.442695, %v6011_v46  ;;  %2898 = vst [vmem:[%s4122_s17 + $0x230] sm:$0xff] %v2770_v2  ;;  %v1853_v6 = vsel %vm6017_vm15, %v3533_v10, %v1849_v15  ;;  %v1863_v54 = vmul.f32 %v3537_v3, %v1862_v1  ;;  %v1886_v13 = vand.u32 2147483648, %v6002_v62  ;;  %vm6050_vm2 = vmor %vm1865_vm0, %vm1866_vm4 }
 0x169   : > { %3546 = vpow2.f32 %v3133_v34  ;;  %v1858_v48 = vsel %vm5992_vm13, %v1857_v14, %v1853_v6  ;;  %v1872_v60 = vor.u32 1.1754944e-38, %v1871_v63  ;;  %v3135_v40 = vmul.f32 -1.442695, %v6029_v23  ;;  %v6106_v14 = vld [vmem:[%s3960_s24 + $0x2a0] sm:$0xff] }
 0x16a   : > { %v3541_v9 = vpop.eup %3540  ;;  %3548 = vrcp.f32 %v6032_v12  ;;  %v2771_v7 = vmul.f32 %v1858_v48, %v5811_v36  ;;  %v1864_v41 = vadd.f32 %v3537_v3, %v1863_v54  ;;  %v1899_v16 = vand.u32 2147483647, %v6032_v12 }
 0x16b   : > { %v6058_v0 = vadd.f32 1.0, %v3541_v9  ;;  %vm1880_vm3 = vweird.f32 %v6002_v62  ;;  %vm6061_vm5 = vcmp.eq.f32.partialorder %v1884_v21, 8.507059e+37  ;;  %v6066_v29 = vmul.f32 -1.442695, %v6040_v61 }
 0x16c   : > { %v3543_v8 = vpop.eup %3542  ;;  %v6069_v18 = vmul.f32 -1.442695, %v6043_v58  ;;  %2899 = vst [vmem:[%s4122_s17 + $0x238] sm:$0xff] %v2771_v7  ;;  %v1868_v36 = vsel %vm6050_vm2, %v3537_v3, %v1864_v41  ;;  %v1887_v52 = vor.u32 1.1754944e-38, %v1886_v13  ;;  %3550 = vpow2.f32 %v3134_v30 }
 0x16d   : > { %v1876_v27 = vmul.f32 %v3543_v8, %v6002_v62  ;;  %v3545_v44 = vpop.eup %3544  ;;  %v1873_v10 = vsel %vm6021_vm1, %v1872_v60, %v1868_v36  ;;  %vm1895_vm6 = vweird.f32 %v6032_v12  ;;  %v1901_v11 = vand.u32 2147483648, %v6032_v12 }
 0x16e   : > { %3552 = vrcp.f32 %v6058_v0  ;;  %v2772_v24 = vmul.f32 %v1873_v10, %v5817_v28  ;;  %vm1881_vm7 = vweird.f32 %v3543_v8  ;;  %vm6087_vm8 = vcmp.eq.f32.partialorder %v1899_v16, 8.507059e+37 }
 0x16f   : > { %v3547_v32 = vpop.eup %3546  ;;  %v1877_v53 = vsub.f32 1.0, %v1876_v27  ;;  %v6091_v38 = vadd.f32 1.0, %v3545_v44  ;;  %v1914_v31 = vand.u32 2147483647, %v6058_v0  ;;  %v1916_v50 = vand.u32 2147483648, %v6058_v0  ;;  %vm6110_vm9 = vmor %vm1880_vm3, %vm1881_vm7 }
 0x170   : > { %v3549_v33 = vpop.eup %3548  ;;  %v6095_v55 = vadd.f32 1.0, %v3547_v32  ;;  %3554 = vpow2.f32 %v3135_v40  ;;  %2900 = vst [vmem:[%s4122_s17 + $0x240] sm:$0xff] %v2772_v24  ;;  %v6100_v17 = vmul.f32 -1.442695, %v6081_v47  ;;  %v6103_v3 = vmul.f32 -1.442695, %v6084_v4 }
 0x171   : > { %v1878_v56 = vmul.f32 %v3543_v8, %v1877_v53  ;;  %v1891_v28 = vmul.f32 %v3549_v33, %v6032_v12  ;;  %vm1896_vm10 = vweird.f32 %v3549_v33  ;;  %v1902_v57 = vor.u32 1.1754944e-38, %v1901_v11 }
 0x172   : > { %vm1910_vm14 = vweird.f32 %v6058_v0  ;;  %3556 = vrcp.f32 %v6091_v38  ;;  %v3551_v19 = vpop.eup %3550  ;;  %v1929_v20 = vand.u32 2147483647, %v6091_v38  ;;  %vm6118_vm11 = vcmp.eq.f32.partialorder %v1914_v31, 8.507059e+37  ;;  %vm6135_vm13 = vmor %vm1895_vm6, %vm1896_vm10 }
 0x173   : > { %v1879_v45 = vadd.f32 %v3543_v8, %v1878_v56  ;;  %v1892_v34 = vsub.f32 1.0, %v1891_v28  ;;  %3558 = vrcp.f32 %v6095_v55  ;;  %v1917_v51 = vor.u32 1.1754944e-38, %v1916_v50 }
 0x174   : > { %v3553_v26 = vpop.eup %3552  ;;  %v1931_v49 = vand.u32 2147483648, %v6091_v38  ;;  %v6124_v63 = vmul.f32 -1.442695, %v6106_v14  ;;  %v1944_v21 = vand.u32 2147483647, %v6095_v55  ;;  %vm1925_vm12 = vweird.f32 %v6091_v38 }
 0x175   : > { %v1883_v2 = vsel %vm6110_vm9, %v3543_v8, %v1879_v45  ;;  %v1893_v15 = vmul.f32 %v3549_v33, %v1892_v34  ;;  %v1906_v1 = vmul.f32 %v3553_v26, %v6058_v0  ;;  %vm1940_vm0 = vweird.f32 %v6095_v55 }
 0x176   : > { %v3555_v30 = vpop.eup %3554  ;;  %v1888_v6 = vsel %vm6061_vm5, %v1887_v52, %v1883_v2  ;;  %v6141_v13 = vadd.f32 1.0, %v3551_v19  ;;  %vm1911_vm15 = vweird.f32 %v3553_v26  ;;  %vm6144_vm1 = vcmp.eq.f32.partialorder %v1929_v20, 8.507059e+37 }
 0x177   : > { %v2773_v9 = vmul.f32 %v1888_v6, %v5848_v22  ;;  %v1894_v48 = vadd.f32 %v3549_v33, %v1893_v15  ;;  %v1907_v5 = vsub.f32 1.0, %v1906_v1  ;;  %v1932_v40 = vor.u32 1.1754944e-38, %v1931_v49  ;;  %vm6164_vm2 = vmor %vm1910_vm14, %vm1911_vm15 }
 0x178   : > { %v3557_v12 = vpop.eup %3556  ;;  %v1946_v7 = vand.u32 2147483648, %v6095_v55  ;;  %3560 = vrcp.f32 %v6141_v13  ;;  %v6150_v41 = vadd.f32 1.0, %v3555_v30  ;;  %vm6156_vm4 = vcmp.eq.f32.partialorder %v1944_v21, 8.507059e+37 }
 0x179   : > { %v3559_v16 = vpop.eup %3558  ;;  %2901 = vst [vmem:[%s4122_s17 + $0x248] sm:$0xff] %v2773_v9  ;;  %v1898_v22 = vsel %vm6135_vm13, %v3549_v33, %v1894_v48  ;;  %v1908_v8 = vmul.f32 %v3553_v26, %v1907_v5  ;;  %v1921_v37 = vmul.f32 %v3557_v12, %v6091_v38  ;;  %v1959_v10 = vand.u32 2147483647, %v6141_v13 }
 0x17a   : > { %v1903_v27 = vsel %vm6087_vm8, %v1902_v57, %v1898_v22  ;;  %v1936_v44 = vmul.f32 %v3559_v16, %v6095_v55  ;;  %v1961_v11 = vand.u32 2147483648, %v6141_v13  ;;  %vm1926_vm3 = vweird.f32 %v3557_v12  ;;  %v6208_v55 = vld [vmem:[%s3960_s24 + $0x2a8] sm:$0xff] }
 0x17b   : > { %v2774_v32 = vmul.f32 %v1903_v27, %v5926_v43  ;;  %v1909_v24 = vadd.f32 %v3553_v26, %v1908_v8  ;;  %v1922_v53 = vsub.f32 1.0, %v1921_v37  ;;  %vm1941_vm5 = vweird.f32 %v3559_v16  ;;  %vm6182_vm7 = vmor %vm1925_vm12, %vm1926_vm3 }
 0x17c   : > { %v1937_v33 = vsub.f32 1.0, %v1936_v44  ;;  %v1947_v39 = vor.u32 1.1754944e-38, %v1946_v7  ;;  %3562 = vrcp.f32 %v6150_v41  ;;  %vm1955_vm6 = vweird.f32 %v6141_v13  ;;  %vm6195_vm9 = vmor %vm1940_vm0, %vm1941_vm5 }
 0x17d   : > { %2902 = vst [vmem:[%s4122_s17 + $0x250] sm:$0xff] %v2774_v32  ;;  %v1913_v0 = vsel %vm6164_vm2, %v3553_v26, %v1909_v24  ;;  %v1923_v31 = vmul.f32 %v3557_v12, %v1922_v53  ;;  %3564 = vpow2.f32 %v6066_v29  ;;  %vm6186_vm8 = vcmp.eq.f32.partialorder %v1959_v10, 8.507059e+37  ;;  %v6211_v26 = vld [vmem:[%s3960_s24 + $0x2b0] sm:$0xff] }
 0x17e   : > { %v3561_v50 = vpop.eup %3560  ;;  %v1918_v43 = vsel %vm6118_vm11, %v1917_v51, %v1913_v0  ;;  %v1938_v28 = vmul.f32 %v3559_v16, %v1937_v33  ;;  %3566 = vpow2.f32 %v6069_v18  ;;  %v1962_v45 = vor.u32 1.1754944e-38, %v1961_v11 }
 0x17f   : > { %v2775_v29 = vmul.f32 %v1918_v43, %v5970_v42  ;;  %v1924_v57 = vadd.f32 %v3557_v12, %v1923_v31  ;;  %v1951_v19 = vmul.f32 %v3561_v50, %v6141_v13  ;;  %vm1970_vm10 = vweird.f32 %v6150_v41 }
 0x180   : > { %v1939_v34 = vadd.f32 %v3559_v16, %v1938_v28  ;;  %v1974_v20 = vand.u32 2147483647, %v6150_v41  ;;  %3568 = vpow2.f32 %v6100_v17  ;;  %vm1956_vm14 = vweird.f32 %v3561_v50 }
 0x181   : > { %2903 = vst [vmem:[%s4122_s17 + $0x258] sm:$0xff] %v2775_v29  ;;  %v1928_v42 = vsel %vm6182_vm7, %v3557_v12, %v1924_v57  ;;  %v1952_v18 = vsub.f32 1.0, %v1951_v19  ;;  %3570 = vpow2.f32 %v6103_v3  ;;  %v1976_v49 = vand.u32 2147483648, %v6150_v41  ;;  %vm6227_vm11 = vmor %vm1955_vm6, %vm1956_vm14 }
 0x182   : > { %v3563_v62 = vpop.eup %3562  ;;  %v1933_v51 = vsel %vm6144_vm1, %v1932_v40, %v1928_v42  ;;  %v1943_v17 = vsel %vm6195_vm9, %v3559_v16, %v1939_v34  ;;  %3572 = vpow2.f32 %v6124_v63  ;;  %v3142_v9 = vmul.f32 -1.442695, %v6211_v26 }
 0x183   : > { %v3565_v2 = vpop.eup %3564  ;;  %v2776_v3 = vmul.f32 %v1933_v51, %v5983_v25  ;;  %v1948_v15 = vsel %vm6156_vm4, %v1947_v39, %v1943_v17  ;;  %v1953_v1 = vmul.f32 %v3561_v50, %v1952_v18  ;;  %v1966_v21 = vmul.f32 %v3563_v62, %v6150_v41 }
 0x184   : > { %v3567_v30 = vpop.eup %3566  ;;  %v2777_v6 = vmul.f32 %v1948_v15, %v5999_v35  ;;  %v6231_v63 = vadd.f32 1.0, %v3565_v2  ;;  %v3141_v25 = vmul.f32 -1.442695, %v6208_v55  ;;  %vm1971_vm13 = vweird.f32 %v3563_v62  ;;  %v6239_v35 = vld [vmem:[%s3960_s24 + $0x2b8] sm:$0xff] }
 0x185   : > { %2904 = vst [vmem:[%s4122_s17 + $0x260] sm:$0xff] %v2776_v3  ;;  %v1954_v48 = vadd.f32 %v3561_v50, %v1953_v1  ;;  %v1967_v5 = vsub.f32 1.0, %v1966_v21  ;;  %v6236_v60 = vadd.f32 1.0, %v3567_v30  ;;  %vm6242_vm12 = vcmp.eq.f32.partialorder %v1974_v20, 8.507059e+37  ;;  %vm6257_vm0 = vmor %vm1970_vm10, %vm1971_vm13 }
 0x186   : > { %v3569_v12 = vpop.eup %3568  ;;  %2905 = vst [vmem:[%s4122_s17 + $0x268] sm:$0xff] %v2777_v6  ;;  %v1977_v40 = vor.u32 1.1754944e-38, %v1976_v49  ;;  %3574 = vrcp.f32 %v6231_v63  ;;  %v1989_v7 = vand.u32 2147483647, %v6231_v63  ;;  %v1991_v37 = vand.u32 2147483648, %v6231_v63 }
 0x187   : > { %v3571_v16 = vpop.eup %3570  ;;  %v1958_v22 = vsel %vm6227_vm11, %v3561_v50, %v1954_v48  ;;  %v1968_v8 = vmul.f32 %v3563_v62, %v1967_v5  ;;  %3576 = vrcp.f32 %v6236_v60  ;;  %v2004_v44 = vand.u32 2147483647, %v6236_v60 }
 0x188   : > { %v3573_v36 = vpop.eup %3572  ;;  %v1963_v27 = vsel %vm6186_vm8, %v1962_v45, %v1958_v22  ;;  %3578 = vpow2.f32 %v3141_v25  ;;  %v3143_v10 = vmul.f32 -1.442695, %v6239_v35  ;;  %v6264_v24 = vadd.f32 1.0, %v3569_v12 }
 0x189   : > { %v2778_v11 = vmul.f32 %v1963_v27, %v6011_v46  ;;  %v1969_v32 = vadd.f32 %v3563_v62, %v1968_v8  ;;  %3580 = vpow2.f32 %v3142_v9  ;;  %vm1985_vm15 = vweird.f32 %v6231_v63 }
 0x18a   : > { %vm2000_vm1 = vweird.f32 %v6236_v60  ;;  %v2006_v41 = vand.u32 2147483648, %v6236_v60  ;;  %v6269_v53 = vadd.f32 1.0, %v3571_v16  ;;  %vm6274_vm4 = vcmp.eq.f32.partialorder %v1989_v7, 8.507059e+37 }
 0x18b   : > { %2906 = vst [vmem:[%s4122_s17 + $0x270] sm:$0xff] %v2778_v11  ;;  %v1973_v33 = vsel %vm6257_vm0, %v3563_v62, %v1969_v32  ;;  %v1992_v46 = vor.u32 1.1754944e-38, %v1991_v37  ;;  %3582 = vrcp.f32 %v6264_v24  ;;  %v6279_v0 = vadd.f32 1.0, %v3573_v36 }
 0x18c   : > { %v3575_v31 = vpop.eup %3574  ;;  %v1978_v50 = vsel %vm6242_vm12, %v1977_v40, %v1973_v33  ;;  %vm6283_vm2 = vcmp.eq.f32.partialorder %v2004_v44, 8.507059e+37  ;;  %v2019_v56 = vand.u32 2147483647, %v6264_v24  ;;  %3584 = vrcp.f32 %v6269_v53  ;;  %v6449_v44 = vld [vmem:[%s3960_s24 + $0x2f8] sm:$0xff] }
 0x18d   : > { %v3577_v28 = vpop.eup %3576  ;;  %v2779_v59 = vmul.f32 %v1978_v50, %v6029_v23  ;;  %v1981_v29 = vmul.f32 %v3575_v31, %v6231_v63  ;;  %v2021_v57 = vand.u32 2147483648, %v6264_v24  ;;  %3586 = vpow2.f32 %v3143_v10 }
 0x18e   : > { %v3579_v38 = vpop.eup %3578  ;;  %vm1986_vm3 = vweird.f32 %v3575_v31  ;;  %v1996_v19 = vmul.f32 %v3577_v28, %v6236_v60  ;;  %v2007_v45 = vor.u32 1.1754944e-38, %v2006_v41  ;;  %vm2015_vm5 = vweird.f32 %v6264_v24 }
 0x18f   : > { %v3581_v34 = vpop.eup %3580  ;;  %2907 = vst [vmem:[%s4122_s17 + $0x278] sm:$0xff] %v2779_v59  ;;  %v1982_v20 = vsub.f32 1.0, %v1981_v29  ;;  %v2034_v42 = vand.u32 2147483647, %v6269_v53  ;;  %v2036_v18 = vand.u32 2147483648, %v6269_v53  ;;  %3588 = vrcp.f32 %v6279_v0  ;;  %vm6309_vm9 = vmor %vm1985_vm15, %vm1986_vm3 }
 0x190   : > { %v1997_v23 = vsub.f32 1.0, %v1996_v19  ;;  %vm2001_vm6 = vweird.f32 %v3577_v28  ;;  %vm6298_vm7 = vcmp.eq.f32.partialorder %v2019_v56, 8.507059e+37  ;;  %vm2030_vm8 = vweird.f32 %v6269_v53 }
 0x191   : > { %v3583_v51 = vpop.eup %3582  ;;  %v1983_v17 = vmul.f32 %v3575_v31, %v1982_v20  ;;  %v2022_v49 = vor.u32 1.1754944e-38, %v2021_v57  ;;  %v2049_v2 = vand.u32 2147483647, %v6279_v0  ;;  %v6304_v3 = vadd.f32 1.0, %v3579_v38  ;;  %vm6319_vm14 = vmor %vm2000_vm1, %vm2001_vm6 }
 0x192   : > { %v3585_v15 = vpop.eup %3584  ;;  %v1998_v21 = vmul.f32 %v3577_v28, %v1997_v23  ;;  %v2011_v30 = vmul.f32 %v3583_v51, %v6264_v24  ;;  %vm2045_vm10 = vweird.f32 %v6279_v0  ;;  %v2051_v6 = vand.u32 2147483648, %v6279_v0  ;;  %v6357_v24 = vld [vmem:[%s3960_s24 + $0x2c0] sm:$0xff] }
 0x193   : > { %v3587_v54 = vpop.eup %3586  ;;  %v1984_v25 = vadd.f32 %v3575_v31, %v1983_v17  ;;  %v2026_v63 = vmul.f32 %v3585_v15, %v6269_v53  ;;  %vm6324_vm11 = vcmp.eq.f32.partialorder %v2034_v42, 8.507059e+37  ;;  %v2037_v5 = vor.u32 1.1754944e-38, %v2036_v18 }
 0x194   : > { %v1999_v12 = vadd.f32 %v3577_v28, %v1998_v21  ;;  %v2012_v13 = vsub.f32 1.0, %v2011_v30  ;;  %vm2016_vm13 = vweird.f32 %v3583_v51  ;;  %3590 = vrcp.f32 %v6304_v3 }
 0x195   : > { %v3589_v40 = vpop.eup %3588  ;;  %v1988_v60 = vsel %vm6309_vm9, %v3575_v31, %v1984_v25  ;;  %v2027_v7 = vsub.f32 1.0, %v2026_v63  ;;  %vm2031_vm12 = vweird.f32 %v3585_v15  ;;  %vm6331_vm0 = vcmp.eq.f32.partialorder %v2049_v2, 8.507059e+37  ;;  %vm6345_vm15 = vmor %vm2015_vm5, %vm2016_vm13  ;;  %v6410_v2 = vld [vmem:[%s3960_s24 + $0x2e0] sm:$0xff]  ;;  %v6424_v25 = vld [vmem:[%s3960_s24 + $0x2e8] sm:$0xff] }
 0x196   : > { %v1993_v22 = vsel %vm6274_vm4, %v1992_v46, %v1988_v60  ;;  %v2003_v8 = vsel %vm6319_vm14, %v3577_v28, %v1999_v12  ;;  %v2013_v37 = vmul.f32 %v3583_v51, %v2012_v13  ;;  %v2041_v36 = vmul.f32 %v3589_v40, %v6279_v0  ;;  %vm6352_vm1 = vmor %vm2030_vm8, %vm2031_vm12  ;;  %v6371_v28 = vld [vmem:[%s3960_s24 + $0x2c8] sm:$0xff] }
 0x197   : > { %v2780_v27 = vmul.f32 %v1993_v22, %v6040_v61  ;;  %v2008_v52 = vsel %vm6283_vm2, %v2007_v45, %v2003_v8  ;;  %v2028_v10 = vmul.f32 %v3585_v15, %v2027_v7  ;;  %v2052_v11 = vor.u32 1.1754944e-38, %v2051_v6  ;;  %v6458_v61 = vld [vmem:[%s3960_s24 + $0x308] sm:$0xff] }
 0x198   : > { %v2781_v32 = vmul.f32 %v2008_v52, %v6043_v58  ;;  %v2014_v41 = vadd.f32 %v3583_v51, %v2013_v37  ;;  %v2042_v33 = vsub.f32 1.0, %v2041_v36  ;;  %vm2046_vm4 = vweird.f32 %v3589_v40 }
 0x199   : > { %2908 = vst [vmem:[%s4122_s17 + $0x280] sm:$0xff] %v2780_v27  ;;  %v2029_v39 = vadd.f32 %v3585_v15, %v2028_v10  ;;  %vm2060_vm2 = vweird.f32 %v6304_v3  ;;  %v2064_v46 = vand.u32 2147483647, %v6304_v3  ;;  %v6362_v31 = vadd.f32 1.0, %v3581_v34  ;;  %vm6380_vm3 = vmor %vm2045_vm10, %vm2046_vm4 }
 0x19a   : > { %v3591_v58 = vpop.eup %3590  ;;  %2909 = vst [vmem:[%s4122_s17 + $0x288] sm:$0xff] %v2781_v32  ;;  %v2018_v53 = vsel %vm6345_vm15, %v3583_v51, %v2014_v41  ;;  %v2043_v50 = vmul.f32 %v3589_v40, %v2042_v33  ;;  %v2066_v43 = vand.u32 2147483648, %v6304_v3  ;;  %v6368_v56 = vadd.f32 1.0, %v3587_v54  ;;  %v6455_v41 = vld [vmem:[%s3960_s24 + $0x300] sm:$0xff] }
 0x19b   : > { %v2023_v59 = vsel %vm6298_vm7, %v2022_v49, %v2018_v53  ;;  %v2033_v29 = vsel %vm6352_vm1, %v3585_v15, %v2029_v39  ;;  %v2056_v38 = vmul.f32 %v3591_v58, %v6304_v3  ;;  %v3144_v19 = vmul.f32 -1.442695, %v6357_v24  ;;  %v6407_v49 = vld [vmem:[%s3960_s24 + $0x2d8] sm:$0xff]  ;;  %v6474_v53 = vld [vmem:[%s3960_s24 + $0x310] sm:$0xff] }
 0x19c   : > { %v2782_v45 = vmul.f32 %v2023_v59, %v6081_v47  ;;  %v2038_v34 = vsel %vm6324_vm11, %v2037_v5, %v2033_v29  ;;  %v2044_v20 = vadd.f32 %v3589_v40, %v2043_v50  ;;  %3592 = vrcp.f32 %v6362_v31  ;;  %v6397_v47 = vld [vmem:[%s3960_s24 + $0x2d0] sm:$0xff]  ;;  %v6481_v29 = vld [vmem:[%s3960_s24 + $0x318] sm:$0xff] }
 0x19d   : > { %v2783_v0 = vmul.f32 %v2038_v34, %v6084_v4  ;;  %v2057_v42 = vsub.f32 1.0, %v2056_v38  ;;  %vm2061_vm5 = vweird.f32 %v3591_v58  ;;  %v3145_v18 = vmul.f32 -1.442695, %v6371_v28 }
 0x19e   : > { %2910 = vst [vmem:[%s4122_s17 + $0x290] sm:$0xff] %v2782_v45  ;;  %v2048_v23 = vsel %vm6380_vm3, %v3589_v40, %v2044_v20  ;;  %3594 = vrcp.f32 %v6368_v56  ;;  %vm6402_vm6 = vcmp.eq.f32.partialorder %v2064_v46, 8.507059e+37  ;;  %v2067_v17 = vor.u32 1.1754944e-38, %v2066_v43  ;;  %vm6415_vm7 = vmor %vm2060_vm2, %vm2061_vm5 }
 0x19f   : > { %2911 = vst [vmem:[%s4122_s17 + $0x298] sm:$0xff] %v2783_v0  ;;  %v2053_v62 = vsel %vm6331_vm0, %v2052_v11, %v2048_v23  ;;  %v2058_v51 = vmul.f32 %v3591_v58, %v2057_v42  ;;  %vm2075_vm8 = vweird.f32 %v6362_v31  ;;  %v2079_v21 = vand.u32 2147483647, %v6362_v31 }
 0x1a0   : > { %v2784_v15 = vmul.f32 %v2053_v62, %v6106_v14  ;;  %3596 = vpow2.f32 %v3144_v19  ;;  %v2094_v6 = vand.u32 2147483647, %v6368_v56  ;;  %v3146_v54 = vmul.f32 -1.442695, %v6397_v47  ;;  %v6427_v14 = vld [vmem:[%s3960_s24 + $0x2f0] sm:$0xff] }
 0x1a1   : > { %v2059_v30 = vadd.f32 %v3591_v58, %v2058_v51  ;;  %3598 = vpow2.f32 %v3145_v18  ;;  %v2081_v9 = vand.u32 2147483648, %v6362_v31  ;;  %vm2090_vm9 = vweird.f32 %v6368_v56 }
 0x1a2   : > { %v3593_v3 = vpop.eup %3592  ;;  %2912 = vst [vmem:[%s4122_s17 + $0x2a0] sm:$0xff] %v2784_v15  ;;  %v3147_v63 = vmul.f32 -1.442695, %v6407_v49  ;;  %v3148_v48 = vmul.f32 -1.442695, %v6410_v2  ;;  %v2096_v13 = vand.u32 2147483648, %v6368_v56  ;;  %3600 = vpow2.f32 %v3146_v54 }
 0x1a3   : > { %v2063_v5 = vsel %vm6415_vm7, %v3591_v58, %v2059_v30  ;;  %v2071_v12 = vmul.f32 %v3593_v3, %v6362_v31  ;;  %vm2076_vm10 = vweird.f32 %v3593_v3  ;;  %v3149_v7 = vmul.f32 -1.442695, %v6424_v25 }
 0x1a4   : > { %v3595_v40 = vpop.eup %3594  ;;  %v2068_v60 = vsel %vm6402_vm6, %v2067_v17, %v2063_v5  ;;  %v3150_v16 = vmul.f32 -1.442695, %v6427_v14  ;;  %3602 = vpow2.f32 %v3147_v63  ;;  %vm6444_vm14 = vcmp.eq.f32.partialorder %v2079_v21, 8.507059e+37  ;;  %vm6463_vm13 = vmor %vm2075_vm8, %vm2076_vm10 }
 0x1a5   : > { %v2785_v22 = vmul.f32 %v2068_v60, %v6208_v55  ;;  %v2072_v8 = vsub.f32 1.0, %v2071_v12  ;;  %v2086_v37 = vmul.f32 %v3595_v40, %v6368_v56  ;;  %v2082_v52 = vor.u32 1.1754944e-38, %v2081_v9 }
 0x1a6   : > { %v3597_v36 = vpop.eup %3596  ;;  %vm2091_vm11 = vweird.f32 %v3595_v40  ;;  %3604 = vpow2.f32 %v3148_v48  ;;  %vm6467_vm12 = vcmp.eq.f32.partialorder %v2094_v6, 8.507059e+37  ;;  %v2097_v46 = vor.u32 1.1754944e-38, %v2096_v13 }
 0x1a7   : > { %v3599_v10 = vpop.eup %3598  ;;  %2913 = vst [vmem:[%s4122_s17 + $0x2a8] sm:$0xff] %v2785_v22  ;;  %v2073_v55 = vmul.f32 %v3593_v3, %v2072_v8  ;;  %v2087_v11 = vsub.f32 1.0, %v2086_v37  ;;  %v6452_v32 = vadd.f32 1.0, %v3597_v36  ;;  %3606 = vpow2.f32 %v3149_v7  ;;  %vm6486_vm0 = vmor %vm2090_vm9, %vm2091_vm11 }
 0x1a8   : > { %v6471_v58 = vadd.f32 1.0, %v3599_v10  ;;  %3608 = vpow2.f32 %v3150_v16  ;;  %v3601_v50 = vpop.eup %3600  ;;  %v6478_v31 = vmul.f32 -1.442695, %v6449_v44  ;;  %v6493_v19 = vmul.f32 -1.442695, %v6455_v41  ;;  %v6632_v10 = vld [vmem:[%s3960_s24 + $0x328] sm:$0xff] }
 0x1a9   : > { %v2074_v43 = vadd.f32 %v3593_v3, %v2073_v55  ;;  %v2088_v59 = vmul.f32 %v3595_v40, %v2087_v11  ;;  %3610 = vrcp.f32 %v6452_v32  ;;  %v2109_v38 = vand.u32 2147483647, %v6452_v32 }
 0x1aa   : > { %3612 = vrcp.f32 %v6471_v58  ;;  %v6496_v45 = vmul.f32 -1.442695, %v6458_v61  ;;  %v3603_v34 = vpop.eup %3602  ;;  %v2111_v56 = vand.u32 2147483648, %v6452_v32  ;;  %v6502_v42 = vmul.f32 -1.442695, %v6474_v53 }
 0x1ab   : > { %v2078_v20 = vsel %vm6463_vm13, %v3593_v3, %v2074_v43  ;;  %v2089_v0 = vadd.f32 %v3595_v40, %v2088_v59  ;;  %v2124_v62 = vand.u32 2147483647, %v6471_v58  ;;  %v6507_v51 = vadd.f32 1.0, %v3601_v50 }
 0x1ac   : > { %v3605_v18 = vpop.eup %3604  ;;  %v2083_v23 = vsel %vm6444_vm14, %v2082_v52, %v2078_v20  ;;  %v6510_v4 = vmul.f32 -1.442695, %v6481_v29  ;;  %vm2105_vm15 = vweird.f32 %v6452_v32  ;;  %v2126_v21 = vand.u32 2147483648, %v6471_v58 }
 0x1ad   : > { %v3607_v17 = vpop.eup %3606  ;;  %v2786_v15 = vmul.f32 %v2083_v23, %v6211_v26  ;;  %v2093_v1 = vsel %vm6486_vm0, %v3595_v40, %v2089_v0  ;;  %vm6519_vm1 = vcmp.eq.f32.partialorder %v2109_v38, 8.507059e+37  ;;  %vm2120_vm4 = vweird.f32 %v6471_v58 }
 0x1ae   : > { %v3609_v30 = vpop.eup %3608  ;;  %v2098_v6 = vsel %vm6467_vm12, %v2097_v46, %v2093_v1  ;;  %3614 = vrcp.f32 %v6507_v51  ;;  %v2112_v9 = vor.u32 1.1754944e-38, %v2111_v56  ;;  %v6527_v63 = vadd.f32 1.0, %v3603_v34 }
 0x1af   : > { %v3611_v26 = vpop.eup %3610  ;;  %2914 = vst [vmem:[%s4122_s17 + $0x2b0] sm:$0xff] %v2786_v15  ;;  %v2787_v3 = vmul.f32 %v2098_v6, %v6239_v35  ;;  %v6529_v48 = vadd.f32 1.0, %v3605_v18  ;;  %vm6532_vm2 = vcmp.eq.f32.partialorder %v2124_v62, 8.507059e+37  ;;  %v2139_v40 = vand.u32 2147483647, %v6507_v51 }
 0x1b0   : > { %v3613_v5 = vpop.eup %3612  ;;  %v2101_v12 = vmul.f32 %v3611_v26, %v6452_v32  ;;  %v2141_v60 = vand.u32 2147483648, %v6507_v51  ;;  %vm2106_vm3 = vweird.f32 %v3611_v26  ;;  %v2127_v7 = vor.u32 1.1754944e-38, %v2126_v21 }
 0x1b1   : > { %2915 = vst [vmem:[%s4122_s17 + $0x2b8] sm:$0xff] %v2787_v3  ;;  %v2116_v35 = vmul.f32 %v3613_v5, %v6471_v58  ;;  %3616 = vrcp.f32 %v6527_v63  ;;  %v2154_v22 = vand.u32 2147483647, %v6527_v63  ;;  %v2156_v8 = vand.u32 2147483648, %v6527_v63  ;;  %vm6555_vm9 = vmor %vm2105_vm15, %vm2106_vm3 }
 0x1b2   : > { %v2102_v16 = vsub.f32 1.0, %v2101_v12  ;;  %v6543_v37 = vadd.f32 1.0, %v3607_v17  ;;  %vm2121_vm5 = vweird.f32 %v3613_v5  ;;  %vm2135_vm6 = vweird.f32 %v6507_v51 }
 0x1b3   : > { %v2117_v36 = vsub.f32 1.0, %v2116_v35  ;;  %3618 = vrcp.f32 %v6529_v48  ;;  %vm6547_vm7 = vcmp.eq.f32.partialorder %v2139_v40, 8.507059e+37  ;;  %v2142_v55 = vor.u32 1.1754944e-38, %v2141_v60  ;;  %vm6564_vm14 = vmor %vm2120_vm4, %vm2121_vm5 }
 0x1b4   : > { %v3615_v27 = vpop.eup %3614  ;;  %v2103_v52 = vmul.f32 %v3611_v26, %v2102_v16  ;;  %vm2150_vm8 = vweird.f32 %v6527_v63  ;;  %vm2165_vm10 = vweird.f32 %v6529_v48  ;;  %v2169_v46 = vand.u32 2147483647, %v6529_v48 }
 0x1b5   : > { %v2118_v33 = vmul.f32 %v3613_v5, %v2117_v36  ;;  %v2131_v39 = vmul.f32 %v3615_v27, %v6507_v51  ;;  %vm6568_vm11 = vcmp.eq.f32.partialorder %v2154_v22, 8.507059e+37  ;;  %v2157_v59 = vor.u32 1.1754944e-38, %v2156_v8 }
 0x1b6   : > { %v2104_v50 = vadd.f32 %v3611_v26, %v2103_v52  ;;  %v2171_v57 = vand.u32 2147483648, %v6529_v48  ;;  %3620 = vrcp.f32 %v6543_v37  ;;  %vm2136_vm13 = vweird.f32 %v3615_v27 }
 0x1b7   : > { %v3617_v38 = vpop.eup %3616  ;;  %v2119_v34 = vadd.f32 %v3613_v5, %v2118_v33  ;;  %v2132_v20 = vsub.f32 1.0, %v2131_v39  ;;  %v2184_v0 = vand.u32 2147483647, %v6543_v37  ;;  %v2186_v18 = vand.u32 2147483648, %v6543_v37  ;;  %vm6590_vm0 = vmor %vm2135_vm6, %vm2136_vm13  ;;  %v6644_v33 = vld [vmem:[%s3960_s24 + $0x330] sm:$0xff] }
 0x1b8   : > { %v2108_v58 = vsel %vm6555_vm9, %v3611_v26, %v2104_v50  ;;  %v2146_v56 = vmul.f32 %v3617_v38, %v6527_v63  ;;  %v6579_v23 = vadd.f32 1.0, %v3609_v30  ;;  %vm2151_vm12 = vweird.f32 %v3617_v38  ;;  %v6621_v63 = vld [vmem:[%s3960_s24 + $0x320] sm:$0xff] }
 0x1b9   : > { %v3619_v62 = vpop.eup %3618  ;;  %v2113_v17 = vsel %vm6519_vm1, %v2112_v9, %v2108_v58  ;;  %v2123_v15 = vsel %vm6564_vm14, %v3613_v5, %v2119_v34  ;;  %v2133_v1 = vmul.f32 %v3615_v27, %v2132_v20  ;;  %vm6596_vm15 = vcmp.eq.f32.partialorder %v2169_v46, 8.507059e+37  ;;  %vm6608_vm4 = vmor %vm2150_vm8, %vm2151_vm12 }
 0x1ba   : > { %v2788_v21 = vmul.f32 %v2113_v17, %v6357_v24  ;;  %v2128_v6 = vsel %vm6532_vm2, %v2127_v7, %v2123_v15  ;;  %v2147_v26 = vsub.f32 1.0, %v2146_v56  ;;  %v2161_v54 = vmul.f32 %v3619_v62, %v6529_v48 }
 0x1bb   : > { %v2789_v3 = vmul.f32 %v2128_v6, %v6371_v28  ;;  %v2134_v9 = vadd.f32 %v3615_v27, %v2133_v1  ;;  %v2172_v24 = vor.u32 1.1754944e-38, %v2171_v57  ;;  %vm2166_vm1 = vweird.f32 %v3619_v62 }
 0x1bc   : > { %v3621_v12 = vpop.eup %3620  ;;  %2916 = vst [vmem:[%s4122_s17 + $0x2c0] sm:$0xff] %v2788_v21  ;;  %v2148_v13 = vmul.f32 %v3617_v38, %v2147_v26  ;;  %v2162_v51 = vsub.f32 1.0, %v2161_v54  ;;  %3622 = vrcp.f32 %v6579_v23  ;;  %vm2180_vm2 = vweird.f32 %v6543_v37  ;;  %vm6626_vm5 = vmor %vm2165_vm10, %vm2166_vm1 }
 0x1bd   : > { %2917 = vst [vmem:[%s4122_s17 + $0x2c8] sm:$0xff] %v2789_v3  ;;  %v2138_v40 = vsel %vm6590_vm0, %v3615_v27, %v2134_v9  ;;  %v2176_v60 = vmul.f32 %v3621_v12, %v6543_v37  ;;  %vm6614_vm3 = vcmp.eq.f32.partialorder %v2184_v0, 8.507059e+37  ;;  %v2187_v8 = vor.u32 1.1754944e-38, %v2186_v18  ;;  %v6670_v0 = vld [vmem:[%s3960_s24 + $0x338] sm:$0xff]  ;;  %v6681_v18 = vld [vmem:[%s3960_s24 + $0x348] sm:$0xff] }
 0x1be   : > { %v2143_v7 = vsel %vm6547_vm7, %v2142_v55, %v2138_v40  ;;  %v2149_v16 = vadd.f32 %v3617_v38, %v2148_v13  ;;  %v2163_v22 = vmul.f32 %v3619_v62, %v2162_v51  ;;  %vm2181_vm6 = vweird.f32 %v3621_v12 }
 0x1bf   : > { %v2790_v36 = vmul.f32 %v2143_v7, %v6397_v47  ;;  %v2177_v52 = vsub.f32 1.0, %v2176_v60  ;;  %3624 = vpow2.f32 %v6478_v31  ;;  %vm2195_vm7 = vweird.f32 %v6579_v23  ;;  %vm6652_vm8 = vmor %vm2180_vm2, %vm2181_vm6 }
 0x1c0   : > { %v2153_v55 = vsel %vm6608_vm4, %v3617_v38, %v2149_v16  ;;  %v2164_v11 = vadd.f32 %v3619_v62, %v2163_v22  ;;  %3626 = vpow2.f32 %v6493_v19  ;;  %v3156_v31 = vmul.f32 -1.442695, %v6621_v63 }
 0x1c1   : > { %2918 = vst [vmem:[%s4122_s17 + $0x2d0] sm:$0xff] %v2790_v36  ;;  %v2158_v47 = vsel %vm6568_vm11, %v2157_v59, %v2153_v55  ;;  %v2178_v48 = vmul.f32 %v3621_v12, %v2177_v52  ;;  %3628 = vpow2.f32 %v6496_v45  ;;  %v3157_v45 = vmul.f32 -1.442695, %v6632_v10 }
 0x1c2   : > { %v3623_v39 = vpop.eup %3622  ;;  %v2791_v46 = vmul.f32 %v2158_v47, %v6407_v49  ;;  %v2168_v50 = vsel %vm6626_vm5, %v3619_v62, %v2164_v11  ;;  %3630 = vpow2.f32 %v6502_v42  ;;  %v2199_v59 = vand.u32 2147483647, %v6579_v23 }
 0x1c3   : > { %v2173_v43 = vsel %vm6596_vm15, %v2172_v24, %v2168_v50  ;;  %v2179_v49 = vadd.f32 %v3621_v12, %v2178_v48  ;;  %v2191_v32 = vmul.f32 %v3623_v39, %v6579_v23  ;;  %v2201_v57 = vand.u32 2147483648, %v6579_v23 }
 0x1c4   : > { %2919 = vst [vmem:[%s4122_s17 + $0x2d8] sm:$0xff] %v2791_v46  ;;  %v2792_v37 = vmul.f32 %v2173_v43, %v6410_v2  ;;  %3632 = vpow2.f32 %v6510_v4  ;;  %v3158_v42 = vmul.f32 -1.442695, %v6644_v33  ;;  %vm2196_vm9 = vweird.f32 %v3623_v39  ;;  %v6678_v4 = vld [vmem:[%s3960_s24 + $0x340] sm:$0xff] }
 0x1c5   : > { %v3625_v38 = vpop.eup %3624  ;;  %v2183_v34 = vsel %vm6652_vm8, %v3621_v12, %v2179_v49  ;;  %v2192_v20 = vsub.f32 1.0, %v2191_v32  ;;  %3634 = vpow2.f32 %v3156_v31  ;;  %vm6689_vm10 = vmor %vm2195_vm7, %vm2196_vm9  ;;  %vm6693_vm14 = vcmp.eq.f32.partialorder %v2199_v59, 8.507059e+37 }
 0x1c6   : > { %v3627_v58 = vpop.eup %3626  ;;  %2920 = vst [vmem:[%s4122_s17 + $0x2e0] sm:$0xff] %v2792_v37  ;;  %v2188_v2 = vsel %vm6614_vm3, %v2187_v8, %v2183_v34  ;;  %v6675_v56 = vadd.f32 1.0, %v3625_v38  ;;  %3636 = vpow2.f32 %v3157_v45  ;;  %v2202_v26 = vor.u32 1.1754944e-38, %v2201_v57 }
 0x1c7   : > { %v3629_v62 = vpop.eup %3628  ;;  %v2793_v17 = vmul.f32 %v2188_v2, %v6424_v25  ;;  %v2193_v15 = vmul.f32 %v3623_v39, %v2192_v20  ;;  %v6684_v1 = vadd.f32 1.0, %v3627_v58  ;;  %3638 = vpow2.f32 %v3158_v42 }
 0x1c8   : > { %v3631_v21 = vpop.eup %3630  ;;  %3640 = vrcp.f32 %v6675_v56  ;;  %v6699_v25 = vmul.f32 -1.442695, %v6670_v0  ;;  %v6704_v23 = vmul.f32 -1.442695, %v6678_v4  ;;  %v6707_v3 = vmul.f32 -1.442695, %v6681_v18 }
 0x1c9   : > { %2921 = vst [vmem:[%s4122_s17 + $0x2e8] sm:$0xff] %v2793_v17  ;;  %v2194_v54 = vadd.f32 %v3623_v39, %v2193_v15  ;;  %3642 = vrcp.f32 %v6684_v1  ;;  %v2214_v5 = vand.u32 2147483647, %v6675_v56  ;;  %v2216_v24 = vand.u32 2147483648, %v6675_v56 }
 0x1ca   : > { %v3633_v9 = vpop.eup %3632  ;;  %v2229_v12 = vand.u32 2147483647, %v6684_v1  ;;  %v6712_v13 = vadd.f32 1.0, %v3629_v62  ;;  %v2231_v28 = vand.u32 2147483648, %v6684_v1  ;;  %v6717_v60 = vadd.f32 1.0, %v3631_v21 }
 0x1cb   : > { %v3635_v51 = vpop.eup %3634  ;;  %v2198_v40 = vsel %vm6689_vm10, %v3623_v39, %v2194_v54  ;;  %v6719_v35 = vadd.f32 1.0, %v3633_v9  ;;  %vm2210_vm11 = vweird.f32 %v6675_v56  ;;  %vm2225_vm13 = vweird.f32 %v6684_v1 }
 0x1cc   : > { %v3637_v7 = vpop.eup %3636  ;;  %v2203_v16 = vsel %vm6693_vm14, %v2202_v26, %v2198_v40  ;;  %3644 = vrcp.f32 %v6712_v13  ;;  %v2244_v36 = vand.u32 2147483647, %v6712_v13  ;;  %v2246_v27 = vand.u32 2147483648, %v6712_v13 }
 0x1cd   : > { %v3639_v22 = vpop.eup %3638  ;;  %v2794_v8 = vmul.f32 %v2203_v16, %v6427_v14  ;;  %3646 = vrcp.f32 %v6717_v60  ;;  %vm6730_vm12 = vcmp.eq.f32.partialorder %v2214_v5, 8.507059e+37  ;;  %v2259_v11 = vand.u32 2147483647, %v6717_v60 }
 0x1ce   : > { %v3641_v52 = vpop.eup %3640  ;;  %v2261_v47 = vand.u32 2147483648, %v6717_v60  ;;  %3648 = vrcp.f32 %v6719_v35  ;;  %v2217_v31 = vor.u32 1.1754944e-38, %v2216_v24  ;;  %vm6739_vm0 = vcmp.eq.f32.partialorder %v2229_v12, 8.507059e+37 }
 0x1cf   : > { %v3643_v48 = vpop.eup %3642  ;;  %2922 = vst [vmem:[%s4122_s17 + $0x2f0] sm:$0xff] %v2794_v8  ;;  %v2206_v14 = vmul.f32 %v3641_v52, %v6675_v56  ;;  %v2232_v46 = vor.u32 1.1754944e-38, %v2231_v28  ;;  %vm2211_vm15 = vweird.f32 %v3641_v52  ;;  %vm2240_vm1 = vweird.f32 %v6712_v13 }
 0x1d0   : > { %v2221_v50 = vmul.f32 %v3643_v48, %v6684_v1  ;;  %vm2255_vm4 = vweird.f32 %v6717_v60  ;;  %vm2226_vm2 = vweird.f32 %v3643_v48  ;;  %vm6746_vm3 = vcmp.eq.f32.partialorder %v2244_v36, 8.507059e+37  ;;  %vm6762_vm7 = vmor %vm2210_vm11, %vm2211_vm15 }
 0x1d1   : > { %v2207_v19 = vsub.f32 1.0, %v2206_v14  ;;  %v2247_v43 = vor.u32 1.1754944e-38, %v2246_v27  ;;  %vm6750_vm5 = vcmp.eq.f32.partialorder %v2259_v11, 8.507059e+37  ;;  %v2262_v37 = vor.u32 1.1754944e-38, %v2261_v47  ;;  %vm6773_vm8 = vmor %vm2225_vm13, %vm2226_vm2 }
 0x1d2   : > { %v3645_v49 = vpop.eup %3644  ;;  %v2222_v32 = vsub.f32 1.0, %v2221_v50  ;;  %v6754_v57 = vadd.f32 1.0, %v3635_v51  ;;  %vm2270_vm6 = vweird.f32 %v6719_v35  ;;  %v2274_v20 = vand.u32 2147483647, %v6719_v35 }
 0x1d3   : > { %v3647_v42 = vpop.eup %3646  ;;  %v2208_v38 = vmul.f32 %v3641_v52, %v2207_v19  ;;  %v2236_v34 = vmul.f32 %v3645_v49, %v6712_v13  ;;  %v2276_v15 = vand.u32 2147483648, %v6719_v35  ;;  %v6768_v21 = vadd.f32 1.0, %v3637_v7 }
 0x1d4   : > { %v3649_v58 = vpop.eup %3648  ;;  %v2223_v62 = vmul.f32 %v3643_v48, %v2222_v32  ;;  %v2251_v17 = vmul.f32 %v3647_v42, %v6717_v60  ;;  %vm2241_vm9 = vweird.f32 %v3645_v49  ;;  %vm2256_vm10 = vweird.f32 %v3647_v42 }
 0x1d5   : > { %v2209_v6 = vadd.f32 %v3641_v52, %v2208_v38  ;;  %v2237_v56 = vsub.f32 1.0, %v2236_v34  ;;  %v2266_v26 = vmul.f32 %v3649_v58, %v6719_v35  ;;  %3650 = vrcp.f32 %v6754_v57  ;;  %vm6787_vm11 = vmor %vm2240_vm1, %vm2241_vm9 }
 0x1d6   : > { %v2224_v54 = vadd.f32 %v3643_v48, %v2223_v62  ;;  %v2252_v9 = vsub.f32 1.0, %v2251_v17  ;;  %vm2271_vm14 = vweird.f32 %v3649_v58  ;;  %v6791_v7 = vadd.f32 1.0, %v3639_v22  ;;  %vm6798_vm13 = vmor %vm2255_vm4, %vm2256_vm10  ;;  %v6857_v62 = vld [vmem:[%s3960_s24 + $0x360] sm:$0xff] }
 0x1d7   : > { %v2213_v5 = vsel %vm6762_vm7, %v3641_v52, %v2209_v6  ;;  %v2238_v24 = vmul.f32 %v3645_v49, %v2237_v56  ;;  %v2267_v12 = vsub.f32 1.0, %v2266_v26  ;;  %vm6809_vm15 = vcmp.eq.f32.partialorder %v2274_v20, 8.507059e+37  ;;  %v6872_v6 = vld [vmem:[%s3960_s24 + $0x368] sm:$0xff]  ;;  %v6878_v56 = vld [vmem:[%s3960_s24 + $0x370] sm:$0xff] }
 0x1d8   : > { %v2218_v1 = vsel %vm6730_vm12, %v2217_v31, %v2213_v5  ;;  %v2228_v51 = vsel %vm6773_vm8, %v3643_v48, %v2224_v54  ;;  %v2253_v28 = vmul.f32 %v3647_v42, %v2252_v9  ;;  %vm6805_vm12 = vmor %vm2270_vm6, %vm2271_vm14  ;;  %v2277_v11 = vor.u32 1.1754944e-38, %v2276_v15  ;;  %v6882_v9 = vld [vmem:[%s3960_s24 + $0x378] sm:$0xff] }
 0x1d9   : > { %v2795_v16 = vmul.f32 %v2218_v1, %v6449_v44  ;;  %v2233_v8 = vsel %vm6739_vm0, %v2232_v46, %v2228_v51  ;;  %v2239_v36 = vadd.f32 %v3645_v49, %v2238_v24  ;;  %v2268_v13 = vmul.f32 %v3649_v58, %v2267_v12 }
 0x1da   : > { %v2796_v52 = vmul.f32 %v2233_v8, %v6455_v41  ;;  %v2254_v55 = vadd.f32 %v3647_v42, %v2253_v28  ;;  %vm2285_vm0 = vweird.f32 %v6754_v57  ;;  %3652 = vrcp.f32 %v6768_v21  ;;  %v6896_v8 = vld [vmem:[%s3960_s24 + $0x380] sm:$0xff] }
 0x1db   : > { %2923 = vst [vmem:[%s4122_s17 + $0x2f8] sm:$0xff] %v2795_v16  ;;  %v2243_v60 = vsel %vm6787_vm11, %v3645_v49, %v2239_v36  ;;  %v2269_v47 = vadd.f32 %v3649_v58, %v2268_v13  ;;  %v3651_v41 = vpop.eup %3650  ;;  %v2289_v14 = vand.u32 2147483647, %v6754_v57  ;;  %v2291_v31 = vand.u32 2147483648, %v6754_v57  ;;  %v6899_v36 = vld [vmem:[%s3960_s24 + $0x388] sm:$0xff] }
 0x1dc   : > { %2924 = vst [vmem:[%s4122_s17 + $0x300] sm:$0xff] %v2796_v52  ;;  %v2248_v35 = vsel %vm6746_vm3, %v2247_v43, %v2243_v60  ;;  %v2258_v48 = vsel %vm6798_vm13, %v3647_v42, %v2254_v55  ;;  %v2281_v19 = vmul.f32 %v3651_v41, %v6754_v57  ;;  %v2304_v49 = vand.u32 2147483647, %v6768_v21  ;;  %v6837_v42 = vld [vmem:[%s3960_s24 + $0x350] sm:$0xff] }
 0x1dd   : > { %v2797_v39 = vmul.f32 %v2248_v35, %v6458_v61  ;;  %v2263_v46 = vsel %vm6750_vm5, %v2262_v37, %v2258_v48  ;;  %v2273_v50 = vsel %vm6805_vm12, %v3649_v58, %v2269_v47  ;;  %v2306_v32 = vand.u32 2147483648, %v6768_v21  ;;  %v6840_v61 = vld [vmem:[%s3960_s24 + $0x358] sm:$0xff]  ;;  %v6917_v47 = vld [vmem:[%s3960_s24 + $0x390] sm:$0xff] }
 0x1de   : > { %v2798_v45 = vmul.f32 %v2263_v46, %v6474_v53  ;;  %v2278_v43 = vsel %vm6809_vm15, %v2277_v11, %v2273_v50  ;;  %v2282_v37 = vsub.f32 1.0, %v2281_v19  ;;  %vm2286_vm1 = vweird.f32 %v3651_v41 }
 0x1df   : > { %2925 = vst [vmem:[%s4122_s17 + $0x308] sm:$0xff] %v2797_v39  ;;  %v2799_v59 = vmul.f32 %v2278_v43, %v6481_v29  ;;  %3654 = vrcp.f32 %v6791_v7  ;;  %vm6846_vm4 = vcmp.eq.f32.partialorder %v2289_v14, 8.507059e+37  ;;  %v2292_v38 = vor.u32 1.1754944e-38, %v2291_v31  ;;  %vm6861_vm2 = vmor %vm2285_vm0, %vm2286_vm1 }
 0x1e0   : > { %2926 = vst [vmem:[%s4122_s17 + $0x310] sm:$0xff] %v2798_v45  ;;  %v2319_v34 = vand.u32 2147483647, %v6791_v7  ;;  %3656 = vpow2.f32 %v6699_v25  ;;  %v3653_v20 = vpop.eup %3652  ;;  %v2283_v58 = vmul.f32 %v3651_v41, %v2282_v37  ;;  %v3162_v29 = vmul.f32 -1.442695, %v6837_v42 }
 0x1e1   : > { %2927 = vst [vmem:[%s4122_s17 + $0x318] sm:$0xff] %v2799_v59  ;;  %3658 = vpow2.f32 %v6704_v23  ;;  %v3163_v2 = vmul.f32 -1.442695, %v6840_v61  ;;  %v2296_v25 = vmul.f32 %v3653_v20, %v6768_v21  ;;  %vm2300_vm3 = vweird.f32 %v6768_v21 }
 0x1e2   : > { %vm6867_vm5 = vcmp.eq.f32.partialorder %v2304_v49, 8.507059e+37  ;;  %v2307_v23 = vor.u32 1.1754944e-38, %v2306_v32  ;;  %v2284_v30 = vadd.f32 %v3651_v41, %v2283_v58  ;;  %vm2315_vm6 = vweird.f32 %v6791_v7 }
 0x1e3   : > { %v2321_v57 = vand.u32 2147483648, %v6791_v7  ;;  %3660 = vpow2.f32 %v6707_v3  ;;  %v2297_v26 = vsub.f32 1.0, %v2296_v25  ;;  %vm2301_vm7 = vweird.f32 %v3653_v20 }
 0x1e4   : > { %3662 = vpow2.f32 %v3162_v29  ;;  %v3164_v54 = vmul.f32 -1.442695, %v6857_v62  ;;  %v2288_v24 = vsel %vm6861_vm2, %v3651_v41, %v2284_v30  ;;  %vm6886_vm8 = vcmp.eq.f32.partialorder %v2319_v34, 8.507059e+37  ;;  %vm6905_vm9 = vmor %vm2300_vm3, %vm2301_vm7 }
 0x1e5   : > { %v3655_v5 = vpop.eup %3654  ;;  %3664 = vpow2.f32 %v3163_v2  ;;  %v3165_v3 = vmul.f32 -1.442695, %v6872_v6  ;;  %v2293_v51 = vsel %vm6846_vm4, %v2292_v38, %v2288_v24  ;;  %v2298_v40 = vmul.f32 %v3653_v20, %v2297_v26 }
 0x1e6   : > { %v3657_v1 = vpop.eup %3656  ;;  %v2311_v28 = vmul.f32 %v3655_v5, %v6791_v7  ;;  %v3166_v16 = vmul.f32 -1.442695, %v6878_v56  ;;  %v2800_v13 = vmul.f32 %v2293_v51, %v6621_v63  ;;  %vm2316_vm10 = vweird.f32 %v3655_v5 }
 0x1e7   : > { %v3659_v27 = vpop.eup %3658  ;;  %v6909_v55 = vadd.f32 1.0, %v3657_v1  ;;  %v6912_v22 = vmul.f32 -1.442695, %v6882_v9  ;;  %v2299_v44 = vadd.f32 %v3653_v20, %v2298_v40  ;;  %3666 = vpow2.f32 %v3164_v54  ;;  %vm6936_vm14 = vmor %vm2315_vm6, %vm2316_vm10 }
 0x1e8   : > { %v2312_v11 = vsub.f32 1.0, %v2311_v28  ;;  %v6914_v60 = vadd.f32 1.0, %v3659_v27  ;;  %2928 = vst [vmem:[%s4122_s17 + $0x320] sm:$0xff] %v2800_v13  ;;  %v2322_v21 = vor.u32 1.1754944e-38, %v2321_v57  ;;  %v6922_v41 = vmul.f32 -1.442695, %v6896_v8 }
 0x1e9   : > { %v3661_v63 = vpop.eup %3660  ;;  %3668 = vrcp.f32 %v6909_v55  ;;  %v6925_v35 = vmul.f32 -1.442695, %v6899_v36  ;;  %v2303_v14 = vsel %vm6905_vm9, %v3653_v20, %v2299_v44  ;;  %v2334_v39 = vand.u32 2147483647, %v6909_v55 }
 0x1ea   : > { %v3663_v48 = vpop.eup %3662  ;;  %v2313_v31 = vmul.f32 %v3655_v5, %v2312_v11  ;;  %3670 = vrcp.f32 %v6914_v60  ;;  %v2308_v50 = vsel %vm6867_vm5, %v2307_v23, %v2303_v14  ;;  %v2336_v45 = vand.u32 2147483648, %v6909_v55 }
 0x1eb   : > { %v3665_v46 = vpop.eup %3664  ;;  %3672 = vpow2.f32 %v3165_v3  ;;  %v6942_v43 = vmul.f32 -1.442695, %v6917_v47  ;;  %v2801_v49 = vmul.f32 %v2308_v50, %v6632_v10  ;;  %v2349_v59 = vand.u32 2147483647, %v6914_v60 }
 0x1ec   : > { %v2314_v32 = vadd.f32 %v3655_v5, %v2313_v31  ;;  %v6946_v37 = vadd.f32 1.0, %v3661_v63  ;;  %vm2330_vm11 = vweird.f32 %v6909_v55  ;;  %vm2345_vm13 = vweird.f32 %v6914_v60 }
 0x1ed   : > { %v2351_v7 = vand.u32 2147483648, %v6914_v60  ;;  %v6951_v53 = vadd.f32 1.0, %v3663_v48  ;;  %v3667_v38 = vpop.eup %3666  ;;  %2929 = vst [vmem:[%s4122_s17 + $0x328] sm:$0xff] %v2801_v49  ;;  %vm6956_vm12 = vcmp.eq.f32.partialorder %v2334_v39, 8.507059e+37  ;;  %v6961_v20 = vadd.f32 1.0, %v3665_v46 }
 0x1ee   : > { %v2318_v34 = vsel %vm6936_vm14, %v3655_v5, %v2314_v32  ;;  %3674 = vrcp.f32 %v6946_v37  ;;  %v2337_v2 = vor.u32 1.1754944e-38, %v2336_v45  ;;  %v2364_v17 = vand.u32 2147483647, %v6946_v37 }
 0x1ef   : > { %v3669_v58 = vpop.eup %3668  ;;  %v2323_v29 = vsel %vm6886_vm8, %v2322_v21, %v2318_v34  ;;  %3676 = vrcp.f32 %v6951_v53  ;;  %vm6969_vm15 = vcmp.eq.f32.partialorder %v2349_v59, 8.507059e+37  ;;  %v2366_v57 = vand.u32 2147483648, %v6946_v37 }
 0x1f0   : > { %v3671_v25 = vpop.eup %3670  ;;  %v2802_v15 = vmul.f32 %v2323_v29, %v6644_v33  ;;  %v2326_v23 = vmul.f32 %v3669_v58, %v6909_v55  ;;  %v2352_v5 = vor.u32 1.1754944e-38, %v2351_v7  ;;  %vm2360_vm0 = vweird.f32 %v6946_v37 }
 0x1f1   : > { %v3673_v26 = vpop.eup %3672  ;;  %v2341_v54 = vmul.f32 %v3671_v25, %v6914_v60  ;;  %3678 = vpow2.f32 %v3166_v16  ;;  %vm2331_vm1 = vweird.f32 %v3669_v58  ;;  %v2379_v33 = vand.u32 2147483647, %v6951_v53 }
 0x1f2   : > { %2930 = vst [vmem:[%s4122_s17 + $0x330] sm:$0xff] %v2802_v15  ;;  %v2327_v24 = vsub.f32 1.0, %v2326_v23  ;;  %3680 = vrcp.f32 %v6961_v20  ;;  %vm2346_vm4 = vweird.f32 %v3671_v25  ;;  %vm6979_vm2 = vcmp.eq.f32.partialorder %v2364_v17, 8.507059e+37  ;;  %vm6989_vm5 = vmor %vm2330_vm11, %vm2331_vm1 }
 0x1f3   : > { %v2342_v12 = vsub.f32 1.0, %v2341_v54  ;;  %vm2375_vm3 = vweird.f32 %v6951_v53  ;;  %v2367_v40 = vor.u32 1.1754944e-38, %v2366_v57  ;;  %v2381_v28 = vand.u32 2147483648, %v6951_v53  ;;  %vm6999_vm7 = vmor %vm2345_vm13, %vm2346_vm4 }
 0x1f4   : > { %v3675_v1 = vpop.eup %3674  ;;  %v2328_v51 = vmul.f32 %v3669_v58, %v2327_v24  ;;  %v6985_v16 = vadd.f32 1.0, %v3667_v38  ;;  %vm2390_vm6 = vweird.f32 %v6961_v20  ;;  %v2394_v11 = vand.u32 2147483647, %v6961_v20 }
 0x1f5   : > { %v3677_v27 = vpop.eup %3676  ;;  %v2343_v52 = vmul.f32 %v3671_v25, %v2342_v12  ;;  %v2356_v44 = vmul.f32 %v3675_v1, %v6946_v37  ;;  %vm7004_vm8 = vcmp.eq.f32.partialorder %v2379_v33, 8.507059e+37  ;;  %v2396_v14 = vand.u32 2147483648, %v6961_v20 }
 0x1f6   : > { %v2329_v63 = vadd.f32 %v3669_v58, %v2328_v51  ;;  %v2371_v55 = vmul.f32 %v3677_v27, %v6951_v53  ;;  %vm2361_vm9 = vweird.f32 %v3675_v1  ;;  %3682 = vrcp.f32 %v6985_v16 }
 0x1f7   : > { %v3679_v31 = vpop.eup %3678  ;;  %v2344_v39 = vadd.f32 %v3671_v25, %v2343_v52  ;;  %v2357_v46 = vsub.f32 1.0, %v2356_v44  ;;  %vm2376_vm10 = vweird.f32 %v3677_v27  ;;  %v2382_v45 = vor.u32 1.1754944e-38, %v2381_v28  ;;  %vm7022_vm14 = vmor %vm2360_vm0, %vm2361_vm9 }
 0x1f8   : > { %v3681_v50 = vpop.eup %3680  ;;  %v2333_v60 = vsel %vm6989_vm5, %v3669_v58, %v2329_v63  ;;  %v2372_v19 = vsub.f32 1.0, %v2371_v55  ;;  %vm7026_vm11 = vcmp.eq.f32.partialorder %v2394_v11, 8.507059e+37  ;;  %vm7033_vm13 = vmor %vm2375_vm3, %vm2376_vm10  ;;  %v2397_v15 = vor.u32 1.1754944e-38, %v2396_v14 }
 0x1f9   : > { %v2338_v49 = vsel %vm6956_vm12, %v2337_v2, %v2333_v60  ;;  %v2348_v32 = vsel %vm6999_vm7, %v3671_v25, %v2344_v39  ;;  %v2358_v59 = vmul.f32 %v3675_v1, %v2357_v46  ;;  %v2386_v7 = vmul.f32 %v3681_v50, %v6961_v20  ;;  %v7111_v60 = vld [vmem:[%s3960_s24 + $0x3a8] sm:$0xff] }
 0x1fa   : > { %v2803_v38 = vmul.f32 %v2338_v49, %v6670_v0  ;;  %v2353_v34 = vsel %vm6969_vm15, %v2352_v5, %v2348_v32  ;;  %v2373_v10 = vmul.f32 %v3677_v27, %v2372_v19  ;;  %vm2391_vm12 = vweird.f32 %v3681_v50 }
 0x1fb   : > { %v2804_v2 = vmul.f32 %v2353_v34, %v6678_v4  ;;  %v2359_v17 = vadd.f32 %v3675_v1, %v2358_v59  ;;  %v2387_v25 = vsub.f32 1.0, %v2386_v7  ;;  %v2409_v23 = vand.u32 2147483647, %v6985_v16  ;;  %vm7053_vm15 = vmor %vm2390_vm6, %vm2391_vm12 }
 0x1fc   : > { %2931 = vst [vmem:[%s4122_s17 + $0x338] sm:$0xff] %v2803_v38  ;;  %v2374_v37 = vadd.f32 %v3677_v27, %v2373_v10  ;;  %v7039_v30 = vadd.f32 1.0, %v3673_v26  ;;  %v3683_v57 = vpop.eup %3682  ;;  %v7044_v53 = vadd.f32 1.0, %v3679_v31  ;;  %3684 = vpow2.f32 %v6912_v22 }
 0x1fd   : > { %2932 = vst [vmem:[%s4122_s17 + $0x340] sm:$0xff] %v2804_v2  ;;  %v2363_v4 = vsel %vm7022_vm14, %v3675_v1, %v2359_v17  ;;  %v2388_v54 = vmul.f32 %v3681_v50, %v2387_v25  ;;  %v2401_v33 = vmul.f32 %v3683_v57, %v6985_v16  ;;  %v2411_v12 = vand.u32 2147483648, %v6985_v16  ;;  %v7129_v25 = vld [vmem:[%s3960_s24 + $0x3b0] sm:$0xff] }
 0x1fe   : > { %v2368_v5 = vsel %vm6979_vm2, %v2367_v40, %v2363_v4  ;;  %v2378_v24 = vsel %vm7033_vm13, %v3677_v27, %v2374_v37  ;;  %3686 = vrcp.f32 %v7039_v30  ;;  %vm2405_vm0 = vweird.f32 %v6985_v16  ;;  %v7066_v40 = vld [vmem:[%s3960_s24 + $0x398] sm:$0xff] }
 0x1ff   : > { %v2805_v1 = vmul.f32 %v2368_v5, %v6681_v18  ;;  %v2383_v22 = vsel %vm7004_vm8, %v2382_v45, %v2378_v24  ;;  %v2389_v3 = vadd.f32 %v3681_v50, %v2388_v54  ;;  %v2402_v20 = vsub.f32 1.0, %v2401_v33  ;;  %v7132_v37 = vld [vmem:[%s3960_s24 + $0x3b8] sm:$0xff]  ;;  %v7149_v54 = vld [vmem:[%s3960_s24 + $0x3c0] sm:$0xff] }
 0x200   : > { %v2806_v51 = vmul.f32 %v2383_v22, %v6837_v42  ;;  %vm2406_vm1 = vweird.f32 %v3683_v57  ;;  %vm7071_vm4 = vcmp.eq.f32.partialorder %v2409_v23, 8.507059e+37  ;;  %v2424_v27 = vand.u32 2147483647, %v7039_v30 }
 0x201   : > { %2933 = vst [vmem:[%s4122_s17 + $0x348] sm:$0xff] %v2805_v1  ;;  %v2393_v28 = vsel %vm7053_vm15, %v3681_v50, %v2389_v3  ;;  %3688 = vrcp.f32 %v7044_v53  ;;  %v2403_v13 = vmul.f32 %v3683_v57, %v2402_v20  ;;  %v2412_v52 = vor.u32 1.1754944e-38, %v2411_v12  ;;  %vm7084_vm2 = vmor %vm2405_vm0, %vm2406_vm1 }
 0x202   : > { %2934 = vst [vmem:[%s4122_s17 + $0x350] sm:$0xff] %v2806_v51  ;;  %v2398_v42 = vsel %vm7026_vm11, %v2397_v15, %v2393_v28  ;;  %v2426_v44 = vand.u32 2147483648, %v7039_v30  ;;  %v3685_v11 = vpop.eup %3684  ;;  %vm2420_vm3 = vweird.f32 %v7039_v30  ;;  %3690 = vpow2.f32 %v6922_v41 }
 0x203   : > { %v2807_v63 = vmul.f32 %v2398_v42, %v6840_v61  ;;  %v3171_v55 = vmul.f32 -1.442695, %v7066_v40  ;;  %v2404_v48 = vadd.f32 %v3683_v57, %v2403_v13  ;;  %vm2435_vm5 = vweird.f32 %v7044_v53  ;;  %v7096_v61 = vld [vmem:[%s3960_s24 + $0x3a0] sm:$0xff] }
 0x204   : > { %v7092_v14 = vadd.f32 1.0, %v3685_v11  ;;  %3692 = vpow2.f32 %v6925_v35  ;;  %v3687_v16 = vpop.eup %3686  ;;  %vm7099_vm6 = vcmp.eq.f32.partialorder %v2424_v27, 8.507059e+37  ;;  %v2439_v41 = vand.u32 2147483647, %v7044_v53 }
 0x205   : > { %2935 = vst [vmem:[%s4122_s17 + $0x358] sm:$0xff] %v2807_v63  ;;  %v2441_v39 = vand.u32 2147483648, %v7044_v53  ;;  %3694 = vpow2.f32 %v6942_v43  ;;  %v2408_v46 = vsel %vm7084_vm2, %v3683_v57, %v2404_v48  ;;  %v2416_v50 = vmul.f32 %v3687_v16, %v7039_v30 }
 0x206   : > { %v2427_v35 = vor.u32 1.1754944e-38, %v2426_v44  ;;  %3696 = vrcp.f32 %v7092_v14  ;;  %v2413_v45 = vsel %vm7071_vm4, %v2412_v52, %v2408_v46  ;;  %vm2421_vm7 = vweird.f32 %v3687_v16 }
 0x207   : > { %v3689_v19 = vpop.eup %3688  ;;  %v2454_v49 = vand.u32 2147483647, %v7092_v14  ;;  %v3172_v43 = vmul.f32 -1.442695, %v7096_v61  ;;  %v2808_v32 = vmul.f32 %v2413_v45, %v6857_v62  ;;  %v2417_v59 = vsub.f32 1.0, %v2416_v50  ;;  %vm7137_vm10 = vmor %vm2420_vm3, %vm2421_vm7 }
 0x208   : > { %v2431_v7 = vmul.f32 %v3689_v19, %v7044_v53  ;;  %v2456_v38 = vand.u32 2147483648, %v7092_v14  ;;  %v3691_v34 = vpop.eup %3690  ;;  %vm7120_vm8 = vcmp.eq.f32.partialorder %v2439_v41, 8.507059e+37  ;;  %v2442_v10 = vor.u32 1.1754944e-38, %v2441_v39 }
 0x209   : > { %3698 = vpow2.f32 %v3171_v55  ;;  %v3173_v29 = vmul.f32 -1.442695, %v7111_v60  ;;  %2936 = vst [vmem:[%s4122_s17 + $0x360] sm:$0xff] %v2808_v32  ;;  %v2418_v17 = vmul.f32 %v3687_v16, %v2417_v59  ;;  %vm2436_vm9 = vweird.f32 %v3689_v19 }
 0x20a   : > { %v3693_v2 = vpop.eup %3692  ;;  %v2432_v62 = vsub.f32 1.0, %v2431_v7  ;;  %v7126_v0 = vadd.f32 1.0, %v3691_v34  ;;  %vm2450_vm14 = vweird.f32 %v7092_v14  ;;  %vm7142_vm11 = vcmp.eq.f32.partialorder %v2454_v49, 8.507059e+37  ;;  %vm7155_vm13 = vmor %vm2435_vm5, %vm2436_vm9 }
 0x20b   : > { %v3695_v15 = vpop.eup %3694  ;;  %v7146_v4 = vadd.f32 1.0, %v3693_v2  ;;  %3700 = vpow2.f32 %v3172_v43  ;;  %v2419_v24 = vadd.f32 %v3687_v16, %v2418_v17  ;;  %v2457_v33 = vor.u32 1.1754944e-38, %v2456_v38 }
 0x20c   : > { %v3697_v5 = vpop.eup %3696  ;;  %v2433_v26 = vmul.f32 %v3689_v19, %v2432_v62  ;;  %3702 = vrcp.f32 %v7126_v0  ;;  %v7161_v1 = vmul.f32 -1.442695, %v7129_v25  ;;  %v7164_v22 = vmul.f32 -1.442695, %v7132_v37 }
 0x20d   : > { %v2446_v12 = vmul.f32 %v3697_v5, %v7092_v14  ;;  %3704 = vpow2.f32 %v3173_v29  ;;  %v2423_v3 = vsel %vm7137_vm10, %v3687_v16, %v2419_v24  ;;  %v7170_v53 = vmul.f32 -1.442695, %v7149_v54  ;;  %v7277_v16 = vld [vmem:[%s3960_s24 + $0x3d0] sm:$0xff] }
 0x20e   : > { %v2434_v51 = vadd.f32 %v3689_v19, %v2433_v26  ;;  %3706 = vrcp.f32 %v7146_v4  ;;  %v2428_v28 = vsel %vm7099_vm6, %v2427_v35, %v2423_v3  ;;  %vm2451_vm12 = vweird.f32 %v3697_v5 }
 0x20f   : > { %v3699_v20 = vpop.eup %3698  ;;  %v2447_v18 = vsub.f32 1.0, %v2446_v12  ;;  %v2469_v27 = vand.u32 2147483647, %v7126_v0  ;;  %v2809_v42 = vmul.f32 %v2428_v28, %v6872_v6  ;;  %vm2465_vm15 = vweird.f32 %v7126_v0  ;;  %vm7190_vm0 = vmor %vm2450_vm14, %vm2451_vm12 }
 0x210   : > { %v2438_v13 = vsel %vm7155_vm13, %v3689_v19, %v2434_v51  ;;  %v2471_v52 = vand.u32 2147483648, %v7126_v0  ;;  %v7182_v21 = vadd.f32 1.0, %v3695_v15  ;;  %v7184_v55 = vadd.f32 1.0, %v3699_v20 }
 0x211   : > { %v3701_v44 = vpop.eup %3700  ;;  %v2443_v11 = vsel %vm7120_vm8, %v2442_v10, %v2438_v13  ;;  %v2448_v63 = vmul.f32 %v3697_v5, %v2447_v18  ;;  %2937 = vst [vmem:[%s4122_s17 + $0x368] sm:$0xff] %v2809_v42  ;;  %vm2480_vm1 = vweird.f32 %v7146_v4  ;;  %v2484_v31 = vand.u32 2147483647, %v7146_v4 }
 0x212   : > { %v3703_v48 = vpop.eup %3702  ;;  %v2810_v6 = vmul.f32 %v2443_v11, %v6878_v56  ;;  %v2486_v41 = vand.u32 2147483648, %v7146_v4  ;;  %vm7198_vm4 = vcmp.eq.f32.partialorder %v2469_v27, 8.507059e+37  ;;  %3708 = vrcp.f32 %v7182_v21  ;;  %v7260_v11 = vld [vmem:[%s3960_s24 + $0x3c8] sm:$0xff] }
 0x213   : > { %v3705_v39 = vpop.eup %3704  ;;  %v2449_v46 = vadd.f32 %v3697_v5, %v2448_v63  ;;  %v2461_v50 = vmul.f32 %v3703_v48, %v7126_v0  ;;  %v2499_v14 = vand.u32 2147483647, %v7182_v21  ;;  %v2501_v19 = vand.u32 2147483648, %v7182_v21 }
 0x214   : > { %v3707_v56 = vpop.eup %3706  ;;  %2938 = vst [vmem:[%s4122_s17 + $0x370] sm:$0xff] %v2810_v6  ;;  %3710 = vrcp.f32 %v7184_v55  ;;  %v7207_v45 = vadd.f32 1.0, %v3701_v44  ;;  %vm2466_vm2 = vweird.f32 %v3703_v48  ;;  %v2472_v7 = vor.u32 1.1754944e-38, %v2471_v52 }
 0x215   : > { %v2453_v49 = vsel %vm7190_vm0, %v3697_v5, %v2449_v46  ;;  %v2462_v43 = vsub.f32 1.0, %v2461_v50  ;;  %v2476_v32 = vmul.f32 %v3707_v56, %v7146_v4  ;;  %vm7214_vm3 = vcmp.eq.f32.partialorder %v2484_v31, 8.507059e+37  ;;  %vm7221_vm6 = vmor %vm2465_vm15, %vm2466_vm2 }
 0x216   : > { %v2458_v59 = vsel %vm7142_vm11, %v2457_v33, %v2453_v49  ;;  %v2487_v34 = vor.u32 1.1754944e-38, %v2486_v41  ;;  %vm2481_vm5 = vweird.f32 %v3707_v56  ;;  %vm2495_vm7 = vweird.f32 %v7182_v21 }
 0x217   : > { %v2811_v58 = vmul.f32 %v2458_v59, %v6882_v9  ;;  %v2463_v10 = vmul.f32 %v3703_v48, %v2462_v43  ;;  %v2477_v29 = vsub.f32 1.0, %v2476_v32  ;;  %vm7226_vm8 = vcmp.eq.f32.partialorder %v2499_v14, 8.507059e+37  ;;  %vm7236_vm10 = vmor %vm2480_vm1, %vm2481_vm5 }
 0x218   : > { %v2502_v62 = vor.u32 1.1754944e-38, %v2501_v19  ;;  %3712 = vrcp.f32 %v7207_v45  ;;  %v3709_v15 = vpop.eup %3708  ;;  %vm2510_vm9 = vweird.f32 %v7184_v55  ;;  %v2514_v0 = vand.u32 2147483647, %v7184_v55 }
 0x219   : > { %2939 = vst [vmem:[%s4122_s17 + $0x378] sm:$0xff] %v2811_v58  ;;  %v2464_v9 = vadd.f32 %v3703_v48, %v2463_v10  ;;  %v2478_v23 = vmul.f32 %v3707_v56, %v2477_v29  ;;  %v2491_v24 = vmul.f32 %v3709_v15, %v7182_v21  ;;  %v2516_v26 = vand.u32 2147483648, %v7184_v55  ;;  %v7317_v10 = vld [vmem:[%s3960_s24 + $0x3d8] sm:$0xff] }
 0x21a   : > { %v3711_v57 = vpop.eup %3710  ;;  %vm2525_vm14 = vweird.f32 %v7207_v45  ;;  %v2529_v33 = vand.u32 2147483647, %v7207_v45  ;;  %vm2496_vm11 = vweird.f32 %v3709_v15  ;;  %v7249_v20 = vadd.f32 1.0, %v3705_v39 }
 0x21b   : > { %v2468_v30 = vsel %vm7221_vm6, %v3703_v48, %v2464_v9  ;;  %v2479_v12 = vadd.f32 %v3707_v56, %v2478_v23  ;;  %v2506_v4 = vmul.f32 %v3711_v57, %v7184_v55  ;;  %v2492_v51 = vsub.f32 1.0, %v2491_v24  ;;  %vm7267_vm12 = vmor %vm2495_vm7, %vm2496_vm11 }
 0x21c   : > { %v2473_v3 = vsel %vm7198_vm4, %v2472_v7, %v2468_v30  ;;  %vm2511_vm13 = vweird.f32 %v3711_v57  ;;  %3714 = vpow2.f32 %v7161_v1  ;;  %v2531_v44 = vand.u32 2147483648, %v7207_v45 }
 0x21d   : > { %v2812_v28 = vmul.f32 %v2473_v3, %v6896_v8  ;;  %v2483_v18 = vsel %vm7236_vm10, %v3707_v56, %v2479_v12  ;;  %v2507_v27 = vsub.f32 1.0, %v2506_v4  ;;  %v2493_v52 = vmul.f32 %v3709_v15, %v2492_v51  ;;  %vm7282_vm0 = vmor %vm2510_vm9, %vm2511_vm13 }
 0x21e   : > { %v3713_v42 = vpop.eup %3712  ;;  %v2488_v13 = vsel %vm7214_vm3, %v2487_v34, %v2483_v18  ;;  %3716 = vrcp.f32 %v7249_v20  ;;  %vm7271_vm15 = vcmp.eq.f32.partialorder %v2514_v0, 8.507059e+37  ;;  %v2517_v21 = vor.u32 1.1754944e-38, %v2516_v26 }
 0x21f   : > { %2940 = vst [vmem:[%s4122_s17 + $0x380] sm:$0xff] %v2812_v28  ;;  %v2813_v8 = vmul.f32 %v2488_v13, %v6899_v36  ;;  %v2508_v63 = vmul.f32 %v3711_v57, %v2507_v27  ;;  %v2521_v6 = vmul.f32 %v3713_v42, %v7207_v45  ;;  %v2494_v31 = vadd.f32 %v3709_v15, %v2493_v52 }
 0x220   : > { %vm2526_vm1 = vweird.f32 %v3713_v42  ;;  %3718 = vpow2.f32 %v7164_v22  ;;  %v3177_v46 = vmul.f32 -1.442695, %v7260_v11  ;;  %vm7292_vm4 = vcmp.eq.f32.partialorder %v2529_v33, 8.507059e+37 }
 0x221   : > { %2941 = vst [vmem:[%s4122_s17 + $0x388] sm:$0xff] %v2813_v8  ;;  %v2509_v41 = vadd.f32 %v3711_v57, %v2508_v63  ;;  %v2522_v39 = vsub.f32 1.0, %v2521_v6  ;;  %3720 = vpow2.f32 %v7170_v53  ;;  %v2498_v50 = vsel %vm7267_vm12, %v3709_v15, %v2494_v31  ;;  %vm7307_vm2 = vmor %vm2525_vm14, %vm2526_vm1 }
 0x222   : > { %v2532_v35 = vor.u32 1.1754944e-38, %v2531_v44  ;;  %v3178_v56 = vmul.f32 -1.442695, %v7277_v16  ;;  %v3715_v14 = vpop.eup %3714  ;;  %v2503_v22 = vsel %vm7226_vm8, %v2502_v62, %v2498_v50  ;;  %3722 = vpow2.f32 %v3177_v46 }
 0x223   : > { %v2513_v53 = vsel %vm7282_vm0, %v3711_v57, %v2509_v41  ;;  %v2523_v19 = vmul.f32 %v3713_v42, %v2522_v39  ;;  %v2814_v43 = vmul.f32 %v2503_v22, %v6917_v47  ;;  %v7311_v7 = vadd.f32 1.0, %v3715_v14 }
 0x224   : > { %v3717_v49 = vpop.eup %3716  ;;  %v2518_v32 = vsel %vm7271_vm15, %v2517_v21, %v2513_v53  ;;  %3724 = vpow2.f32 %v3178_v56  ;;  %v2544_v47 = vand.u32 2147483647, %v7249_v20  ;;  %vm2540_vm3 = vweird.f32 %v7249_v20  ;;  %v7395_v53 = vld [vmem:[%s3960_s24 + $0x3e0] sm:$0xff] }
 0x225   : > { %v2815_v38 = vmul.f32 %v2518_v32, %v7066_v40  ;;  %v2524_v34 = vadd.f32 %v3713_v42, %v2523_v19  ;;  %v2536_v58 = vmul.f32 %v3717_v49, %v7249_v20  ;;  %2942 = vst [vmem:[%s4122_s17 + $0x390] sm:$0xff] %v2814_v43  ;;  %vm2541_vm5 = vweird.f32 %v3717_v49 }
 0x226   : > { %v3719_v29 = vpop.eup %3718  ;;  %v2546_v45 = vand.u32 2147483648, %v7249_v20  ;;  %3726 = vrcp.f32 %v7311_v7  ;;  %v2559_v62 = vand.u32 2147483647, %v7311_v7  ;;  %v2561_v23 = vand.u32 2147483648, %v7311_v7  ;;  %vm7344_vm7 = vmor %vm2540_vm3, %vm2541_vm5 }
 0x227   : > { %v3721_v2 = vpop.eup %3720  ;;  %2943 = vst [vmem:[%s4122_s17 + $0x398] sm:$0xff] %v2815_v38  ;;  %v2528_v40 = vsel %vm7307_vm2, %v3713_v42, %v2524_v34  ;;  %v2537_v17 = vsub.f32 1.0, %v2536_v58  ;;  %v7327_v15 = vadd.f32 1.0, %v3719_v29  ;;  %v3179_v57 = vmul.f32 -1.442695, %v7317_v10 }
 0x228   : > { %v2533_v9 = vsel %vm7292_vm4, %v2532_v35, %v2528_v40  ;;  %v7332_v0 = vadd.f32 1.0, %v3721_v2  ;;  %v3723_v5 = vpop.eup %3722  ;;  %vm7336_vm6 = vcmp.eq.f32.partialorder %v2544_v47, 8.507059e+37  ;;  %v2547_v4 = vor.u32 1.1754944e-38, %v2546_v45  ;;  %v7416_v40 = vld [vmem:[%s3960_s24 + $0x3e8] sm:$0xff] }
 0x229   : > { %v2816_v24 = vmul.f32 %v2533_v9, %v7096_v61  ;;  %v2538_v26 = vmul.f32 %v3717_v49, %v2537_v17  ;;  %3728 = vrcp.f32 %v7327_v15  ;;  %vm2555_vm8 = vweird.f32 %v7311_v7 }
 0x22a   : > { %v3725_v30 = vpop.eup %3724  ;;  %v2574_v61 = vand.u32 2147483647, %v7327_v15  ;;  %3730 = vrcp.f32 %v7332_v0  ;;  %vm7352_vm9 = vcmp.eq.f32.partialorder %v2559_v62, 8.507059e+37  ;;  %v2576_v28 = vand.u32 2147483648, %v7327_v15 }
 0x22b   : > { %2944 = vst [vmem:[%s4122_s17 + $0x3a0] sm:$0xff] %v2816_v24  ;;  %v2539_v3 = vadd.f32 %v3717_v49, %v2538_v26  ;;  %v7357_v20 = vadd.f32 1.0, %v3723_v5  ;;  %v2562_v27 = vor.u32 1.1754944e-38, %v2561_v23  ;;  %v2589_v42 = vand.u32 2147483647, %v7332_v0 }
 0x22c   : > { %v3727_v18 = vpop.eup %3726  ;;  %v7360_v13 = vadd.f32 1.0, %v3725_v30  ;;  %3732 = vpow2.f32 %v3179_v57  ;;  %vm2570_vm10 = vweird.f32 %v7327_v15  ;;  %v2591_v8 = vand.u32 2147483648, %v7332_v0 }
 0x22d   : > { %v2543_v52 = vsel %vm7344_vm7, %v3717_v49, %v2539_v3  ;;  %v2551_v44 = vmul.f32 %v3727_v18, %v7311_v7  ;;  %vm7369_vm14 = vcmp.eq.f32.partialorder %v2574_v61, 8.507059e+37  ;;  %vm2585_vm11 = vweird.f32 %v7332_v0  ;;  %v7439_v61 = vld [vmem:[%s3960_s24 + $0x3f0] sm:$0xff]  ;;  %v7442_v3 = vld [vmem:[%s3960_s24 + $0x3f8] sm:$0xff] }
 0x22e   : > { %v2548_v1 = vsel %vm7336_vm6, %v2547_v4, %v2543_v52  ;;  %3734 = vrcp.f32 %v7357_v20  ;;  %vm2556_vm13 = vweird.f32 %v3727_v18  ;;  %v2577_v36 = vor.u32 1.1754944e-38, %v2576_v28 }
 0x22f   : > { %v3729_v48 = vpop.eup %3728  ;;  %v2817_v6 = vmul.f32 %v2548_v1, %v7111_v60  ;;  %v2552_v31 = vsub.f32 1.0, %v2551_v44  ;;  %vm7377_vm12 = vcmp.eq.f32.partialorder %v2589_v42, 8.507059e+37  ;;  %v2604_v46 = vand.u32 2147483647, %v7357_v20  ;;  %vm7388_vm0 = vmor %vm2555_vm8, %vm2556_vm13 }
 0x230   : > { %v3731_v21 = vpop.eup %3730  ;;  %v2566_v41 = vmul.f32 %v3729_v48, %v7327_v15  ;;  %3736 = vrcp.f32 %v7360_v13  ;;  %v2592_v60 = vor.u32 1.1754944e-38, %v2591_v8  ;;  %vm2600_vm15 = vweird.f32 %v7357_v20 }
 0x231   : > { %2945 = vst [vmem:[%s4122_s17 + $0x3a8] sm:$0xff] %v2817_v6  ;;  %v2553_v50 = vmul.f32 %v3727_v18, %v2552_v31  ;;  %v2581_v55 = vmul.f32 %v3731_v21, %v7332_v0  ;;  %vm2571_vm1 = vweird.f32 %v3729_v48  ;;  %v2606_v22 = vand.u32 2147483648, %v7357_v20 }
 0x232   : > { %v3733_v35 = vpop.eup %3732  ;;  %v2567_v14 = vsub.f32 1.0, %v2566_v41  ;;  %vm2615_vm4 = vweird.f32 %v7360_v13  ;;  %vm2586_vm2 = vweird.f32 %v3731_v21  ;;  %vm7399_vm3 = vcmp.eq.f32.partialorder %v2604_v46, 8.507059e+37  ;;  %vm7409_vm5 = vmor %vm2570_vm10, %vm2571_vm1 }
 0x233   : > { %v2554_v19 = vadd.f32 %v3727_v18, %v2553_v50  ;;  %v2582_v49 = vsub.f32 1.0, %v2581_v55  ;;  %v7397_v43 = vadd.f32 1.0, %v3733_v35  ;;  %v2619_v38 = vand.u32 2147483647, %v7360_v13  ;;  %vm7423_vm6 = vmor %vm2585_vm11, %vm2586_vm2 }
 0x234   : > { %v3735_v32 = vpop.eup %3734  ;;  %v2568_v59 = vmul.f32 %v3729_v48, %v2567_v14  ;;  %v2621_v34 = vand.u32 2147483648, %v7360_v13  ;;  %v3180_v2 = vmul.f32 -1.442695, %v7395_v53  ;;  %v2607_v33 = vor.u32 1.1754944e-38, %v2606_v22 }
 0x235   : > { %v2558_v58 = vsel %vm7388_vm0, %v3727_v18, %v2554_v19  ;;  %v2583_v29 = vmul.f32 %v3731_v21, %v2582_v49  ;;  %v2596_v45 = vmul.f32 %v3735_v32, %v7357_v20  ;;  %vm2601_vm7 = vweird.f32 %v3735_v32 }
 0x236   : > { %v3737_v17 = vpop.eup %3736  ;;  %v2563_v62 = vsel %vm7352_vm9, %v2562_v27, %v2558_v58  ;;  %v2569_v9 = vadd.f32 %v3729_v48, %v2568_v59  ;;  %3738 = vrcp.f32 %v7397_v43  ;;  %v3181_v0 = vmul.f32 -1.442695, %v7416_v40  ;;  %vm7450_vm9 = vmor %vm2600_vm15, %vm2601_vm7 }
 0x237   : > { %v2818_v23 = vmul.f32 %v2563_v62, %v7129_v25  ;;  %v2584_v57 = vadd.f32 %v3731_v21, %v2583_v29  ;;  %v2597_v5 = vsub.f32 1.0, %v2596_v45  ;;  %v2611_v24 = vmul.f32 %v3737_v17, %v7360_v13 }
 0x238   : > { %v2573_v26 = vsel %vm7409_vm5, %v3729_v48, %v2569_v9  ;;  %vm2616_vm8 = vweird.f32 %v3737_v17  ;;  %vm7454_vm10 = vcmp.eq.f32.partialorder %v2619_v38, 8.507059e+37  ;;  %v2622_v42 = vor.u32 1.1754944e-38, %v2621_v34 }
 0x239   : > { %2946 = vst [vmem:[%s4122_s17 + $0x3b0] sm:$0xff] %v2818_v23  ;;  %v2578_v30 = vsel %vm7369_vm14, %v2577_v36, %v2573_v26  ;;  %v2588_v12 = vsel %vm7423_vm6, %v3731_v21, %v2584_v57  ;;  %v2598_v25 = vmul.f32 %v3735_v32, %v2597_v5  ;;  %v2612_v4 = vsub.f32 1.0, %v2611_v24  ;;  %vm7463_vm14 = vmor %vm2615_vm4, %vm2616_vm8 }
 0x23a   : > { %v2819_v51 = vmul.f32 %v2578_v30, %v7132_v37  ;;  %v2593_v28 = vsel %vm7377_vm12, %v2592_v60, %v2588_v12  ;;  %3740 = vpow2.f32 %v3180_v2  ;;  %vm2630_vm11 = vweird.f32 %v7397_v43 }
 0x23b   : > { %v2820_v52 = vmul.f32 %v2593_v28, %v7149_v54  ;;  %v2599_v44 = vadd.f32 %v3735_v32, %v2598_v25  ;;  %v2613_v37 = vmul.f32 %v3737_v17, %v2612_v4  ;;  %3742 = vpow2.f32 %v3181_v0 }
 0x23c   : > { %v3739_v8 = vpop.eup %3738  ;;  %2947 = vst [vmem:[%s4122_s17 + $0x3b8] sm:$0xff] %v2819_v51  ;;  %v3182_v1 = vmul.f32 -1.442695, %v7439_v61  ;;  %v3183_v63 = vmul.f32 -1.442695, %v7442_v3  ;;  %v2636_v36 = vand.u32 2147483648, %v7397_v43 }
 0x23d   : > { %2948 = vst [vmem:[%s4122_s17 + $0x3c0] sm:$0xff] %v2820_v52  ;;  %v2603_v54 = vsel %vm7450_vm9, %v3735_v32, %v2599_v44  ;;  %v2614_v48 = vadd.f32 %v3737_v17, %v2613_v37  ;;  %v2626_v6 = vmul.f32 %v3739_v8, %v7397_v43  ;;  %v2634_v13 = vand.u32 2147483647, %v7397_v43 }
 0x23e   : > { %v2608_v31 = vsel %vm7399_vm3, %v2607_v33, %v2603_v54  ;;  %vm2631_vm13 = vweird.f32 %v3739_v8  ;;  %3744 = vpow2.f32 %v3182_v1  ;;  %v2637_v56 = vor.u32 1.1754944e-38, %v2636_v36 }
 0x23f   : > { %v2821_v21 = vmul.f32 %v2608_v31, %v7260_v11  ;;  %v2618_v41 = vsel %vm7463_vm14, %v3737_v17, %v2614_v48  ;;  %v2627_v39 = vsub.f32 1.0, %v2626_v6  ;;  %3746 = vpow2.f32 %v3183_v63  ;;  %vm2632_vm12 = vmor %vm2630_vm11, %vm2631_vm13 }
 0x240   : > { %v2623_v46 = vsel %vm7454_vm10, %v2622_v42, %v2618_v41  ;;  %v3741_v50 = vpop.eup %3740  ;;  %vm2635_vm15 = vcmp.eq.f32.partialorder %v2634_v13, 8.507059e+37 }
 0x241   : > { %2949 = vst [vmem:[%s4122_s17 + $0x3c8] sm:$0xff] %v2821_v21  ;;  %v2822_v55 = vmul.f32 %v2623_v46, %v7277_v16  ;;  %v2628_v60 = vmul.f32 %v3739_v8, %v2627_v39  ;;  %v3743_v35 = vpop.eup %3742  ;;  %v776_v11 = vadd.f32 1.0, %v3741_v50 }
 0x242   : > { %v777_v22 = vadd.f32 1.0, %v3743_v35 }
 0x243   : > { %2950 = vst [vmem:[%s4122_s17 + $0x3d0] sm:$0xff] %v2822_v55  ;;  %v2629_v14 = vadd.f32 %v3739_v8, %v2628_v60  ;;  %3748 = vrcp.f32 %v776_v11  ;;  %v2649_v34 = vand.u32 2147483647, %v776_v11  ;;  %v2651_v29 = vand.u32 2147483648, %v776_v11 }
 0x244   : > { %v3745_v19 = vpop.eup %3744  ;;  %3750 = vrcp.f32 %v777_v22  ;;  %v2664_v45 = vand.u32 2147483647, %v777_v22  ;;  %v2666_v2 = vand.u32 2147483648, %v777_v22  ;;  %vm2645_vm0 = vweird.f32 %v776_v11 }
 0x245   : > { %v3747_v49 = vpop.eup %3746  ;;  %v2633_v32 = vsel %vm2632_vm12, %v3739_v8, %v2629_v14  ;;  %v778_v7 = vadd.f32 1.0, %v3745_v19  ;;  %vm7490_vm4 = vcmp.eq.f32.partialorder %v2649_v34, 8.507059e+37  ;;  %vm2660_vm2 = vweird.f32 %v777_v22 }
 0x246   : > { %v2638_v59 = vsel %vm2635_vm15, %v2637_v56, %v2633_v32  ;;  %v779_v38 = vadd.f32 1.0, %v3747_v49  ;;  %v2652_v57 = vor.u32 1.1754944e-38, %v2651_v29  ;;  %vm7494_vm5 = vcmp.eq.f32.partialorder %v2664_v45, 8.507059e+37 }
 0x247   : > { %v2823_v16 = vmul.f32 %v2638_v59, %v7317_v10  ;;  %3752 = vrcp.f32 %v778_v7  ;;  %v2667_v24 = vor.u32 1.1754944e-38, %v2666_v2  ;;  %vm2675_vm7 = vweird.f32 %v778_v7 }
 0x248   : > { %3754 = vrcp.f32 %v779_v38  ;;  %v2679_v12 = vand.u32 2147483647, %v778_v7  ;;  %v2681_v51 = vand.u32 2147483648, %v778_v7  ;;  %vm2690_vm9 = vweird.f32 %v779_v38 }
 0x249   : > { %2951 = vst [vmem:[%s4122_s17 + $0x3d8] sm:$0xff] %v2823_v16  ;;  %v3749_v43 = vpop.eup %3748  ;;  %v2696_v42 = vand.u32 2147483648, %v779_v38  ;;  %v2694_v37 = vand.u32 2147483647, %v779_v38 }
 0x24a   : > { %v3751_v58 = vpop.eup %3750  ;;  %v2641_v47 = vmul.f32 %v3749_v43, %v776_v11  ;;  %vm2646_vm1 = vweird.f32 %v3749_v43  ;;  %v2682_v6 = vor.u32 1.1754944e-38, %v2681_v51  ;;  %vm2680_vm13 = vcmp.eq.f32.partialorder %v2679_v12, 8.507059e+37 }
 0x24b   : > { %v2656_v17 = vmul.f32 %v3751_v58, %v777_v22  ;;  %vm2661_vm3 = vweird.f32 %v3751_v58  ;;  %vm7498_vm6 = vmor %vm2645_vm0, %vm2646_vm1  ;;  %v2697_v21 = vor.u32 1.1754944e-38, %v2696_v42  ;;  %vm2695_vm15 = vcmp.eq.f32.partialorder %v2694_v37, 8.507059e+37 }
 0x24c   : > { %v2642_v62 = vsub.f32 1.0, %v2641_v47  ;;  %vm7502_vm8 = vmor %vm2660_vm2, %vm2661_vm3 }
 0x24d   : > { %v2657_v10 = vsub.f32 1.0, %v2656_v17  ;;  %v3753_v15 = vpop.eup %3752 }
 0x24e   : > { %v2643_v23 = vmul.f32 %v3749_v43, %v2642_v62  ;;  %v3755_v26 = vpop.eup %3754  ;;  %v2671_v30 = vmul.f32 %v3753_v15, %v778_v7  ;;  %vm2676_vm10 = vweird.f32 %v3753_v15 }
 0x24f   : > { %v2658_v0 = vmul.f32 %v3751_v58, %v2657_v10  ;;  %v2686_v28 = vmul.f32 %v3755_v26, %v779_v38  ;;  %vm2691_vm14 = vweird.f32 %v3755_v26  ;;  %vm7520_vm11 = vmor %vm2675_vm7, %vm2676_vm10 }
 0x250   : > { %v2644_v25 = vadd.f32 %v3749_v43, %v2643_v23  ;;  %v2672_v27 = vsub.f32 1.0, %v2671_v30  ;;  %vm2692_vm12 = vmor %vm2690_vm9, %vm2691_vm14 }
 0x251   : > { %v2659_v18 = vadd.f32 %v3751_v58, %v2658_v0  ;;  %v2687_v44 = vsub.f32 1.0, %v2686_v28 }
 0x252   : > { %v2648_v52 = vsel %vm7498_vm6, %v3749_v43, %v2644_v25  ;;  %v2673_v1 = vmul.f32 %v3753_v15, %v2672_v27 }
 0x253   : > { %v2653_v8 = vsel %vm7490_vm4, %v2652_v57, %v2648_v52  ;;  %v2663_v20 = vsel %vm7502_vm8, %v3751_v58, %v2659_v18  ;;  %v2688_v13 = vmul.f32 %v3755_v26, %v2687_v44 }
 0x254   : > { %v2824_v63 = vmul.f32 %v2653_v8, %v7395_v53  ;;  %v2668_v54 = vsel %vm7494_vm5, %v2667_v24, %v2663_v20  ;;  %v2674_v36 = vadd.f32 %v3753_v15, %v2673_v1 }
 0x255   : > { %v2825_v31 = vmul.f32 %v2668_v54, %v7416_v40  ;;  %v2689_v53 = vadd.f32 %v3755_v26, %v2688_v13 }
 0x256   : > { %2952 = vst [vmem:[%s4122_s17 + $0x3e0] sm:$0xff] %v2824_v63  ;;  %v2678_v41 = vsel %vm7520_vm11, %v3753_v15, %v2674_v36 }
 0x257   : > { %2953 = vst [vmem:[%s4122_s17 + $0x3e8] sm:$0xff] %v2825_v31  ;;  %v2683_v39 = vsel %vm2680_vm13, %v2682_v6, %v2678_v41  ;;  %v2693_v40 = vsel %vm2692_vm12, %v3755_v26, %v2689_v53 }
 0x258   : > { %v2826_v46 = vmul.f32 %v2683_v39, %v7439_v61  ;;  %v2698_v50 = vsel %vm2695_vm15, %v2697_v21, %v2693_v40 }
 0x259   : > { %v2827_v55 = vmul.f32 %v2698_v50, %v7442_v3 }
 0x25a   : > { %2954 = vst [vmem:[%s4122_s17 + $0x3f0] sm:$0xff] %v2826_v46 }
 0x25b   : > { %2955 = vst [vmem:[%s4122_s17 + $0x3f8] sm:$0xff] %v2827_v55 }
 0x25c   : > { %3813 = shalt.err (!%p3810_p4)
}
 0x25d   : > { %s3856_s16 = smov 4096   ;;  %s3857_s20 = smov 256  }
 0x25e   : > { %3196 = dma.vmem_to_hbm [thread:$0]  (%p3918_p11), %s2971_s28, 16384, %s2973_s29, %s2957_s30, %s3856_s16, %s3856_s16, %s3857_s20  }
 0x25f PF: > { %s2987_s21 = sand.u32 1, %s3840_s6   ;;  %p8060_p7 = scmp.ge.s32.totalorder %s3852_s9, 2 }
 0x260   : > { %s2988_s22 = scalar_lea.sflag [#allocation4], %s2987_s21 }
 0x261   : > { %p3203_p5 = pnand %p8060_p7, %p3922_p12 }
 0x263   : > { %p3204_p8 = pneg %p3203_p5 }
 0x265   : > { %3835 = dma.done.wait (%p3204_p8), %s2988_s22, 16384  }
 0x266   : > { %3837 = vsyncadd (%p3204_p8), %s2988_s22, 4294950912  ;;  %p14_p10 = scmp.ge.s32.totalorder %s3893_s12, 4   ;;  %s8061_s6 = smov %s3844_s7 }
 0x267   : > { %s8062_s7 = smov %s3848_s8  ;;  %s8063_s8 = smov %s3905_s15 }
 0x268   : > { %s8064_s9 = smov %s3893_s12  ;;  %16 = sbr.rel (!%p14_p10) target bundleno = 5 (0x5), region = 69 }
 0x26d   :  { %2994 = vsyncpa [#allocation3], 1 }
 0x26e   :  { %2996 = vsyncpa [#allocation3 + $0x1], 1 }
 0x26f   :  { %2997 = vsyncpa [#allocation4], 1 }
 0x270   :  { %2999 = vsyncpa [#allocation4 + $0x1], 1 }

</bundles_post_ra>
